<compile_context>
chip_gen: v7x
topology: tpu7x:2x2x1
jax: 0.10.0
libtpu: 0.0.40
codegen_flags: <defaults>
</compile_context>

<pallas_src>
import jax
import jax.numpy as jnp
from jax import lax
from jax.experimental import pallas as pl
from jax.experimental.pallas import tpu as pltpu

EPS = 1e-5
NEG_SLOPE = 0.01
LANE = 128
VMEM_LIMIT = 32 * 1024 * 1024  # explicit scoped-VMEM limit (above v5e default)


def _leaky(v):
    return jnp.where(v > 0, v, NEG_SLOPE * v)


def _round_up(n, m):
    return ((n + m - 1) // m) * m


def _pad_axis(a, axis, target):
    pad = target - a.shape[axis]
    if pad == 0:
        return a
    widths = [(0, 0)] * a.ndim
    widths[axis] = (0, pad)
    return jnp.pad(a, widths)


def _pick_tile_m(m):
    # Largest bf16-friendly tile (multiple of 16) that divides M, preferring
    # >=2 grid steps so the cross-tile stat accumulation is exercised.
    for t in (512, 256, 128, 64, 32, 16):
        if t < m and m % t == 0:
            return t
    return m


def _finalize_bn(sum_, ssq, gamma, beta, count):
    # Single-pass statistics: var = E[v^2] - mean^2 (f32 accumulators).
    mean = sum_ / count                      # (1, C)
    var = ssq / count - mean * mean
    rstd = lax.rsqrt(var + EPS)
    scale = gamma.reshape(1, -1) * rstd
    shift = beta.reshape(1, -1) - mean * scale
    return scale, shift


# --------------------------------------------------------------------------
# Kernel A: 1x1 conv (matmul) + BN_mid sum / sum-of-squares accumulation.
# Grid over M row tiles; stats outputs are resident accumulators ("arbitrary").
# --------------------------------------------------------------------------
def conv1_stats_kernel(x_ref, w1_ref, y_ref, sum_ref, ssq_ref):
    y = jnp.dot(x_ref[...], w1_ref[...],
                preferred_element_type=jnp.float32)          # (TM, CmidP) f32
    y_ref[...] = y.astype(y_ref.dtype)                        # bf16 to HBM

    @pl.when(pl.program_id(0) == 0)
    def _():
        sum_ref[...] = jnp.zeros_like(sum_ref)
        ssq_ref[...] = jnp.zeros_like(ssq_ref)

    sum_ref[...] += jnp.sum(y, axis=0, keepdims=True)
    ssq_ref[...] += jnp.sum(y * y, axis=0, keepdims=True)


# --------------------------------------------------------------------------
# Kernel B: BN_mid affine + LeakyReLU, 3x3 conv as 9 shifted matmuls,
# residual add, LeakyReLU, BN_out stat accumulation.  Grid over batch images.
# --------------------------------------------------------------------------
def conv3_res_stats_kernel(y_ref, x_ref, w2_ref, scale_ref, shift_ref,
                           z_ref, sum_ref, ssq_ref, ypad_ref, acc_ref):
    H, W = y_ref.shape[1], y_ref.shape[2]
    CmidP = y_ref.shape[3]
    CoutP = z_ref.shape[3]

    # BN_mid normalization + LeakyReLU in f32 (stats were computed globally).
    y = y_ref[0].astype(jnp.float32)                          # (H, W, CmidP)
    y_act = _leaky(y * scale_ref[...] + shift_ref[...])

    # Zero-padded activation in VMEM scratch (no HBM im2col, no XLA pad op).
    ypad_ref[...] = jnp.zeros_like(ypad_ref)
    ypad_ref[1:H + 1, 1:W + 1, :] = y_act

    # 3x3 conv = 9 shifted-window matmuls accumulated in f32.
    acc_ref[...] = jnp.zeros_like(acc_ref)
    for dy in range(3):
        for dx in range(3):
            patch = ypad_ref[dy:dy + H, dx:dx + W, :].reshape(H * W, CmidP)
            acc_ref[...] += jnp.dot(patch.astype(jnp.bfloat16),
                                    w2_ref[dy * 3 + dx],
                                    preferred_element_type=jnp.float32)

    # Residual add + LeakyReLU (f32), store pre-BN_out activation as bf16.
    x = x_ref[0].astype(jnp.float32).reshape(H * W, CoutP)
    z = _leaky(x + acc_ref[...])
    z_ref[0] = z.reshape(H, W, CoutP).astype(z_ref.dtype)

    @pl.when(pl.program_id(0) == 0)
    def _():
        sum_ref[...] = jnp.zeros_like(sum_ref)
        ssq_ref[...] = jnp.zeros_like(ssq_ref)

    sum_ref[...] += jnp.sum(z, axis=0, keepdims=True)
    ssq_ref[...] += jnp.sum(z * z, axis=0, keepdims=True)


# --------------------------------------------------------------------------
# Kernel C: BN_out normalization (scale/shift already folded).  "parallel".
# --------------------------------------------------------------------------
def bn_out_kernel(z_ref, scale_ref, shift_ref, o_ref):
    z = z_ref[...].astype(jnp.float32)
    o_ref[...] = (z * scale_ref[...] + shift_ref[...]).astype(o_ref.dtype)


# --------------------------------------------------------------------------
# Wrapper: Residual.forward
# --------------------------------------------------------------------------
def residual_forward(x_nchw, w1, w2, gamma_mid, beta_mid, gamma_out, beta_out):
    N, Cin, H, W = x_nchw.shape
    Cmid = w1.shape[0]
    Cout = w2.shape[0]
    assert Cin == Cout, "residual add requires in_channels == out_channels"
    M = N * H * W

    CinP = _round_up(Cin, LANE)
    CmidP = _round_up(Cmid, LANE)
    CoutP = _round_up(Cout, LANE)
    TM = _pick_tile_m(M)

    # ---- layout glue: NCHW -> NHWC, lane-pad channels, cast to bf16 ----
    x_nhwc = jnp.transpose(x_nchw, (0, 2, 3, 1))                  # (N,H,W,Cin)
    x_p = _pad_axis(x_nhwc, 3, CinP).astype(jnp.bfloat16)         # (N,H,W,CinP)
    x2d = x_p.reshape(M, CinP)

    w1_mat = jnp.transpose(w1[:, :, 0, 0], (1, 0))                # (Cin,Cmid)
    w1_mat = _pad_axis(_pad_axis(w1_mat, 0, CinP), 1, CmidP).astype(jnp.bfloat16)

    # (Cout,Cmid,3,3) -> (kh,kw,Cmid,Cout) -> (9,Cmid,Cout), lane-padded.
    w2_mat = jnp.transpose(w2, (2, 3, 1, 0)).reshape(9, Cmid, Cout)
    w2_mat = _pad_axis(_pad_axis(w2_mat, 1, CmidP), 2, CoutP).astype(jnp.bfloat16)

    g_mid = _pad_axis(gamma_mid, 0, CmidP)
    b_mid = _pad_axis(beta_mid, 0, CmidP)
    g_out = _pad_axis(gamma_out, 0, CoutP)
    b_out = _pad_axis(beta_out, 0, CoutP)

    # ---- Kernel A: conv1x1 + BN_mid stats --------------------------------
    y2d, mid_sum, mid_ssq = pl.pallas_call(
        conv1_stats_kernel,
        grid=(M // TM,),
        in_specs=[
            pl.BlockSpec((TM, CinP), lambda i: (i, 0)),
            pl.BlockSpec((CinP, CmidP), lambda i: (0, 0)),
        ],
        out_specs=(
            pl.BlockSpec((TM, CmidP), lambda i: (i, 0)),
            pl.BlockSpec((1, CmidP), lambda i: (0, 0)),
            pl.BlockSpec((1, CmidP), lambda i: (0, 0)),
        ),
        out_shape=(
            jax.ShapeDtypeStruct((M, CmidP), jnp.bfloat16),
            jax.ShapeDtypeStruct((1, CmidP), jnp.float32),
            jax.ShapeDtypeStruct((1, CmidP), jnp.float32),
        ),
        compiler_params=pltpu.CompilerParams(
            dimension_semantics=("arbitrary",),
            vmem_limit_bytes=VMEM_LIMIT,
        ),
    )(x2d, w1_mat)

    scale_mid, shift_mid = _finalize_bn(mid_sum, mid_ssq, g_mid, b_mid, float(M))

    # ---- Kernel B: BN_mid+LReLU, conv3x3 (9 shifted matmuls), residual ----
    y4d = y2d.reshape(N, H, W, CmidP)
    z4d, out_sum, out_ssq = pl.pallas_call(
        conv3_res_stats_kernel,
        grid=(N,),
        in_specs=[
            pl.BlockSpec((1, H, W, CmidP), lambda n: (n, 0, 0, 0)),
            pl.BlockSpec((1, H, W, CoutP), lambda n: (n, 0, 0, 0)),
            pl.BlockSpec((9, CmidP, CoutP), lambda n: (0, 0, 0)),
            pl.BlockSpec((1, CmidP), lambda n: (0, 0)),
            pl.BlockSpec((1, CmidP), lambda n: (0, 0)),
        ],
        out_specs=(
            pl.BlockSpec((1, H, W, CoutP), lambda n: (n, 0, 0, 0)),
            pl.BlockSpec((1, CoutP), lambda n: (0, 0)),
            pl.BlockSpec((1, CoutP), lambda n: (0, 0)),
        ),
        out_shape=(
            jax.ShapeDtypeStruct((N, H, W, CoutP), jnp.bfloat16),
            jax.ShapeDtypeStruct((1, CoutP), jnp.float32),
            jax.ShapeDtypeStruct((1, CoutP), jnp.float32),
        ),
        scratch_shapes=[
            pltpu.VMEM((H + 2, W + 2, CmidP), jnp.float32),   # padded activation
            pltpu.VMEM((H * W, CoutP), jnp.float32),          # conv accumulator
        ],
        compiler_params=pltpu.CompilerParams(
            dimension_semantics=("arbitrary",),
            vmem_limit_bytes=VMEM_LIMIT,
        ),
    )(y4d, x_p, w2_mat, scale_mid, shift_mid)

    scale_out, shift_out = _finalize_bn(out_sum, out_ssq, g_out, b_out, float(M))

    # ---- Kernel C: BN_out normalization (megacore-parallel over M) --------
    z2d = z4d.reshape(M, CoutP)
    out2d = pl.pallas_call(
        bn_out_kernel,
        grid=(M // TM,),
        in_specs=[
            pl.BlockSpec((TM, CoutP), lambda i: (i, 0)),
            pl.BlockSpec((1, CoutP), lambda i: (0, 0)),
            pl.BlockSpec((1, CoutP), lambda i: (0, 0)),
        ],
        out_specs=pl.BlockSpec((TM, CoutP), lambda i: (i, 0)),
        out_shape=jax.ShapeDtypeStruct((M, CoutP), jnp.float32),
        compiler_params=pltpu.CompilerParams(
            dimension_semantics=("parallel",),
            vmem_limit_bytes=VMEM_LIMIT,
        ),
    )(z2d, scale_out, shift_out)

    # strip channel padding, NHWC -> NCHW
    out = out2d[:, :Cout].reshape(N, H, W, Cout)
    return jnp.transpose(out, (0, 3, 1, 2))


# --------------------------------------------------------------------------
# Pure-JAX reference (independent path via lax.conv) for the sanity check.
# --------------------------------------------------------------------------
def residual_reference(x, w1, w2, gamma_mid, beta_mid, gamma_out, beta_out):
    def bn(v, g, b):
        mean = jnp.mean(v, axis=(0, 2, 3), keepdims=True)
        var = jnp.mean((v - mean) ** 2, axis=(0, 2, 3), keepdims=True)
        return (v - mean) * lax.rsqrt(var + EPS) * g.reshape(1, -1, 1, 1) \
            + b.reshape(1, -1, 1, 1)

    dn = ("NCHW", "OIHW", "NCHW")
    y = lax.conv_general_dilated(x, w1, (1, 1), "VALID", dimension_numbers=dn)
    y = _leaky(bn(y, gamma_mid, beta_mid))
    y = lax.conv_general_dilated(y, w2, (1, 1), ((1, 1), (1, 1)),
                                 dimension_numbers=dn)
    z = _leaky(x + y)
    return bn(z, gamma_out, beta_out)


if __name__ == "__main__":
    # Small shapes; residual add requires in_channels == out_channels.
    N, Cin, Cmid, Cout, H, W = 2, 4, 8, 4, 16, 16

    key = jax.random.PRNGKey(0)
    kx, k1, k2 = jax.random.split(key, 3)
    x = jax.random.normal(kx, (N, Cin, H, W), dtype=jnp.float32)
    w1 = jax.random.normal(k1, (Cmid, Cin, 1, 1), dtype=jnp.float32) * 0.1
    w2 = jax.random.normal(k2, (Cout, Cmid, 3, 3), dtype=jnp.float32) * 0.1
    # BatchNorm affine params at PyTorch defaults (gamma=1, beta=0).
    gamma_mid = jnp.ones((Cmid,), jnp.float32)
    beta_mid = jnp.zeros((Cmid,), jnp.float32)
    gamma_out = jnp.ones((Cout,), jnp.float32)
    beta_out = jnp.zeros((Cout,), jnp.float32)

    fwd = jax.jit(residual_forward)
    out = jax.block_until_ready(
        fwd(x, w1, w2, gamma_mid, beta_mid, gamma_out, beta_out))

    ref = residual_reference(x, w1, w2, gamma_mid, beta_mid, gamma_out, beta_out)
    assert out.shape == (N, Cout, H, W)
    # bf16 MXU inputs + bf16 intermediates -> relaxed tolerance vs f32 reference.
    err = float(jnp.max(jnp.abs(out - ref)))
    assert err < 5e-2, err

    print("KERNEL_OK")
</pallas_src>

<mosaic_0001>
module attributes {stable_mosaic.version = 11 : i64} {
  func.func @conv1_stats_kernel(%arg0: i32, %arg1: memref<256x128xbf16, #tpu.memory_space<vmem>>, %arg2: memref<128x128xbf16, #tpu.memory_space<vmem>>, %arg3: memref<256x128xbf16, #tpu.memory_space<vmem>>, %arg4: memref<1x128xf32, #tpu.memory_space<vmem>>, %arg5: memref<1x128xf32, #tpu.memory_space<vmem>>) attributes {dimension_semantics = [#tpu.dimension_semantics<arbitrary>], iteration_bounds = array<i64: 2>, scalar_prefetch = 0 : i64, scratch_operands = 0 : i64, tpu.core_type = #tpu.core_type<tc>, window_params = [{transform_indices = @transform_0, window_bounds = array<i64: 256, 128>}, {pipeline_mode = #tpu.pipeline_mode<synchronous>, transform_indices = @transform_1, window_bounds = array<i64: 128, 128>}, {transform_indices = @transform_2, window_bounds = array<i64: 256, 128>}, {pipeline_mode = #tpu.pipeline_mode<synchronous>, transform_indices = @transform_3, window_bounds = array<i64: 1, 128>}, {pipeline_mode = #tpu.pipeline_mode<synchronous>, transform_indices = @transform_4, window_bounds = array<i64: 1, 128>}]} {
    %c0 = arith.constant 0 : index
    %c0_0 = arith.constant 0 : index
    %0 = vector.load %arg1[%c0, %c0_0] : memref<256x128xbf16, #tpu.memory_space<vmem>>, vector<256x128xbf16>
    %c0_1 = arith.constant 0 : index
    %c0_2 = arith.constant 0 : index
    %1 = vector.load %arg2[%c0_1, %c0_2] : memref<128x128xbf16, #tpu.memory_space<vmem>>, vector<128x128xbf16>
    %cst = arith.constant dense<0.000000e+00> : vector<256x128xf32>
    %2 = tpu.matmul %0, %1, %cst {dimension_numbers = #tpu.dot_dimension_numbers<[1], [0], [0], [1], [0, 0, 1, 1], [], []>} : vector<256x128xbf16>, vector<128x128xbf16>, vector<256x128xf32> -> vector<256x128xf32>
    %3 = arith.truncf %2 : vector<256x128xf32> to vector<256x128xbf16>
    %c0_3 = arith.constant 0 : index
    %c0_4 = arith.constant 0 : index
    %4 = vector.load %arg3[%c0_3, %c0_4] : memref<256x128xbf16, #tpu.memory_space<vmem>>, vector<256x128xbf16>
    tpu.vector_store %arg3[%c0_3, %c0_4], %3 {strides = array<i32>} : memref<256x128xbf16, #tpu.memory_space<vmem>>, vector<256x128xbf16>,
    %c0_i32 = arith.constant 0 : i32
    %5 = arith.cmpi eq, %arg0, %c0_i32 : i32
    %6 = arith.extui %5 : i1 to i32
    %c0_i32_5 = arith.constant 0 : i32
    %7 = arith.cmpi ne, %6, %c0_i32_5 : i32
    scf.if %7 {
      %cst_16 = arith.constant 0.000000e+00 : f32
      %19 = vector.broadcast %cst_16 : f32 to vector<1x128xf32>
      %c0_17 = arith.constant 0 : index
      %c0_18 = arith.constant 0 : index
      %20 = vector.load %arg4[%c0_17, %c0_18] : memref<1x128xf32, #tpu.memory_space<vmem>>, vector<1x128xf32>
      tpu.vector_store %arg4[%c0_17, %c0_18], %19 {strides = array<i32>} : memref<1x128xf32, #tpu.memory_space<vmem>>, vector<1x128xf32>,
      %cst_19 = arith.constant 0.000000e+00 : f32
      %21 = vector.broadcast %cst_19 : f32 to vector<1x128xf32>
      %c0_20 = arith.constant 0 : index
      %c0_21 = arith.constant 0 : index
      %22 = vector.load %arg5[%c0_20, %c0_21] : memref<1x128xf32, #tpu.memory_space<vmem>>, vector<1x128xf32>
      tpu.vector_store %arg5[%c0_20, %c0_21], %21 {strides = array<i32>} : memref<1x128xf32, #tpu.memory_space<vmem>>, vector<1x128xf32>,
    } else {
    }
    %c0_6 = arith.constant 0 : index
    %c0_7 = arith.constant 0 : index
    %8 = vector.load %arg4[%c0_6, %c0_7] : memref<1x128xf32, #tpu.memory_space<vmem>>, vector<1x128xf32>
    %cst_8 = arith.constant dense<0.000000e+00> : vector<128xf32>
    %9 = vector.multi_reduction <add>, %2, %cst_8 [0] : vector<256x128xf32> to vector<128xf32>
    %10 = vector.shape_cast %9 : vector<128xf32> to vector<1x128xf32>
    %11 = arith.addf %8, %10 : vector<1x128xf32>
    %c0_9 = arith.constant 0 : index
    %c0_10 = arith.constant 0 : index
    %12 = vector.load %arg4[%c0_9, %c0_10] : memref<1x128xf32, #tpu.memory_space<vmem>>, vector<1x128xf32>
    tpu.vector_store %arg4[%c0_9, %c0_10], %11 {strides = array<i32>} : memref<1x128xf32, #tpu.memory_space<vmem>>, vector<1x128xf32>,
    %c0_11 = arith.constant 0 : index
    %c0_12 = arith.constant 0 : index
    %13 = vector.load %arg5[%c0_11, %c0_12] : memref<1x128xf32, #tpu.memory_space<vmem>>, vector<1x128xf32>
    %14 = arith.mulf %2, %2 : vector<256x128xf32>
    %cst_13 = arith.constant dense<0.000000e+00> : vector<128xf32>
    %15 = vector.multi_reduction <add>, %14, %cst_13 [0] : vector<256x128xf32> to vector<128xf32>
    %16 = vector.shape_cast %15 : vector<128xf32> to vector<1x128xf32>
    %17 = arith.addf %13, %16 : vector<1x128xf32>
    %c0_14 = arith.constant 0 : index
    %c0_15 = arith.constant 0 : index
    %18 = vector.load %arg5[%c0_14, %c0_15] : memref<1x128xf32, #tpu.memory_space<vmem>>, vector<1x128xf32>
    tpu.vector_store %arg5[%c0_14, %c0_15], %17 {strides = array<i32>} : memref<1x128xf32, #tpu.memory_space<vmem>>, vector<1x128xf32>,
    return
  }
  func.func @transform_0(%arg0: i32) -> (i32, i32) {
    %c0_i32 = arith.constant 0 : i32
    %c0_i32_0 = arith.constant 0 : i32
    return %arg0, %c0_i32 : i32, i32
  }
  func.func @transform_1(%arg0: i32) -> (i32, i32) {
    %c0_i32 = arith.constant 0 : i32
    %c0_i32_0 = arith.constant 0 : i32
    %c0_i32_1 = arith.constant 0 : i32
    return %c0_i32, %c0_i32_0 : i32, i32
  }
  func.func @transform_2(%arg0: i32) -> (i32, i32) {
    %c0_i32 = arith.constant 0 : i32
    %c0_i32_0 = arith.constant 0 : i32
    return %arg0, %c0_i32 : i32, i32
  }
  func.func @transform_3(%arg0: i32) -> (i32, i32) {
    %c0_i32 = arith.constant 0 : i32
    %c0_i32_0 = arith.constant 0 : i32
    %c0_i32_1 = arith.constant 0 : i32
    return %c0_i32, %c0_i32_0 : i32, i32
  }
  func.func @transform_4(%arg0: i32) -> (i32, i32) {
    %c0_i32 = arith.constant 0 : i32
    %c0_i32_0 = arith.constant 0 : i32
    %c0_i32_1 = arith.constant 0 : i32
    return %c0_i32, %c0_i32_0 : i32, i32
  }
}

module attributes {stable_mosaic.version = 11 : i64} {
  func.func @conv3_res_stats_kernel(%arg0: i32, %arg1: memref<1x16x16x128xbf16, #tpu.memory_space<vmem>>, %arg2: memref<1x16x16x128xbf16, #tpu.memory_space<vmem>>, %arg3: memref<9x128x128xbf16, #tpu.memory_space<vmem>>, %arg4: memref<1x128xf32, #tpu.memory_space<vmem>>, %arg5: memref<1x128xf32, #tpu.memory_space<vmem>>, %arg6: memref<1x16x16x128xbf16, #tpu.memory_space<vmem>>, %arg7: memref<1x128xf32, #tpu.memory_space<vmem>>, %arg8: memref<1x128xf32, #tpu.memory_space<vmem>>, %arg9: memref<18x18x128xf32, #tpu.memory_space<vmem>>, %arg10: memref<256x128xf32, #tpu.memory_space<vmem>>) attributes {dimension_semantics = [#tpu.dimension_semantics<arbitrary>], iteration_bounds = array<i64: 2>, scalar_prefetch = 0 : i64, scratch_operands = 2 : i64, tpu.core_type = #tpu.core_type<tc>, window_params = [{transform_indices = @transform_0, window_bounds = array<i64: 1, 16, 16, 128>}, {transform_indices = @transform_1, window_bounds = array<i64: 1, 16, 16, 128>}, {pipeline_mode = #tpu.pipeline_mode<synchronous>, transform_indices = @transform_2, window_bounds = array<i64: 9, 128, 128>}, {pipeline_mode = #tpu.pipeline_mode<synchronous>, transform_indices = @transform_3, window_bounds = array<i64: 1, 128>}, {pipeline_mode = #tpu.pipeline_mode<synchronous>, transform_indices = @transform_4, window_bounds = array<i64: 1, 128>}, {transform_indices = @transform_5, window_bounds = array<i64: 1, 16, 16, 128>}, {pipeline_mode = #tpu.pipeline_mode<synchronous>, transform_indices = @transform_6, window_bounds = array<i64: 1, 128>}, {pipeline_mode = #tpu.pipeline_mode<synchronous>, transform_indices = @transform_7, window_bounds = array<i64: 1, 128>}]} {
    %c0 = arith.constant 0 : index
    %c0_0 = arith.constant 0 : index
    %c0_1 = arith.constant 0 : index
    %c0_2 = arith.constant 0 : index
    %0 = vector.load %arg1[%c0, %c0_0, %c0_1, %c0_2] : memref<1x16x16x128xbf16, #tpu.memory_space<vmem>>, vector<1x16x16x128xbf16>
    %1 = vector.shape_cast %0 : vector<1x16x16x128xbf16> to vector<16x16x128xbf16>
    %2 = arith.extf %1 : vector<16x16x128xbf16> to vector<16x16x128xf32>
    %c0_3 = arith.constant 0 : index
    %c0_4 = arith.constant 0 : index
    %3 = vector.load %arg4[%c0_3, %c0_4] : memref<1x128xf32, #tpu.memory_space<vmem>>, vector<1x128xf32>
    %4 = vector.shape_cast %3 : vector<1x128xf32> to vector<1x1x128xf32>
    %5 = vector.broadcast %4 : vector<1x1x128xf32> to vector<16x16x128xf32>
    %6 = arith.mulf %2, %5 : vector<16x16x128xf32>
    %c0_5 = arith.constant 0 : index
    %c0_6 = arith.constant 0 : index
    %7 = vector.load %arg5[%c0_5, %c0_6] : memref<1x128xf32, #tpu.memory_space<vmem>>, vector<1x128xf32>
    %8 = vector.shape_cast %7 : vector<1x128xf32> to vector<1x1x128xf32>
    %9 = vector.broadcast %8 : vector<1x1x128xf32> to vector<16x16x128xf32>
    %10 = arith.addf %6, %9 : vector<16x16x128xf32>
    %cst = arith.constant 0.000000e+00 : f32
    %11 = vector.broadcast %cst : f32 to vector<16x16x128xf32>
    %12 = arith.cmpf ogt, %10, %11 : vector<16x16x128xf32>
    %cst_7 = arith.constant 0.00999999977 : f32
    %13 = vector.broadcast %cst_7 : f32 to vector<16x16x128xf32>
    %14 = arith.mulf %13, %10 : vector<16x16x128xf32>
    %15 = arith.select %12, %10, %14 : vector<16x16x128xi1>, vector<16x16x128xf32>
    %cst_8 = arith.constant 0.000000e+00 : f32
    %16 = vector.broadcast %cst_8 : f32 to vector<18x18x128xf32>
    %c0_9 = arith.constant 0 : index
    %c0_10 = arith.constant 0 : index
    %c0_11 = arith.constant 0 : index
    %17 = vector.load %arg9[%c0_9, %c0_10, %c0_11] : memref<18x18x128xf32, #tpu.memory_space<vmem>>, vector<18x18x128xf32>
    tpu.vector_store %arg9[%c0_9, %c0_10, %c0_11], %16 {strides = array<i32>} : memref<18x18x128xf32, #tpu.memory_space<vmem>>, vector<18x18x128xf32>,
    %c1 = arith.constant 1 : index
    %c1_12 = arith.constant 1 : index
    %c0_13 = arith.constant 0 : index
    %18 = vector.load %arg9[%c1, %c1_12, %c0_13] : memref<18x18x128xf32, #tpu.memory_space<vmem>>, vector<16x16x128xf32>
    tpu.vector_store %arg9[%c1, %c1_12, %c0_13], %15 {strides = array<i32>} : memref<18x18x128xf32, #tpu.memory_space<vmem>>, vector<16x16x128xf32>,
    %cst_14 = arith.constant 0.000000e+00 : f32
    %19 = vector.broadcast %cst_14 : f32 to vector<256x128xf32>
    %c0_15 = arith.constant 0 : index
    %c0_16 = arith.constant 0 : index
    %20 = vector.load %arg10[%c0_15, %c0_16] : memref<256x128xf32, #tpu.memory_space<vmem>>, vector<256x128xf32>
    tpu.vector_store %arg10[%c0_15, %c0_16], %19 {strides = array<i32>} : memref<256x128xf32, #tpu.memory_space<vmem>>, vector<256x128xf32>,
    %c0_17 = arith.constant 0 : index
    %c0_18 = arith.constant 0 : index
    %c0_19 = arith.constant 0 : index
    %21 = vector.load %arg9[%c0_17, %c0_18, %c0_19] : memref<18x18x128xf32, #tpu.memory_space<vmem>>, vector<16x16x128xf32>
    %22 = vector.shape_cast %21 : vector<16x16x128xf32> to vector<256x128xf32>
    %c0_20 = arith.constant 0 : index
    %c0_21 = arith.constant 0 : index
    %23 = vector.load %arg10[%c0_20, %c0_21] : memref<256x128xf32, #tpu.memory_space<vmem>>, vector<256x128xf32>
    %24 = arith.truncf %22 : vector<256x128xf32> to vector<256x128xbf16>
    %c0_22 = arith.constant 0 : index
    %c0_23 = arith.constant 0 : index
    %c0_24 = arith.constant 0 : index
    %25 = vector.load %arg3[%c0_22, %c0_23, %c0_24] : memref<9x128x128xbf16, #tpu.memory_space<vmem>>, vector<1x128x128xbf16>
    %26 = vector.shape_cast %25 : vector<1x128x128xbf16> to vector<128x128xbf16>
    %cst_25 = arith.constant dense<0.000000e+00> : vector<256x128xf32>
    %27 = tpu.matmul %24, %26, %cst_25 {dimension_numbers = #tpu.dot_dimension_numbers<[1], [0], [0], [1], [0, 0, 1, 1], [], []>} : vector<256x128xbf16>, vector<128x128xbf16>, vector<256x128xf32> -> vector<256x128xf32>
    %28 = arith.addf %23, %27 : vector<256x128xf32>
    %c0_26 = arith.constant 0 : index
    %c0_27 = arith.constant 0 : index
    %29 = vector.load %arg10[%c0_26, %c0_27] : memref<256x128xf32, #tpu.memory_space<vmem>>, vector<256x128xf32>
    tpu.vector_store %arg10[%c0_26, %c0_27], %28 {strides = array<i32>} : memref<256x128xf32, #tpu.memory_space<vmem>>, vector<256x128xf32>,
    %c0_28 = arith.constant 0 : index
    %c1_29 = arith.constant 1 : index
    %c0_30 = arith.constant 0 : index
    %30 = vector.load %arg9[%c0_28, %c1_29, %c0_30] : memref<18x18x128xf32, #tpu.memory_space<vmem>>, vector<16x16x128xf32>
    %31 = vector.shape_cast %30 : vector<16x16x128xf32> to vector<256x128xf32>
    %c0_31 = arith.constant 0 : index
    %c0_32 = arith.constant 0 : index
    %32 = vector.load %arg10[%c0_31, %c0_32] : memref<256x128xf32, #tpu.memory_space<vmem>>, vector<256x128xf32>
    %33 = arith.truncf %31 : vector<256x128xf32> to vector<256x128xbf16>
    %c1_33 = arith.constant 1 : index
    %c0_34 = arith.constant 0 : index
    %c0_35 = arith.constant 0 : index
    %34 = vector.load %arg3[%c1_33, %c0_34, %c0_35] : memref<9x128x128xbf16, #tpu.memory_space<vmem>>, vector<1x128x128xbf16>
    %35 = vector.shape_cast %34 : vector<1x128x128xbf16> to vector<128x128xbf16>
    %cst_36 = arith.constant dense<0.000000e+00> : vector<256x128xf32>
    %36 = tpu.matmul %33, %35, %cst_36 {dimension_numbers = #tpu.dot_dimension_numbers<[1], [0], [0], [1], [0, 0, 1, 1], [], []>} : vector<256x128xbf16>, vector<128x128xbf16>, vector<256x128xf32> -> vector<256x128xf32>
    %37 = arith.addf %32, %36 : vector<256x128xf32>
    %c0_37 = arith.constant 0 : index
    %c0_38 = arith.constant 0 : index
    %38 = vector.load %arg10[%c0_37, %c0_38] : memref<256x128xf32, #tpu.memory_space<vmem>>, vector<256x128xf32>
    tpu.vector_store %arg10[%c0_37, %c0_38], %37 {strides = array<i32>} : memref<256x128xf32, #tpu.memory_space<vmem>>, vector<256x128xf32>,
    %c0_39 = arith.constant 0 : index
    %c2 = arith.constant 2 : index
    %c0_40 = arith.constant 0 : index
    %39 = vector.load %arg9[%c0_39, %c2, %c0_40] : memref<18x18x128xf32, #tpu.memory_space<vmem>>, vector<16x16x128xf32>
    %40 = vector.shape_cast %39 : vector<16x16x128xf32> to vector<256x128xf32>
    %c0_41 = arith.constant 0 : index
    %c0_42 = arith.constant 0 : index
    %41 = vector.load %arg10[%c0_41, %c0_42] : memref<256x128xf32, #tpu.memory_space<vmem>>, vector<256x128xf32>
    %42 = arith.truncf %40 : vector<256x128xf32> to vector<256x128xbf16>
    %c2_43 = arith.constant 2 : index
    %c0_44 = arith.constant 0 : index
    %c0_45 = arith.constant 0 : index
    %43 = vector.load %arg3[%c2_43, %c0_44, %c0_45] : memref<9x128x128xbf16, #tpu.memory_space<vmem>>, vector<1x128x128xbf16>
    %44 = vector.shape_cast %43 : vector<1x128x128xbf16> to vector<128x128xbf16>
    %cst_46 = arith.constant dense<0.000000e+00> : vector<256x128xf32>
    %45 = tpu.matmul %42, %44, %cst_46 {dimension_numbers = #tpu.dot_dimension_numbers<[1], [0], [0], [1], [0, 0, 1, 1], [], []>} : vector<256x128xbf16>, vector<128x128xbf16>, vector<256x128xf32> -> vector<256x128xf32>
    %46 = arith.addf %41, %45 : vector<256x128xf32>
    %c0_47 = arith.constant 0 : index
    %c0_48 = arith.constant 0 : index
    %47 = vector.load %arg10[%c0_47, %c0_48] : memref<256x128xf32, #tpu.memory_space<vmem>>, vector<256x128xf32>
    tpu.vector_store %arg10[%c0_47, %c0_48], %46 {strides = array<i32>} : memref<256x128xf32, #tpu.memory_space<vmem>>, vector<256x128xf32>,
    %c1_49 = arith.constant 1 : index
    %c0_50 = arith.constant 0 : index
    %c0_51 = arith.constant 0 : index
    %48 = vector.load %arg9[%c1_49, %c0_50, %c0_51] : memref<18x18x128xf32, #tpu.memory_space<vmem>>, vector<16x16x128xf32>
    %49 = vector.shape_cast %48 : vector<16x16x128xf32> to vector<256x128xf32>
    %c0_52 = arith.constant 0 : index
    %c0_53 = arith.constant 0 : index
    %50 = vector.load %arg10[%c0_52, %c0_53] : memref<256x128xf32, #tpu.memory_space<vmem>>, vector<256x128xf32>
    %51 = arith.truncf %49 : vector<256x128xf32> to vector<256x128xbf16>
    %c3 = arith.constant 3 : index
    %c0_54 = arith.constant 0 : index
    %c0_55 = arith.constant 0 : index
    %52 = vector.load %arg3[%c3, %c0_54, %c0_55] : memref<9x128x128xbf16, #tpu.memory_space<vmem>>, vector<1x128x128xbf16>
    %53 = vector.shape_cast %52 : vector<1x128x128xbf16> to vector<128x128xbf16>
    %cst_56 = arith.constant dense<0.000000e+00> : vector<256x128xf32>
    %54 = tpu.matmul %51, %53, %cst_56 {dimension_numbers = #tpu.dot_dimension_numbers<[1], [0], [0], [1], [0, 0, 1, 1], [], []>} : vector<256x128xbf16>, vector<128x128xbf16>, vector<256x128xf32> -> vector<256x128xf32>
    %55 = arith.addf %50, %54 : vector<256x128xf32>
    %c0_57 = arith.constant 0 : index
    %c0_58 = arith.constant 0 : index
    %56 = vector.load %arg10[%c0_57, %c0_58] : memref<256x128xf32, #tpu.memory_space<vmem>>, vector<256x128xf32>
    tpu.vector_store %arg10[%c0_57, %c0_58], %55 {strides = array<i32>} : memref<256x128xf32, #tpu.memory_space<vmem>>, vector<256x128xf32>,
    %c1_59 = arith.constant 1 : index
    %c1_60 = arith.constant 1 : index
    %c0_61 = arith.constant 0 : index
    %57 = vector.load %arg9[%c1_59, %c1_60, %c0_61] : memref<18x18x128xf32, #tpu.memory_space<vmem>>, vector<16x16x128xf32>
    %58 = vector.shape_cast %57 : vector<16x16x128xf32> to vector<256x128xf32>
    %c0_62 = arith.constant 0 : index
    %c0_63 = arith.constant 0 : index
    %59 = vector.load %arg10[%c0_62, %c0_63] : memref<256x128xf32, #tpu.memory_space<vmem>>, vector<256x128xf32>
    %60 = arith.truncf %58 : vector<256x128xf32> to vector<256x128xbf16>
    %c4 = arith.constant 4 : index
    %c0_64 = arith.constant 0 : index
    %c0_65 = arith.constant 0 : index
    %61 = vector.load %arg3[%c4, %c0_64, %c0_65] : memref<9x128x128xbf16, #tpu.memory_space<vmem>>, vector<1x128x128xbf16>
    %62 = vector.shape_cast %61 : vector<1x128x128xbf16> to vector<128x128xbf16>
    %cst_66 = arith.constant dense<0.000000e+00> : vector<256x128xf32>
    %63 = tpu.matmul %60, %62, %cst_66 {dimension_numbers = #tpu.dot_dimension_numbers<[1], [0], [0], [1], [0, 0, 1, 1], [], []>} : vector<256x128xbf16>, vector<128x128xbf16>, vector<256x128xf32> -> vector<256x128xf32>
    %64 = arith.addf %59, %63 : vector<256x128xf32>
    %c0_67 = arith.constant 0 : index
    %c0_68 = arith.constant 0 : index
    %65 = vector.load %arg10[%c0_67, %c0_68] : memref<256x128xf32, #tpu.memory_space<vmem>>, vector<256x128xf32>
    tpu.vector_store %arg10[%c0_67, %c0_68], %64 {strides = array<i32>} : memref<256x128xf32, #tpu.memory_space<vmem>>, vector<256x128xf32>,
    %c1_69 = arith.constant 1 : index
    %c2_70 = arith.constant 2 : index
    %c0_71 = arith.constant 0 : index
    %66 = vector.load %arg9[%c1_69, %c2_70, %c0_71] : memref<18x18x128xf32, #tpu.memory_space<vmem>>, vector<16x16x128xf32>
    %67 = vector.shape_cast %66 : vector<16x16x128xf32> to vector<256x128xf32>
    %c0_72 = arith.constant 0 : index
    %c0_73 = arith.constant 0 : index
    %68 = vector.load %arg10[%c0_72, %c0_73] : memref<256x128xf32, #tpu.memory_space<vmem>>, vector<256x128xf32>
    %69 = arith.truncf %67 : vector<256x128xf32> to vector<256x128xbf16>
    %c5 = arith.constant 5 : index
    %c0_74 = arith.constant 0 : index
    %c0_75 = arith.constant 0 : index
    %70 = vector.load %arg3[%c5, %c0_74, %c0_75] : memref<9x128x128xbf16, #tpu.memory_space<vmem>>, vector<1x128x128xbf16>
    %71 = vector.shape_cast %70 : vector<1x128x128xbf16> to vector<128x128xbf16>
    %cst_76 = arith.constant dense<0.000000e+00> : vector<256x128xf32>
    %72 = tpu.matmul %69, %71, %cst_76 {dimension_numbers = #tpu.dot_dimension_numbers<[1], [0], [0], [1], [0, 0, 1, 1], [], []>} : vector<256x128xbf16>, vector<128x128xbf16>, vector<256x128xf32> -> vector<256x128xf32>
    %73 = arith.addf %68, %72 : vector<256x128xf32>
    %c0_77 = arith.constant 0 : index
    %c0_78 = arith.constant 0 : index
    %74 = vector.load %arg10[%c0_77, %c0_78] : memref<256x128xf32, #tpu.memory_space<vmem>>, vector<256x128xf32>
    tpu.vector_store %arg10[%c0_77, %c0_78], %73 {strides = array<i32>} : memref<256x128xf32, #tpu.memory_space<vmem>>, vector<256x128xf32>,
    %c2_79 = arith.constant 2 : index
    %c0_80 = arith.constant 0 : index
    %c0_81 = arith.constant 0 : index
    %75 = vector.load %arg9[%c2_79, %c0_80, %c0_81] : memref<18x18x128xf32, #tpu.memory_space<vmem>>, vector<16x16x128xf32>
    %76 = vector.shape_cast %75 : vector<16x16x128xf32> to vector<256x128xf32>
    %c0_82 = arith.constant 0 : index
    %c0_83 = arith.constant 0 : index
    %77 = vector.load %arg10[%c0_82, %c0_83] : memref<256x128xf32, #tpu.memory_space<vmem>>, vector<256x128xf32>
    %78 = arith.truncf %76 : vector<256x128xf32> to vector<256x128xbf16>
    %c6 = arith.constant 6 : index
    %c0_84 = arith.constant 0 : index
    %c0_85 = arith.constant 0 : index
    %79 = vector.load %arg3[%c6, %c0_84, %c0_85] : memref<9x128x128xbf16, #tpu.memory_space<vmem>>, vector<1x128x128xbf16>
    %80 = vector.shape_cast %79 : vector<1x128x128xbf16> to vector<128x128xbf16>
    %cst_86 = arith.constant dense<0.000000e+00> : vector<256x128xf32>
    %81 = tpu.matmul %78, %80, %cst_86 {dimension_numbers = #tpu.dot_dimension_numbers<[1], [0], [0], [1], [0, 0, 1, 1], [], []>} : vector<256x128xbf16>, vector<128x128xbf16>, vector<256x128xf32> -> vector<256x128xf32>
    %82 = arith.addf %77, %81 : vector<256x128xf32>
    %c0_87 = arith.constant 0 : index
    %c0_88 = arith.constant 0 : index
    %83 = vector.load %arg10[%c0_87, %c0_88] : memref<256x128xf32, #tpu.memory_space<vmem>>, vector<256x128xf32>
    tpu.vector_store %arg10[%c0_87, %c0_88], %82 {strides = array<i32>} : memref<256x128xf32, #tpu.memory_space<vmem>>, vector<256x128xf32>,
    %c2_89 = arith.constant 2 : index
    %c1_90 = arith.constant 1 : index
    %c0_91 = arith.constant 0 : index
    %84 = vector.load %arg9[%c2_89, %c1_90, %c0_91] : memref<18x18x128xf32, #tpu.memory_space<vmem>>, vector<16x16x128xf32>
    %85 = vector.shape_cast %84 : vector<16x16x128xf32> to vector<256x128xf32>
    %c0_92 = arith.constant 0 : index
    %c0_93 = arith.constant 0 : index
    %86 = vector.load %arg10[%c0_92, %c0_93] : memref<256x128xf32, #tpu.memory_space<vmem>>, vector<256x128xf32>
    %87 = arith.truncf %85 : vector<256x128xf32> to vector<256x128xbf16>
    %c7 = arith.constant 7 : index
    %c0_94 = arith.constant 0 : index
    %c0_95 = arith.constant 0 : index
    %88 = vector.load %arg3[%c7, %c0_94, %c0_95] : memref<9x128x128xbf16, #tpu.memory_space<vmem>>, vector<1x128x128xbf16>
    %89 = vector.shape_cast %88 : vector<1x128x128xbf16> to vector<128x128xbf16>
    %cst_96 = arith.constant dense<0.000000e+00> : vector<256x128xf32>
    %90 = tpu.matmul %87, %89, %cst_96 {dimension_numbers = #tpu.dot_dimension_numbers<[1], [0], [0], [1], [0, 0, 1, 1], [], []>} : vector<256x128xbf16>, vector<128x128xbf16>, vector<256x128xf32> -> vector<256x128xf32>
    %91 = arith.addf %86, %90 : vector<256x128xf32>
    %c0_97 = arith.constant 0 : index
    %c0_98 = arith.constant 0 : index
    %92 = vector.load %arg10[%c0_97, %c0_98] : memref<256x128xf32, #tpu.memory_space<vmem>>, vector<256x128xf32>
    tpu.vector_store %arg10[%c0_97, %c0_98], %91 {strides = array<i32>} : memref<256x128xf32, #tpu.memory_space<vmem>>, vector<256x128xf32>,
    %c2_99 = arith.constant 2 : index
    %c2_100 = arith.constant 2 : index
    %c0_101 = arith.constant 0 : index
    %93 = vector.load %arg9[%c2_99, %c2_100, %c0_101] : memref<18x18x128xf32, #tpu.memory_space<vmem>>, vector<16x16x128xf32>
    %94 = vector.shape_cast %93 : vector<16x16x128xf32> to vector<256x128xf32>
    %c0_102 = arith.constant 0 : index
    %c0_103 = arith.constant 0 : index
    %95 = vector.load %arg10[%c0_102, %c0_103] : memref<256x128xf32, #tpu.memory_space<vmem>>, vector<256x128xf32>
    %96 = arith.truncf %94 : vector<256x128xf32> to vector<256x128xbf16>
    %c8 = arith.constant 8 : index
    %c0_104 = arith.constant 0 : index
    %c0_105 = arith.constant 0 : index
    %97 = vector.load %arg3[%c8, %c0_104, %c0_105] : memref<9x128x128xbf16, #tpu.memory_space<vmem>>, vector<1x128x128xbf16>
    %98 = vector.shape_cast %97 : vector<1x128x128xbf16> to vector<128x128xbf16>
    %cst_106 = arith.constant dense<0.000000e+00> : vector<256x128xf32>
    %99 = tpu.matmul %96, %98, %cst_106 {dimension_numbers = #tpu.dot_dimension_numbers<[1], [0], [0], [1], [0, 0, 1, 1], [], []>} : vector<256x128xbf16>, vector<128x128xbf16>, vector<256x128xf32> -> vector<256x128xf32>
    %100 = arith.addf %95, %99 : vector<256x128xf32>
    %c0_107 = arith.constant 0 : index
    %c0_108 = arith.constant 0 : index
    %101 = vector.load %arg10[%c0_107, %c0_108] : memref<256x128xf32, #tpu.memory_space<vmem>>, vector<256x128xf32>
    tpu.vector_store %arg10[%c0_107, %c0_108], %100 {strides = array<i32>} : memref<256x128xf32, #tpu.memory_space<vmem>>, vector<256x128xf32>,
    %c0_109 = arith.constant 0 : index
    %c0_110 = arith.constant 0 : index
    %c0_111 = arith.constant 0 : index
    %c0_112 = arith.constant 0 : index
    %102 = vector.load %arg2[%c0_109, %c0_110, %c0_111, %c0_112] : memref<1x16x16x128xbf16, #tpu.memory_space<vmem>>, vector<1x16x16x128xbf16>
    %103 = vector.shape_cast %102 : vector<1x16x16x128xbf16> to vector<16x16x128xbf16>
    %104 = arith.extf %103 : vector<16x16x128xbf16> to vector<16x16x128xf32>
    %105 = vector.shape_cast %104 : vector<16x16x128xf32> to vector<256x128xf32>
    %c0_113 = arith.constant 0 : index
    %c0_114 = arith.constant 0 : index
    %106 = vector.load %arg10[%c0_113, %c0_114] : memref<256x128xf32, #tpu.memory_space<vmem>>, vector<256x128xf32>
    %107 = arith.addf %105, %106 : vector<256x128xf32>
    %cst_115 = arith.constant 0.000000e+00 : f32
    %108 = vector.broadcast %cst_115 : f32 to vector<256x128xf32>
    %109 = arith.cmpf ogt, %107, %108 : vector<256x128xf32>
    %cst_116 = arith.constant 0.00999999977 : f32
    %110 = vector.broadcast %cst_116 : f32 to vector<256x128xf32>
    %111 = arith.mulf %110, %107 : vector<256x128xf32>
    %112 = arith.select %109, %107, %111 : vector<256x128xi1>, vector<256x128xf32>
    %113 = vector.shape_cast %112 : vector<256x128xf32> to vector<16x16x128xf32>
    %114 = arith.truncf %113 : vector<16x16x128xf32> to vector<16x16x128xbf16>
    %c0_117 = arith.constant 0 : index
    %c0_118 = arith.constant 0 : index
    %c0_119 = arith.constant 0 : index
    %c0_120 = arith.constant 0 : index
    %115 = vector.load %arg6[%c0_117, %c0_118, %c0_119, %c0_120] : memref<1x16x16x128xbf16, #tpu.memory_space<vmem>>, vector<1x16x16x128xbf16>
    %116 = vector.shape_cast %115 : vector<1x16x16x128xbf16> to vector<16x16x128xbf16>
    %117 = vector.shape_cast %114 : vector<16x16x128xbf16> to vector<1x16x16x128xbf16>
    tpu.vector_store %arg6[%c0_117, %c0_118, %c0_119, %c0_120], %117 {strides = array<i32>} : memref<1x16x16x128xbf16, #tpu.memory_space<vmem>>, vector<1x16x16x128xbf16>,
    %c0_i32 = arith.constant 0 : i32
    %118 = arith.cmpi eq, %arg0, %c0_i32 : i32
    %119 = arith.extui %118 : i1 to i32
    %c0_i32_121 = arith.constant 0 : i32
    %120 = arith.cmpi ne, %119, %c0_i32_121 : i32
    scf.if %120 {
      %cst_132 = arith.constant 0.000000e+00 : f32
      %132 = vector.broadcast %cst_132 : f32 to vector<1x128xf32>
      %c0_133 = arith.constant 0 : index
      %c0_134 = arith.constant 0 : index
      %133 = vector.load %arg7[%c0_133, %c0_134] : memref<1x128xf32, #tpu.memory_space<vmem>>, vector<1x128xf32>
      tpu.vector_store %arg7[%c0_133, %c0_134], %132 {strides = array<i32>} : memref<1x128xf32, #tpu.memory_space<vmem>>, vector<1x128xf32>,
      %cst_135 = arith.constant 0.000000e+00 : f32
      %134 = vector.broadcast %cst_135 : f32 to vector<1x128xf32>
      %c0_136 = arith.constant 0 : index
      %c0_137 = arith.constant 0 : index
      %135 = vector.load %arg8[%c0_136, %c0_137] : memref<1x128xf32, #tpu.memory_space<vmem>>, vector<1x128xf32>
      tpu.vector_store %arg8[%c0_136, %c0_137], %134 {strides = array<i32>} : memref<1x128xf32, #tpu.memory_space<vmem>>, vector<1x128xf32>,
    } else {
    }
    %c0_122 = arith.constant 0 : index
    %c0_123 = arith.constant 0 : index
    %121 = vector.load %arg7[%c0_122, %c0_123] : memref<1x128xf32, #tpu.memory_space<vmem>>, vector<1x128xf32>
    %cst_124 = arith.constant dense<0.000000e+00> : vector<128xf32>
    %122 = vector.multi_reduction <add>, %112, %cst_124 [0] : vector<256x128xf32> to vector<128xf32>
    %123 = vector.shape_cast %122 : vector<128xf32> to vector<1x128xf32>
    %124 = arith.addf %121, %123 : vector<1x128xf32>
    %c0_125 = arith.constant 0 : index
    %c0_126 = arith.constant 0 : index
    %125 = vector.load %arg7[%c0_125, %c0_126] : memref<1x128xf32, #tpu.memory_space<vmem>>, vector<1x128xf32>
    tpu.vector_store %arg7[%c0_125, %c0_126], %124 {strides = array<i32>} : memref<1x128xf32, #tpu.memory_space<vmem>>, vector<1x128xf32>,
    %c0_127 = arith.constant 0 : index
    %c0_128 = arith.constant 0 : index
    %126 = vector.load %arg8[%c0_127, %c0_128] : memref<1x128xf32, #tpu.memory_space<vmem>>, vector<1x128xf32>
    %127 = arith.mulf %112, %112 : vector<256x128xf32>
    %cst_129 = arith.constant dense<0.000000e+00> : vector<128xf32>
    %128 = vector.multi_reduction <add>, %127, %cst_129 [0] : vector<256x128xf32> to vector<128xf32>
    %129 = vector.shape_cast %128 : vector<128xf32> to vector<1x128xf32>
    %130 = arith.addf %126, %129 : vector<1x128xf32>
    %c0_130 = arith.constant 0 : index
    %c0_131 = arith.constant 0 : index
    %131 = vector.load %arg8[%c0_130, %c0_131] : memref<1x128xf32, #tpu.memory_space<vmem>>, vector<1x128xf32>
    tpu.vector_store %arg8[%c0_130, %c0_131], %130 {strides = array<i32>} : memref<1x128xf32, #tpu.memory_space<vmem>>, vector<1x128xf32>,
    return
  }
  func.func @transform_0(%arg0: i32) -> (i32, i32, i32, i32) {
    %c0_i32 = arith.constant 0 : i32
    %c0_i32_0 = arith.constant 0 : i32
    %c0_i32_1 = arith.constant 0 : i32
    %c0_i32_2 = arith.constant 0 : i32
    return %arg0, %c0_i32, %c0_i32_0, %c0_i32_1 : i32, i32, i32, i32
  }
  func.func @transform_1(%arg0: i32) -> (i32, i32, i32, i32) {
    %c0_i32 = arith.constant 0 : i32
    %c0_i32_0 = arith.constant 0 : i32
    %c0_i32_1 = arith.constant 0 : i32
    %c0_i32_2 = arith.constant 0 : i32
    return %arg0, %c0_i32, %c0_i32_0, %c0_i32_1 : i32, i32, i32, i32
  }
  func.func @transform_2(%arg0: i32) -> (i32, i32, i32) {
    %c0_i32 = arith.constant 0 : i32
    %c0_i32_0 = arith.constant 0 : i32
    %c0_i32_1 = arith.constant 0 : i32
    %c0_i32_2 = arith.constant 0 : i32
    return %c0_i32, %c0_i32_0, %c0_i32_1 : i32, i32, i32
  }
  func.func @transform_3(%arg0: i32) -> (i32, i32) {
    %c0_i32 = arith.constant 0 : i32
    %c0_i32_0 = arith.constant 0 : i32
    %c0_i32_1 = arith.constant 0 : i32
    return %c0_i32, %c0_i32_0 : i32, i32
  }
  func.func @transform_4(%arg0: i32) -> (i32, i32) {
    %c0_i32 = arith.constant 0 : i32
    %c0_i32_0 = arith.constant 0 : i32
    %c0_i32_1 = arith.constant 0 : i32
    return %c0_i32, %c0_i32_0 : i32, i32
  }
  func.func @transform_5(%arg0: i32) -> (i32, i32, i32, i32) {
    %c0_i32 = arith.constant 0 : i32
    %c0_i32_0 = arith.constant 0 : i32
    %c0_i32_1 = arith.constant 0 : i32
    %c0_i32_2 = arith.constant 0 : i32
    return %arg0, %c0_i32, %c0_i32_0, %c0_i32_1 : i32, i32, i32, i32
  }
  func.func @transform_6(%arg0: i32) -> (i32, i32) {
    %c0_i32 = arith.constant 0 : i32
    %c0_i32_0 = arith.constant 0 : i32
    %c0_i32_1 = arith.constant 0 : i32
    return %c0_i32, %c0_i32_0 : i32, i32
  }
  func.func @transform_7(%arg0: i32) -> (i32, i32) {
    %c0_i32 = arith.constant 0 : i32
    %c0_i32_0 = arith.constant 0 : i32
    %c0_i32_1 = arith.constant 0 : i32
    return %c0_i32, %c0_i32_0 : i32, i32
  }
}

module attributes {stable_mosaic.version = 11 : i64} {
  func.func @bn_out_kernel(%arg0: i32, %arg1: memref<256x128xbf16, #tpu.memory_space<vmem>>, %arg2: memref<1x128xf32, #tpu.memory_space<vmem>>, %arg3: memref<1x128xf32, #tpu.memory_space<vmem>>, %arg4: memref<256x128xf32, #tpu.memory_space<vmem>>) attributes {dimension_semantics = [#tpu.dimension_semantics<parallel>], iteration_bounds = array<i64: 2>, scalar_prefetch = 0 : i64, scratch_operands = 0 : i64, tpu.core_type = #tpu.core_type<tc>, window_params = [{transform_indices = @transform_0, window_bounds = array<i64: 256, 128>}, {pipeline_mode = #tpu.pipeline_mode<synchronous>, transform_indices = @transform_1, window_bounds = array<i64: 1, 128>}, {pipeline_mode = #tpu.pipeline_mode<synchronous>, transform_indices = @transform_2, window_bounds = array<i64: 1, 128>}, {transform_indices = @transform_3, window_bounds = array<i64: 256, 128>}]} {
    %c0 = arith.constant 0 : index
    %c0_0 = arith.constant 0 : index
    %0 = vector.load %arg1[%c0, %c0_0] : memref<256x128xbf16, #tpu.memory_space<vmem>>, vector<256x128xbf16>
    %1 = arith.extf %0 : vector<256x128xbf16> to vector<256x128xf32>
    %c0_1 = arith.constant 0 : index
    %c0_2 = arith.constant 0 : index
    %2 = vector.load %arg2[%c0_1, %c0_2] : memref<1x128xf32, #tpu.memory_space<vmem>>, vector<1x128xf32>
    %3 = vector.broadcast %2 : vector<1x128xf32> to vector<256x128xf32>
    %4 = arith.mulf %1, %3 : vector<256x128xf32>
    %c0_3 = arith.constant 0 : index
    %c0_4 = arith.constant 0 : index
    %5 = vector.load %arg3[%c0_3, %c0_4] : memref<1x128xf32, #tpu.memory_space<vmem>>, vector<1x128xf32>
    %6 = vector.broadcast %5 : vector<1x128xf32> to vector<256x128xf32>
    %7 = arith.addf %4, %6 : vector<256x128xf32>
    %c0_5 = arith.constant 0 : index
    %c0_6 = arith.constant 0 : index
    %8 = vector.load %arg4[%c0_5, %c0_6] : memref<256x128xf32, #tpu.memory_space<vmem>>, vector<256x128xf32>
    tpu.vector_store %arg4[%c0_5, %c0_6], %7 {strides = array<i32>} : memref<256x128xf32, #tpu.memory_space<vmem>>, vector<256x128xf32>,
    return
  }
  func.func @transform_0(%arg0: i32) -> (i32, i32) {
    %c0_i32 = arith.constant 0 : i32
    %c0_i32_0 = arith.constant 0 : i32
    return %arg0, %c0_i32 : i32, i32
  }
  func.func @transform_1(%arg0: i32) -> (i32, i32) {
    %c0_i32 = arith.constant 0 : i32
    %c0_i32_0 = arith.constant 0 : i32
    %c0_i32_1 = arith.constant 0 : i32
    return %c0_i32, %c0_i32_0 : i32, i32
  }
  func.func @transform_2(%arg0: i32) -> (i32, i32) {
    %c0_i32 = arith.constant 0 : i32
    %c0_i32_0 = arith.constant 0 : i32
    %c0_i32_1 = arith.constant 0 : i32
    return %c0_i32, %c0_i32_0 : i32, i32
  }
  func.func @transform_3(%arg0: i32) -> (i32, i32) {
    %c0_i32 = arith.constant 0 : i32
    %c0_i32_0 = arith.constant 0 : i32
    return %arg0, %c0_i32 : i32, i32
  }
}

</mosaic_0001>

<bundles_post_ra>
// kernel: residual_forward.5
= control target key start
LH: loop header
LB: loop body
LE: loop exit
PB: predicated region body
PF: predicated region fallthrough
CT: control target
= control target key end

     0   :  { %s532_s12 = smov 0   ;;  %s675_s0 = inlined_call_operand.vmem [shape: bf16[512,128], index: 0, kind: input, shape index: {}]   ;;  %s676_s1 = inlined_call_operand.vmem [shape: f32[1,128], index: 1, kind: input, shape index: {}]   ;;  %s677_s2 = inlined_call_operand.vmem [shape: f32[1,128], index: 2, kind: input, shape index: {}]   ;;  %s678_s3 = inlined_call_operand.vmem [shape: f32[512,128], index: 3, kind: output, shape index: {}]  }
   0x1 LB: > { %s404_s13 = sadd.s32 4294967295, %s510_s12   ;;  %p408_p0 = scmp.ge.s32.totalorder %s510_s12, 1  ;;  %s510_s12 = sphi %s532_s12, %s13_s12  }
   0x2   : > { %p138_p1 = scmp.lt.s32.totalorder %s510_s12, 3 }
   0x4   : > { %p139_p2 = pnand %p408_p0, %p138_p1 }
   0x5   : > { %s409_s14 = sshll.u32 (!%p139_p2), %s404_s13, 5  ;;  %v548_v0 = vld [vmem:[%s676_s1] ss:$0 sm:$0xff] (!%p139_p2) }
   0x6   : > { %142 = sbr.rel (%p139_p2) target bundleno = 45 (0x2d), region = 32  ;;  %p163_p3 = scmp.lt.s32.totalorder (!%p139_p2), %s409_s14, 63  ;;  %v557_v9 = vld [vmem:[%s677_s2] ss:$0 sm:$0xff] (!%p139_p2) }
   0xd   : > { %s680_s14 = smov (!%p163_p3, %s409_s14), 63 }
   0xe   : > { %s410_s15 = sshll.u32 %s680_s14, 2  ;;  %s412_s21 = sshll.u32 %s680_s14, 3 }
   0xf   : > { %s543_s18 = scalar_lea.vmem %s675_s0, %s410_s15  ;;  %s566_s26 = scalar_lea.vmem %s678_s3, %s412_s21 }
  0x10   : > { %v418_v1 = vld [vmem:[%s543_s18] sm:$0xff]   ;;  %v481_v2 = vld [vmem:[%s543_s18 + $0x8] sm:$0xff]   ;;  %v482_v3 = vld [vmem:[%s543_s18 + $0x10] sm:$0xff]  }
  0x11   : > { %v419_v4 = vunpack.c.l.bf16 %v418_v1  ;;  %v420_v5 = vunpack.c.h.bf16 %v418_v1  ;;  %v423_v6 = vunpack.c.l.bf16 %v481_v2  ;;  %v424_v7 = vunpack.c.h.bf16 %v481_v2  ;;  %v483_v8 = vld [vmem:[%s543_s18 + $0x18] sm:$0xff]   ;;  %v484_v22 = vld [vmem:[%s543_s18 + $0x20] sm:$0xff]   ;;  %v485_v23 = vld [vmem:[%s543_s18 + $0x28] sm:$0xff]  }
  0x12   : > { %v427_v10 = vunpack.c.l.bf16 %v482_v3  ;;  %v428_v11 = vunpack.c.h.bf16 %v482_v3  ;;  %v431_v12 = vunpack.c.l.bf16 %v483_v8  ;;  %v432_v13 = vunpack.c.h.bf16 %v483_v8  ;;  %v486_v28 = vld [vmem:[%s543_s18 + $0x30] sm:$0xff]   ;;  %v487_v29 = vld [vmem:[%s543_s18 + $0x38] sm:$0xff]   ;;  %v488_v50 = vld [vmem:[%s543_s18 + $0x40] sm:$0xff]  }
  0x13   : > { %v245_v14 = vmul.f32 %v419_v4, %v548_v0  ;;  %v246_v15 = vmul.f32 %v420_v5, %v548_v0  ;;  %v247_v16 = vmul.f32 %v423_v6, %v548_v0  ;;  %v248_v17 = vmul.f32 %v424_v7, %v548_v0  ;;  %v489_v51 = vld [vmem:[%s543_s18 + $0x48] sm:$0xff]   ;;  %v490_v56 = vld [vmem:[%s543_s18 + $0x50] sm:$0xff]   ;;  %v491_v57 = vld [vmem:[%s543_s18 + $0x58] sm:$0xff]  }
  0x14   : > { %v249_v18 = vmul.f32 %v427_v10, %v548_v0  ;;  %v250_v19 = vmul.f32 %v428_v11, %v548_v0  ;;  %v251_v20 = vmul.f32 %v431_v12, %v548_v0  ;;  %v252_v21 = vmul.f32 %v432_v13, %v548_v0 }
  0x15   : > { %v284_v24 = vadd.f32 %v557_v9, %v245_v14  ;;  %v285_v25 = vadd.f32 %v557_v9, %v246_v15  ;;  %v286_v26 = vadd.f32 %v557_v9, %v247_v16  ;;  %v287_v27 = vadd.f32 %v557_v9, %v248_v17  ;;  %v492_v16 = vld [vmem:[%s543_s18 + $0x60] sm:$0xff]   ;;  %v493_v17 = vld [vmem:[%s543_s18 + $0x68] sm:$0xff]  }
  0x16   : > { %v288_v30 = vadd.f32 %v557_v9, %v249_v18  ;;  %v289_v31 = vadd.f32 %v557_v9, %v250_v19  ;;  %v290_v32 = vadd.f32 %v557_v9, %v251_v20  ;;  %v291_v33 = vadd.f32 %v557_v9, %v252_v21 }
  0x17   : > { %316 = vst [vmem:[%s566_s26] sm:$0xff] %v284_v24  ;;  %317 = vst [vmem:[%s566_s26 + $0x8] sm:$0xff] %v285_v25  ;;  %v435_v34 = vunpack.c.l.bf16 %v484_v22  ;;  %v436_v35 = vunpack.c.h.bf16 %v484_v22  ;;  %v439_v36 = vunpack.c.l.bf16 %v485_v23  ;;  %v440_v37 = vunpack.c.h.bf16 %v485_v23  ;;  %v494_v22 = vld [vmem:[%s543_s18 + $0x70] sm:$0xff]   ;;  %v495_v23 = vld [vmem:[%s543_s18 + $0x78] sm:$0xff]  }
  0x18   : > { %318 = vst [vmem:[%s566_s26 + $0x10] sm:$0xff] %v286_v26  ;;  %319 = vst [vmem:[%s566_s26 + $0x18] sm:$0xff] %v287_v27  ;;  %v443_v38 = vunpack.c.l.bf16 %v486_v28  ;;  %v444_v39 = vunpack.c.h.bf16 %v486_v28  ;;  %v447_v40 = vunpack.c.l.bf16 %v487_v29  ;;  %v448_v41 = vunpack.c.h.bf16 %v487_v29 }
  0x19   : > { %320 = vst [vmem:[%s566_s26 + $0x20] sm:$0xff] %v288_v30  ;;  %321 = vst [vmem:[%s566_s26 + $0x28] sm:$0xff] %v289_v31  ;;  %v253_v42 = vmul.f32 %v435_v34, %v548_v0  ;;  %v254_v43 = vmul.f32 %v436_v35, %v548_v0  ;;  %v255_v44 = vmul.f32 %v439_v36, %v548_v0  ;;  %v451_v62 = vunpack.c.l.bf16 %v488_v50 }
  0x1a   : > { %322 = vst [vmem:[%s566_s26 + $0x30] sm:$0xff] %v290_v32  ;;  %323 = vst [vmem:[%s566_s26 + $0x38] sm:$0xff] %v291_v33  ;;  %v256_v45 = vmul.f32 %v440_v37, %v548_v0  ;;  %v257_v46 = vmul.f32 %v443_v38, %v548_v0  ;;  %v258_v47 = vmul.f32 %v444_v39, %v548_v0  ;;  %v452_v63 = vunpack.c.h.bf16 %v488_v50 }
  0x1b   : > { %v259_v48 = vmul.f32 %v447_v40, %v548_v0  ;;  %v260_v49 = vmul.f32 %v448_v41, %v548_v0  ;;  %v292_v52 = vadd.f32 %v557_v9, %v253_v42  ;;  %v293_v53 = vadd.f32 %v557_v9, %v254_v43 }
  0x1c   : > { %v294_v54 = vadd.f32 %v557_v9, %v255_v44  ;;  %v295_v55 = vadd.f32 %v557_v9, %v256_v45  ;;  %v296_v58 = vadd.f32 %v557_v9, %v257_v46  ;;  %v297_v59 = vadd.f32 %v557_v9, %v258_v47 }
  0x1d   : > { %v298_v60 = vadd.f32 %v557_v9, %v259_v48  ;;  %v299_v61 = vadd.f32 %v557_v9, %v260_v49  ;;  %324 = vst [vmem:[%s566_s26 + $0x40] sm:$0xff] %v292_v52  ;;  %325 = vst [vmem:[%s566_s26 + $0x48] sm:$0xff] %v293_v53  ;;  %v455_v1 = vunpack.c.l.bf16 %v489_v51  ;;  %v456_v2 = vunpack.c.h.bf16 %v489_v51 }
  0x1e   : > { %326 = vst [vmem:[%s566_s26 + $0x50] sm:$0xff] %v294_v54  ;;  %327 = vst [vmem:[%s566_s26 + $0x58] sm:$0xff] %v295_v55  ;;  %v459_v3 = vunpack.c.l.bf16 %v490_v56  ;;  %v460_v4 = vunpack.c.h.bf16 %v490_v56  ;;  %v463_v5 = vunpack.c.l.bf16 %v491_v57  ;;  %v464_v6 = vunpack.c.h.bf16 %v491_v57 }
  0x1f   : > { %328 = vst [vmem:[%s566_s26 + $0x60] sm:$0xff] %v296_v58  ;;  %329 = vst [vmem:[%s566_s26 + $0x68] sm:$0xff] %v297_v59  ;;  %v261_v7 = vmul.f32 %v451_v62, %v548_v0  ;;  %v262_v8 = vmul.f32 %v452_v63, %v548_v0  ;;  %v263_v10 = vmul.f32 %v455_v1, %v548_v0  ;;  %v467_v28 = vunpack.c.l.bf16 %v492_v16 }
  0x20   : > { %330 = vst [vmem:[%s566_s26 + $0x70] sm:$0xff] %v298_v60  ;;  %331 = vst [vmem:[%s566_s26 + $0x78] sm:$0xff] %v299_v61  ;;  %v264_v11 = vmul.f32 %v456_v2, %v548_v0  ;;  %v265_v12 = vmul.f32 %v459_v3, %v548_v0  ;;  %v266_v13 = vmul.f32 %v460_v4, %v548_v0  ;;  %v468_v29 = vunpack.c.h.bf16 %v492_v16 }
  0x21   : > { %v267_v14 = vmul.f32 %v463_v5, %v548_v0  ;;  %v268_v15 = vmul.f32 %v464_v6, %v548_v0  ;;  %v300_v18 = vadd.f32 %v557_v9, %v261_v7  ;;  %v301_v19 = vadd.f32 %v557_v9, %v262_v8 }
  0x22   : > { %v302_v20 = vadd.f32 %v557_v9, %v263_v10  ;;  %v303_v21 = vadd.f32 %v557_v9, %v264_v11  ;;  %v304_v24 = vadd.f32 %v557_v9, %v265_v12  ;;  %v305_v25 = vadd.f32 %v557_v9, %v266_v13 }
  0x23   : > { %v306_v26 = vadd.f32 %v557_v9, %v267_v14  ;;  %v307_v27 = vadd.f32 %v557_v9, %v268_v15  ;;  %332 = vst [vmem:[%s566_s26 + $0x80] sm:$0xff] %v300_v18  ;;  %333 = vst [vmem:[%s566_s26 + $0x88] sm:$0xff] %v301_v19  ;;  %v471_v30 = vunpack.c.l.bf16 %v493_v17  ;;  %v472_v31 = vunpack.c.h.bf16 %v493_v17 }
  0x24   : > { %334 = vst [vmem:[%s566_s26 + $0x90] sm:$0xff] %v302_v20  ;;  %335 = vst [vmem:[%s566_s26 + $0x98] sm:$0xff] %v303_v21  ;;  %v475_v32 = vunpack.c.l.bf16 %v494_v22  ;;  %v476_v33 = vunpack.c.h.bf16 %v494_v22  ;;  %v479_v34 = vunpack.c.l.bf16 %v495_v23  ;;  %v480_v35 = vunpack.c.h.bf16 %v495_v23 }
  0x25   : > { %336 = vst [vmem:[%s566_s26 + $0xa0] sm:$0xff] %v304_v24  ;;  %337 = vst [vmem:[%s566_s26 + $0xa8] sm:$0xff] %v305_v25  ;;  %v269_v36 = vmul.f32 %v467_v28, %v548_v0  ;;  %v270_v37 = vmul.f32 %v468_v29, %v548_v0  ;;  %v271_v38 = vmul.f32 %v471_v30, %v548_v0 }
  0x26   : > { %338 = vst [vmem:[%s566_s26 + $0xb0] sm:$0xff] %v306_v26  ;;  %339 = vst [vmem:[%s566_s26 + $0xb8] sm:$0xff] %v307_v27  ;;  %v272_v39 = vmul.f32 %v472_v31, %v548_v0  ;;  %v273_v40 = vmul.f32 %v475_v32, %v548_v0  ;;  %v274_v41 = vmul.f32 %v476_v33, %v548_v0 }
  0x27   : > { %v275_v42 = vmul.f32 %v479_v34, %v548_v0  ;;  %v276_v43 = vmul.f32 %v480_v35, %v548_v0  ;;  %v308_v44 = vadd.f32 %v557_v9, %v269_v36  ;;  %v309_v45 = vadd.f32 %v557_v9, %v270_v37 }
  0x28   : > { %v310_v46 = vadd.f32 %v557_v9, %v271_v38  ;;  %v311_v47 = vadd.f32 %v557_v9, %v272_v39  ;;  %v312_v48 = vadd.f32 %v557_v9, %v273_v40  ;;  %v313_v49 = vadd.f32 %v557_v9, %v274_v41 }
  0x29   : > { %v314_v50 = vadd.f32 %v557_v9, %v275_v42  ;;  %v315_v51 = vadd.f32 %v557_v9, %v276_v43  ;;  %340 = vst [vmem:[%s566_s26 + $0xc0] sm:$0xff] %v308_v44  ;;  %341 = vst [vmem:[%s566_s26 + $0xc8] sm:$0xff] %v309_v45 }
  0x2a   : > { %342 = vst [vmem:[%s566_s26 + $0xd0] sm:$0xff] %v310_v46  ;;  %343 = vst [vmem:[%s566_s26 + $0xd8] sm:$0xff] %v311_v47 }
  0x2b   : > { %344 = vst [vmem:[%s566_s26 + $0xe0] sm:$0xff] %v312_v48  ;;  %345 = vst [vmem:[%s566_s26 + $0xe8] sm:$0xff] %v313_v49 }
  0x2c   : > { %346 = vst [vmem:[%s566_s26 + $0xf0] sm:$0xff] %v314_v50  ;;  %347 = vst [vmem:[%s566_s26 + $0xf8] sm:$0xff] %v315_v51 }
  0x2d PF: > { %s13_s12 = sadd.s32 1, %s510_s12  }
  0x2e   : > { %p10_p4 = scmp.ge.s32.totalorder %s13_s12, 4  }
  0x30   :  { %12 = sbr.rel (!%p10_p4) target bundleno = 1 (0x1), region = 62 }

// kernel: residual_forward.3
= control target key start
LH: loop header
LB: loop body
LE: loop exit
PB: predicated region body
PF: predicated region fallthrough
CT: control target
= control target key end

     0   :  { %s1246_s15 = smov 0   ;;  %s1508_s0 = inlined_call_operand.vmem [shape: bf16[512,128], index: 0, kind: input, shape index: {}]   ;;  %s1509_s1 = inlined_call_operand.vmem [shape: bf16[128,128], index: 1, kind: input, shape index: {}]   ;;  %s1510_s2 = inlined_call_operand.vmem [shape: bf16[512,128], index: 2, kind: output, shape index: {0}]   ;;  %s1511_s3 = inlined_call_operand.vmem [shape: f32[1,128], index: 3, kind: output, shape index: {1}]   ;;  %s1512_s4 = inlined_call_operand.vmem [shape: f32[1,128], index: 4, kind: output, shape index: {2}]  }
   0x1 LB: > { %s896_s16 = sadd.s32 4294967295, %s1218_s15   ;;  %p900_p0 = scmp.ge.s32.totalorder %s1218_s15, 1  ;;  %s1218_s15 = sphi %s1246_s15, %s15_s15  }
   0x2   : > { %p158_p1 = scmp.lt.s32.totalorder %s1218_s15, 3 }
   0x4   : > { %p159_p2 = pnand %p900_p0, %p158_p1 }
   0x5   : > { %v1188_v0 = vld [vmem:[%s1509_s1] sm:$0xff] (!%p159_p2)   ;;  %s901_s19 = sshll.u32 (!%p159_p2), %s896_s16, 5  ;;  %v1189_v1 = vld [vmem:[%s1509_s1 + $0x8] sm:$0xff] (!%p159_p2)   ;;  %v1190_v2 = vld [vmem:[%s1509_s1 + $0x10] sm:$0xff] (!%p159_p2)   ;;  %p961_p4 = scmp.ne.s32.totalorder (!%p159_p2), %s896_s16, 0 }
   0x6   : > { %162 = sbr.rel (%p159_p2) target bundleno = 359 (0x167), region = 28  ;;  %p185_p3 = scmp.lt.s32.totalorder (!%p159_p2), %s901_s19, 63  ;;  %1115 = vmatprep.subr.bf16.mxu0 (!%p159_p2), %v1188_v0  ;;  %1163 = vmatprep.subr.bf16.mxu1 (!%p159_p2), %v1188_v0  ;;  %v1191_v3 = vld [vmem:[%s1509_s1 + $0x18] sm:$0xff] (!%p159_p2)   ;;  %v1192_v6 = vld [vmem:[%s1509_s1 + $0x20] sm:$0xff] (!%p159_p2)   ;;  %v1193_v7 = vld [vmem:[%s1509_s1 + $0x28] sm:$0xff] (!%p159_p2)  }
   0x7   : > { %1116 = vmatpush3.bf16.msra.mxu0 (!%p159_p2), %v1188_v0  ;;  %1171 = vmatpush3.bf16.msra.mxu1 (!%p159_p2), %v1188_v0  ;;  %v1194_v8 = vld [vmem:[%s1509_s1 + $0x30] sm:$0xff] (!%p159_p2)   ;;  %v1195_v9 = vld [vmem:[%s1509_s1 + $0x38] sm:$0xff] (!%p159_p2)  }
   0x8   : > { %1117 = vmatprep.subr.bf16.mxu0 (!%p159_p2), %v1189_v1  ;;  %1164 = vmatprep.subr.bf16.mxu1 (!%p159_p2), %v1189_v1 }
   0xb   : > { %1118 = vmatpush3.bf16.msra.mxu0 (!%p159_p2), %v1189_v1  ;;  %1172 = vmatpush3.bf16.msra.mxu1 (!%p159_p2), %v1189_v1 }
   0xc   : > { %1119 = vmatprep.subr.bf16.mxu0 (!%p159_p2), %v1190_v2  ;;  %1165 = vmatprep.subr.bf16.mxu1 (!%p159_p2), %v1190_v2 }
   0xd   : > { %s1514_s19 = smov (!%p185_p3, %s901_s19), 63 }
   0xe   : > { %s902_s24 = sshll.u32 %s1514_s19, 2 }
   0xf   : > { %s1273_s27 = scalar_lea.vmem %s1508_s0, %s902_s24  ;;  %1120 = vmatpush3.bf16.msra.mxu0 %v1190_v2  ;;  %1173 = vmatpush3.bf16.msra.mxu1 %v1190_v2  ;;  %s1319_s14 = scalar_lea.vmem %s1510_s2, %s902_s24 }
  0x10   : > { %v1196_v4 = vld [vmem:[%s1273_s27] sm:$0xff]   ;;  %1121 = vmatprep.subr.bf16.mxu0 %v1191_v3  ;;  %1166 = vmatprep.subr.bf16.mxu1 %v1191_v3  ;;  %v1198_v10 = vld [vmem:[%s1273_s27 + $0x8] sm:$0xff]   ;;  %v1200_v12 = vld [vmem:[%s1273_s27 + $0x10] sm:$0xff]  }
  0x11   : > { %v1197_v5 = vld [vmem:[%s1273_s27 + $0x40] sm:$0xff]   ;;  %1131 = vmatprep.mubr.bf16.mxu0 %v1196_v4  ;;  %v1199_v11 = vld [vmem:[%s1273_s27 + $0x48] sm:$0xff]   ;;  %v1201_v13 = vld [vmem:[%s1273_s27 + $0x50] sm:$0xff]  }
  0x12   : > { %1147 = vmatprep.mubr.bf16.mxu1 %v1197_v5  ;;  %v1202_v14 = vld [vmem:[%s1273_s27 + $0x18] sm:$0xff]   ;;  %v1204_v16 = vld [vmem:[%s1273_s27 + $0x20] sm:$0xff]   ;;  %v1206_v18 = vld [vmem:[%s1273_s27 + $0x28] sm:$0xff]  }
  0x13   : > { %1122 = vmatpush3.bf16.msra.mxu0 %v1191_v3  ;;  %1174 = vmatpush3.bf16.msra.mxu1 %v1191_v3  ;;  %v1203_v15 = vld [vmem:[%s1273_s27 + $0x58] sm:$0xff]   ;;  %v1205_v17 = vld [vmem:[%s1273_s27 + $0x60] sm:$0xff]   ;;  %v1207_v19 = vld [vmem:[%s1273_s27 + $0x68] sm:$0xff]  }
  0x14   : > { %1123 = vmatprep.subr.bf16.mxu0 %v1192_v6  ;;  %1167 = vmatprep.subr.bf16.mxu1 %v1192_v6  ;;  %v1208_v20 = vld [vmem:[%s1273_s27 + $0x30] sm:$0xff]   ;;  %v1210_v22 = vld [vmem:[%s1273_s27 + $0x38] sm:$0xff]  }
  0x15   : > { %v1209_v21 = vld [vmem:[%s1273_s27 + $0x70] sm:$0xff]   ;;  %v1211_v23 = vld [vmem:[%s1273_s27 + $0x78] sm:$0xff]  }
  0x17   : > { %1124 = vmatpush3.bf16.msra.mxu0 %v1192_v6  ;;  %1175 = vmatpush3.bf16.msra.mxu1 %v1192_v6 }
  0x18   : > { %1125 = vmatprep.subr.bf16.mxu0 %v1193_v7  ;;  %1168 = vmatprep.subr.bf16.mxu1 %v1193_v7 }
  0x1b   : > { %1126 = vmatpush3.bf16.msra.mxu0 %v1193_v7  ;;  %1176 = vmatpush3.bf16.msra.mxu1 %v1193_v7 }
  0x1c   : > { %1127 = vmatprep.subr.bf16.mxu0 %v1194_v8  ;;  %1169 = vmatprep.subr.bf16.mxu1 %v1194_v8 }
  0x1f   : > { %1128 = vmatpush3.bf16.msra.mxu0 %v1194_v8  ;;  %1177 = vmatpush3.bf16.msra.mxu1 %v1194_v8  ;;  %v1220_v8 = vmov (!%p961_p4), 0.0  }
  0x20   : > { %1129 = vmatprep.subr.bf16.mxu0 %v1195_v9  ;;  %1170 = vmatprep.subr.bf16.mxu1 %v1195_v9  ;;  %714 = vst [vmem:[%s1511_s3] sm:$0x1] (!%p961_p4), %v1220_v8  ;;  %715 = vst [vmem:[%s1512_s4] sm:$0x1] (!%p961_p4), %v1220_v8 }
  0x23   : > { %1130 = vmatpush3.bf16.msra.mxu0 %v1195_v9  ;;  %1178 = vmatpush3.bf16.msra.mxu1 %v1195_v9 }
  0x26   : > { %1132 = vmatmul.mubr.bf16.vlgmr.msra.gmra.mrb[0].mxu0 %v1198_v10  ;;  %1148 = vmatmul.mubr.bf16.vlgmr.msra.gmra.mrb[0].mxu1 %v1199_v11 }
  0x27   : > { %1135 = vmatprep.mubr.bf16.mxu0 %v1200_v12  ;;  %1151 = vmatprep.mubr.bf16.mxu1 %v1201_v13 }
  0x2e   : > { %1136 = vmatmul.mubr.bf16.gmra.mrb[4].mxu0 %v1202_v14  ;;  %1152 = vmatmul.mubr.bf16.gmra.mrb[4].mxu1 %v1203_v15 }
  0x2f   : > { %1139 = vmatprep.mubr.bf16.mxu0 %v1204_v16  ;;  %1155 = vmatprep.mubr.bf16.mxu1 %v1205_v17 }
  0x36   : > { %1140 = vmatmul.mubr.bf16.gmra.mrb[8].mxu0 %v1206_v18  ;;  %1156 = vmatmul.mubr.bf16.gmra.mrb[8].mxu1 %v1207_v19 }
  0x37   : > { %1143 = vmatprep.mubr.bf16.mxu0 %v1208_v20  ;;  %1159 = vmatprep.mubr.bf16.mxu1 %v1209_v21 }
  0x3e   : > { %1144 = vmatmul.mubr.bf16.gmra.mrb[12].mxu0 %v1210_v22  ;;  %1160 = vmatmul.mubr.bf16.gmra.mrb[12].mxu1 %v1211_v23 }
  0xf9   : > { %v1306_v24 = vpop.f32.mrb[0].mxu0  ;;  %v1308_v25 = vpop.f32.mrb[0].mxu1 }
  0xfa   : > { %v1310_v26 = vpop.f32.mrb[1].mxu0  ;;  %v1312_v27 = vpop.f32.mrb[1].mxu1 }
  0xfb   : > { %v1321_v28 = vpop.f32.mrb[2].mxu0  ;;  %v1323_v29 = vpop.f32.mrb[2].mxu1 }
  0xfc   : > { %v1004_v30 = vpack.c.bf16 %v1321_v28, %v1306_v24  ;;  %v1044_v31 = vpack.c.bf16 %v1323_v29, %v1308_v25  ;;  %v1329_v32 = vpop.f32.mrb[3].mxu0  ;;  %v1331_v33 = vpop.f32.mrb[3].mxu1 }
  0xfd   : > { %v999_v34 = vpack.c.bf16 %v1329_v32, %v1310_v26  ;;  %v1039_v35 = vpack.c.bf16 %v1331_v33, %v1312_v27 }
  0xfe   : > { %1076 = vst [vmem:[%s1319_s14 + $0x8] sm:$0xff] %v1004_v30   ;;  %1084 = vst [vmem:[%s1319_s14 + $0x48] sm:$0xff] %v1044_v31  }
  0xff   : > { %1000 = vst [vmem:[%s1319_s14] sm:$0xff] %v999_v34   ;;  %1083 = vst [vmem:[%s1319_s14 + $0x40] sm:$0xff] %v1039_v35  }
 0x101   : > { %v1341_v36 = vpop.f32.mrb[4].mxu0  ;;  %v1343_v37 = vpop.f32.mrb[4].mxu1 }
 0x102   : > { %v1345_v38 = vpop.f32.mrb[5].mxu0  ;;  %v1347_v39 = vpop.f32.mrb[5].mxu1 }
 0x103   : > { %v1349_v40 = vpop.f32.mrb[6].mxu0  ;;  %v1351_v41 = vpop.f32.mrb[6].mxu1 }
 0x104   : > { %v1014_v42 = vpack.c.bf16 %v1349_v40, %v1341_v36  ;;  %v1054_v43 = vpack.c.bf16 %v1351_v41, %v1343_v37  ;;  %v442_v44 = vpop.f32.mrb[7].mxu0  ;;  %v1357_v45 = vpop.f32.mrb[7].mxu1 }
 0x105   : > { %v1009_v46 = vpack.c.bf16 %v442_v44, %v1345_v38  ;;  %v1049_v47 = vpack.c.bf16 %v1357_v45, %v1347_v39 }
 0x106   : > { %1078 = vst [vmem:[%s1319_s14 + $0x18] sm:$0xff] %v1014_v42   ;;  %1086 = vst [vmem:[%s1319_s14 + $0x58] sm:$0xff] %v1054_v43  }
 0x107   : > { %1077 = vst [vmem:[%s1319_s14 + $0x10] sm:$0xff] %v1009_v46   ;;  %1085 = vst [vmem:[%s1319_s14 + $0x50] sm:$0xff] %v1049_v47  }
 0x109   : > { %v1366_v48 = vpop.f32.mrb[8].mxu0  ;;  %v1368_v49 = vpop.f32.mrb[8].mxu1 }
 0x10a   : > { %v455_v50 = vpop.f32.mrb[9].mxu0  ;;  %v1370_v51 = vpop.f32.mrb[9].mxu1 }
 0x10b   : > { %v1372_v52 = vpop.f32.mrb[10].mxu0  ;;  %v1374_v53 = vpop.f32.mrb[10].mxu1 }
 0x10c   : > { %v1024_v54 = vpack.c.bf16 %v1372_v52, %v1366_v48  ;;  %v1064_v55 = vpack.c.bf16 %v1374_v53, %v1368_v49  ;;  %v458_v56 = vpop.f32.mrb[11].mxu0  ;;  %v1380_v57 = vpop.f32.mrb[11].mxu1 }
 0x10d   : > { %v1019_v58 = vpack.c.bf16 %v458_v56, %v455_v50  ;;  %v1059_v59 = vpack.c.bf16 %v1380_v57, %v1370_v51 }
 0x10e   : > { %1080 = vst [vmem:[%s1319_s14 + $0x28] sm:$0xff] %v1024_v54   ;;  %1088 = vst [vmem:[%s1319_s14 + $0x68] sm:$0xff] %v1064_v55  }
 0x10f   : > { %1079 = vst [vmem:[%s1319_s14 + $0x20] sm:$0xff] %v1019_v58   ;;  %1087 = vst [vmem:[%s1319_s14 + $0x60] sm:$0xff] %v1059_v59  }
 0x111   : > { %v1388_v60 = vpop.f32.mrb[12].mxu0  ;;  %v1390_v61 = vpop.f32.mrb[12].mxu1  ;;  %713 = sbr.rel (%p961_p4) target bundleno = 280 (0x118), region = 32 }
 0x112   : > { %v471_v62 = vpop.f32.mrb[13].mxu0  ;;  %v1392_v63 = vpop.f32.mrb[13].mxu1 }
 0x113   : > { %v1146_v0 = vpop.f32.mrb[14].mxu0  ;;  %v1394_v1 = vpop.f32.mrb[14].mxu1 }
 0x114   : > { %v1034_v2 = vpack.c.bf16 %v1146_v0, %v1388_v60  ;;  %v1074_v3 = vpack.c.bf16 %v1394_v1, %v1390_v61  ;;  %v474_v4 = vpop.f32.mrb[15].mxu0  ;;  %v1399_v5 = vpop.f32.mrb[15].mxu1 }
 0x115   : > { %v1029_v6 = vpack.c.bf16 %v474_v4, %v471_v62  ;;  %v1069_v7 = vpack.c.bf16 %v1399_v5, %v1392_v63 }
 0x116   : > { %1082 = vst [vmem:[%s1319_s14 + $0x38] sm:$0xff] %v1034_v2   ;;  %1090 = vst [vmem:[%s1319_s14 + $0x78] sm:$0xff] %v1074_v3  }
 0x117   : > { %1081 = vst [vmem:[%s1319_s14 + $0x30] sm:$0xff] %v1029_v6   ;;  %1089 = vst [vmem:[%s1319_s14 + $0x70] sm:$0xff] %v1069_v7  }
 0x118 PF: > { %v717_v9 = vadd.f32 %v1329_v32, %v1310_v26  ;;  %v757_v12 = vmul.f32 %v1310_v26, %v1310_v26  ;;  %v758_v13 = vmul.f32 %v1329_v32, %v1329_v32  ;;  %v759_v15 = vmul.f32 %v1306_v24, %v1306_v24 }
 0x119   : > { %v760_v17 = vmul.f32 %v1321_v28, %v1321_v28  ;;  %v761_v20 = vmul.f32 %v1345_v38, %v1345_v38  ;;  %v762_v23 = vmul.f32 %v442_v44, %v442_v44  ;;  %v763_v31 = vmul.f32 %v1341_v36, %v1341_v36 }
 0x11a   : > { %v718_v10 = vadd.f32 %v1306_v24, %v717_v9  ;;  %v789_v18 = vadd.f32 %v758_v13, %v757_v12  ;;  %v765_v42 = vmul.f32 %v455_v50, %v455_v50  ;;  %v766_v46 = vmul.f32 %v458_v56, %v458_v56 }
 0x11b   : > { %v767_v54 = vmul.f32 %v1366_v48, %v1366_v48  ;;  %v768_v58 = vmul.f32 %v1372_v52, %v1372_v52  ;;  %v769_v2 = vmul.f32 %v471_v62, %v471_v62  ;;  %v770_v6 = vmul.f32 %v474_v4, %v474_v4 }
 0x11c   : > { %v719_v11 = vadd.f32 %v1321_v28, %v718_v10  ;;  %v790_v21 = vadd.f32 %v789_v18, %v759_v15  ;;  %v764_v28 = vmul.f32 %v1349_v40, %v1349_v40  ;;  %v771_v8 = vmul.f32 %v1388_v60, %v1388_v60 }
 0x11d   : > { %v772_v10 = vmul.f32 %v1146_v0, %v1146_v0  ;;  %v773_v12 = vmul.f32 %v1312_v27, %v1312_v27 }
 0x11e   : > { %v720_v14 = vadd.f32 %v719_v11, %v1345_v38  ;;  %v791_v26 = vadd.f32 %v790_v21, %v760_v17  ;;  %v776_v17 = vmul.f32 %v1323_v29, %v1323_v29  ;;  %v778_v21 = vmul.f32 %v1357_v45, %v1357_v45 }
 0x120   : > { %v721_v16 = vadd.f32 %v720_v14, %v442_v44  ;;  %v792_v24 = vadd.f32 %v791_v26, %v761_v20 }
 0x122   : > { %v722_v19 = vadd.f32 %v1341_v36, %v721_v16  ;;  %v793_v34 = vadd.f32 %v792_v24, %v762_v23  ;;  %v779_v23 = vmul.f32 %v1343_v37, %v1343_v37  ;;  %v781_v24 = vmul.f32 %v1370_v51, %v1370_v51 }
 0x124   : > { %v723_v22 = vadd.f32 %v1349_v40, %v722_v19  ;;  %v794_v43 = vadd.f32 %v793_v34, %v763_v31  ;;  %v777_v19 = vmul.f32 %v1347_v39, %v1347_v39 }
 0x126   : > { %v724_v30 = vadd.f32 %v723_v22, %v455_v50  ;;  %v795_v47 = vadd.f32 %v794_v43, %v764_v28  ;;  %v782_v28 = vmul.f32 %v1380_v57, %v1380_v57  ;;  %v784_v43 = vmul.f32 %v1374_v53, %v1374_v53 }
 0x128   : > { %v725_v32 = vadd.f32 %v724_v30, %v458_v56  ;;  %v796_v55 = vadd.f32 %v795_v47, %v765_v42  ;;  %v780_v30 = vmul.f32 %v1351_v41, %v1351_v41 }
 0x12a   : > { %v726_v35 = vadd.f32 %v1366_v48, %v725_v32  ;;  %v797_v59 = vadd.f32 %v796_v55, %v766_v46  ;;  %v785_v46 = vmul.f32 %v1392_v63, %v1392_v63  ;;  %v787_v55 = vmul.f32 %v1390_v61, %v1390_v61 }
 0x12c   : > { %v727_v38 = vadd.f32 %v1372_v52, %v726_v35  ;;  %v798_v3 = vadd.f32 %v797_v59, %v767_v54  ;;  %v783_v35 = vmul.f32 %v1368_v49, %v1368_v49 }
 0x12e   : > { %v728_v44 = vadd.f32 %v727_v38, %v471_v62  ;;  %v799_v7 = vadd.f32 %v798_v3, %v768_v58 }
 0x130   : > { %v729_v36 = vadd.f32 %v728_v44, %v474_v4  ;;  %v800_v9 = vadd.f32 %v799_v7, %v769_v2  ;;  %v774_v4 = vmul.f32 %v1331_v33, %v1331_v33  ;;  %v786_v44 = vmul.f32 %v1399_v5, %v1399_v5 }
 0x132   : > { %v730_v40 = vadd.f32 %v1388_v60, %v729_v36  ;;  %v801_v11 = vadd.f32 %v800_v9, %v770_v6  ;;  %v775_v60 = vmul.f32 %v1308_v25, %v1308_v25 }
 0x134   : > { %v731_v50 = vadd.f32 %v1146_v0, %v730_v40  ;;  %v802_v62 = vadd.f32 %v801_v11, %v771_v8 }
 0x136   : > { %v732_v56 = vadd.f32 %v731_v50, %v1312_v27  ;;  %v803_v14 = vadd.f32 %v802_v62, %v772_v10 }
 0x138   : > { %v733_v48 = vadd.f32 %v732_v56, %v1331_v33  ;;  %v804_v16 = vadd.f32 %v803_v14, %v773_v12 }
 0x13a   : > { %v734_v52 = vadd.f32 %v1308_v25, %v733_v48  ;;  %v805_v18 = vadd.f32 %v804_v16, %v774_v4  ;;  %v756_v48 = vld [vmem:[%s1512_s4] sm:$0x1] }
 0x13c   : > { %v735_v13 = vadd.f32 %v1323_v29, %v734_v52  ;;  %v806_v20 = vadd.f32 %v805_v18, %v775_v60 }
 0x13e   : > { %v736_v15 = vadd.f32 %v735_v13, %v1347_v39  ;;  %v807_v22 = vadd.f32 %v806_v20, %v776_v17 }
 0x140   : > { %v737_v0 = vadd.f32 %v736_v15, %v1357_v45  ;;  %v808_v26 = vadd.f32 %v807_v22, %v777_v19 }
 0x142   : > { %v738_v27 = vadd.f32 %v1343_v37, %v737_v0  ;;  %v809_v31 = vadd.f32 %v808_v26, %v778_v21 }
 0x144   : > { %v739_v33 = vadd.f32 %v1351_v41, %v738_v27  ;;  %v810_v32 = vadd.f32 %v809_v31, %v779_v23 }
 0x146   : > { %v740_v25 = vadd.f32 %v739_v33, %v1370_v51  ;;  %v811_v34 = vadd.f32 %v810_v32, %v780_v30 }
 0x148   : > { %v741_v29 = vadd.f32 %v740_v25, %v1380_v57  ;;  %v812_v42 = vadd.f32 %v811_v34, %v781_v24 }
 0x14a   : > { %v742_v39 = vadd.f32 %v1368_v49, %v741_v29  ;;  %v813_v38 = vadd.f32 %v812_v42, %v782_v28 }
 0x14c   : > { %v743_v45 = vadd.f32 %v1374_v53, %v742_v39  ;;  %v814_v47 = vadd.f32 %v813_v38, %v783_v35  ;;  %v788_v53 = vmul.f32 %v1394_v1, %v1394_v1 }
 0x14e   : > { %v744_v37 = vadd.f32 %v743_v45, %v1392_v63  ;;  %v815_v54 = vadd.f32 %v814_v47, %v784_v43 }
 0x150   : > { %v745_v41 = vadd.f32 %v744_v37, %v1399_v5  ;;  %v816_v36 = vadd.f32 %v815_v54, %v785_v46  ;;  %v716_v5 = vld [vmem:[%s1511_s3] sm:$0x1] }
 0x152   : > { %v746_v51 = vadd.f32 %v1390_v61, %v745_v41  ;;  %v817_v59 = vadd.f32 %v816_v36, %v786_v44 }
 0x154   : > { %v747_v57 = vadd.f32 %v1394_v1, %v746_v51  ;;  %v818_v2 = vadd.f32 %v817_v59, %v787_v55 }
 0x156   : > { %v748_v49 = vrot.slane %v747_v57, 4  ;;  %v819_v3 = vadd.f32 %v818_v2, %v788_v53 }
 0x158   : > { %v749_v58 = vadd.f32 %v748_v49, %v747_v57  ;;  %v820_v6 = vrot.slane %v819_v3, 4 }
 0x15a   : > { %v750_v40 = vrot.slane %v749_v58, 2  ;;  %v821_v56 = vadd.f32 %v820_v6, %v819_v3 }
 0x15c   : > { %v751_v63 = vadd.f32 %v750_v40, %v749_v58  ;;  %v822_v61 = vrot.slane %v821_v56, 2 }
 0x15e   : > { %v752_v50 = vrot.slane %v751_v63, 1  ;;  %v823_v1 = vadd.f32 %v822_v61, %v821_v56 }
 0x160   : > { %v753_v7 = vadd.f32 %v752_v50, %v751_v63  ;;  %v824_v9 = vrot.slane %v823_v1, 1 }
 0x162   : > { %v754_v8 = vadd.f32 %v753_v7, %v716_v5  ;;  %v825_v10 = vadd.f32 %v824_v9, %v823_v1 }
 0x164   : > { %755 = vst [vmem:[%s1511_s3] sm:$0x1] %v754_v8  ;;  %v826_v11 = vadd.f32 %v825_v10, %v756_v48 }
 0x166   : > { %827 = vst [vmem:[%s1512_s4] sm:$0x1] %v826_v11 }
 0x167 PF: > { %s15_s15 = sadd.s32 1, %s1218_s15  }
 0x168   : > { %p12_p5 = scmp.ge.s32.totalorder %s15_s15, 4  }
 0x16a   :  { %14 = sbr.rel (!%p12_p5) target bundleno = 1 (0x1), region = 78 }

// kernel: residual_forward.4
= control target key start
LH: loop header
LB: loop body
LE: loop exit
PB: predicated region body
PF: predicated region fallthrough
CT: control target
= control target key end

     0   :  { %s6161_s24 = smov 0   ;;  %s7099_s0 = inlined_call_operand.vmem [shape: bf16[2,16,16,128], index: 0, kind: input, shape index: {}]   ;;  %s7100_s1 = inlined_call_operand.vmem [shape: bf16[2,16,16,128], index: 1, kind: input, shape index: {}]   ;;  %s7101_s2 = inlined_call_operand.vmem [shape: bf16[9,128,128], index: 2, kind: input, shape index: {}]   ;;  %s7102_s3 = inlined_call_operand.vmem [shape: f32[1,128], index: 3, kind: input, shape index: {}]   ;;  %s7103_s4 = inlined_call_operand.vmem [shape: f32[1,128], index: 4, kind: input, shape index: {}]   ;;  %s7104_s5 = inlined_call_operand.vmem [shape: bf16[2,16,16,128], index: 5, kind: output, shape index: {0}]   ;;  %s7105_s6 = inlined_call_operand.vmem [shape: f32[1,128], index: 6, kind: output, shape index: {1}]   ;;  %s7106_s7 = inlined_call_operand.vmem [shape: f32[1,128], index: 7, kind: output, shape index: {2}]  }
   0x1 LB: > { %s6167_s25 = sadd.s32 4294967295, %s6116_s24   ;;  %p4567_p0 = scmp.ge.s32.totalorder %s6116_s24, 1  ;;  %s6116_s24 = sphi %s6161_s24, %s18_s24  }
   0x2   : > { %p242_p1 = scmp.lt.s32.totalorder %s6116_s24, 3 }
   0x4   : > { %p243_p2 = pnand %p4567_p0, %p242_p1 }
   0x5   : > { %v6029_v0 = vld [vmem:[%s7101_s2] sm:$0xff] (!%p243_p2)   ;;  %v6118_v2 = vmov (!%p243_p2), 0.0   ;;  %v6031_v3 = vld [vmem:[%s7101_s2 + $0x8] sm:$0xff] (!%p243_p2)   ;;  %p279_p3 = scmp.lt.s32.totalorder (!%p243_p2), %s6167_s25, 1  ;;  %v6033_v5 = vld [vmem:[%s7101_s2 + $0x10] sm:$0xff] (!%p243_p2)   ;;  %v6119_v7 = vmov (!%p243_p2), 0.0|0.0  }
   0x6   : > { %246 = sbr.rel (%p243_p2) target bundleno = 627 (0x273), region = 40  ;;  %v6030_v1 = vld [vmem:[%s7101_s2 + $0x100] sm:$0xff] (!%p243_p2)   ;;  %533 = vst [vmem:[#allocation2] sm:$0xff] (!%p243_p2), %v6118_v2  ;;  %534 = vst [vmem:[#allocation2 + $0x8] sm:$0xff] (!%p243_p2), %v6118_v2  ;;  %5315 = vmatprep.subr.bf16.mxu1 (!%p243_p2), %v6029_v0  ;;  %v6032_v4 = vld [vmem:[%s7101_s2 + $0x108] sm:$0xff] (!%p243_p2)   ;;  %5331 = vmatprep.mubr.bf16.mxu1 (!%p243_p2), %v6119_v7  ;;  %p4808_p4 = scmp.ne.s32.totalorder (!%p243_p2), %s6167_s25, 0 }
   0x7   : > { %535 = vst [vmem:[#allocation2 + $0x10] sm:$0x3] (!%p243_p2), %v6118_v2  ;;  %536 = vst [vmem:[#allocation2 + $0x18] sm:$0xff] (!%p243_p2), %v6118_v2  ;;  %5507 = vmatprep.subr.bf16.mxu0 (!%p243_p2), %v6030_v1  ;;  %5316 = vmatpush3.bf16.msra.mxu1 (!%p243_p2), %v6029_v0  ;;  %v6034_v6 = vld [vmem:[%s7101_s2 + $0x110] sm:$0xff] (!%p243_p2)   ;;  %v6035_v8 = vld [vmem:[%s7101_s2 + $0x18] sm:$0xff] (!%p243_p2)  }
   0x8   : > { %537 = vst [vmem:[#allocation2 + $0x20] sm:$0xff] (!%p243_p2), %v6118_v2  ;;  %538 = vst [vmem:[#allocation2 + $0x28] sm:$0x3] (!%p243_p2), %v6118_v2  ;;  %5508 = vmatpush3.bf16.msra.mxu0 (!%p243_p2), %v6030_v1  ;;  %5317 = vmatprep.subr.bf16.mxu1 (!%p243_p2), %v6031_v3  ;;  %v6036_v9 = vld [vmem:[%s7101_s2 + $0x118] sm:$0xff] (!%p243_p2)   ;;  %v6037_v10 = vld [vmem:[%s7101_s2 + $0x20] sm:$0xff] (!%p243_p2)  }
   0x9   : > { %539 = vst [vmem:[#allocation2 + $0x30] sm:$0xff] (!%p243_p2), %v6118_v2  ;;  %540 = vst [vmem:[#allocation2 + $0x38] sm:$0xff] (!%p243_p2), %v6118_v2  ;;  %5509 = vmatprep.subr.bf16.mxu0 (!%p243_p2), %v6032_v4  ;;  %v6038_v11 = vld [vmem:[%s7101_s2 + $0x120] sm:$0xff] (!%p243_p2)   ;;  %v6039_v12 = vld [vmem:[%s7101_s2 + $0x28] sm:$0xff] (!%p243_p2)  }
   0xa   : > { %541 = vst [vmem:[#allocation2 + $0x40] sm:$0x3] (!%p243_p2), %v6118_v2  ;;  %542 = vst [vmem:[#allocation2 + $0x48] sm:$0xff] (!%p243_p2), %v6118_v2  ;;  %v6040_v13 = vld [vmem:[%s7101_s2 + $0x128] sm:$0xff] (!%p243_p2)   ;;  %v6221_v15 = vld [vmem:[%s7102_s3] ss:$0 sm:$0xff] (!%p243_p2) }
   0xb   : > { %543 = vst [vmem:[#allocation2 + $0x50] sm:$0xff] (!%p243_p2), %v6118_v2  ;;  %544 = vst [vmem:[#allocation2 + $0x58] sm:$0x3] (!%p243_p2), %v6118_v2  ;;  %5318 = vmatpush3.bf16.msra.mxu1 (!%p243_p2), %v6031_v3  ;;  %v6226_v18 = vld [vmem:[%s7103_s4] ss:$0 sm:$0xff] (!%p243_p2)  ;;  %v6041_v24 = vld [vmem:[%s7101_s2 + $0x30] sm:$0xff] (!%p243_p2)  }
   0xc   : > { %545 = vst [vmem:[#allocation2 + $0x60] sm:$0xff] (!%p243_p2), %v6118_v2  ;;  %546 = vst [vmem:[#allocation2 + $0x68] sm:$0xff] (!%p243_p2), %v6118_v2  ;;  %5510 = vmatpush3.bf16.msra.mxu0 (!%p243_p2), %v6032_v4  ;;  %5319 = vmatprep.subr.bf16.mxu1 (!%p243_p2), %v6033_v5  ;;  %v6042_v26 = vld [vmem:[%s7101_s2 + $0x130] sm:$0xff] (!%p243_p2)   ;;  %v6043_v32 = vld [vmem:[%s7101_s2 + $0x38] sm:$0xff] (!%p243_p2)  }
   0xd   : > { %547 = vst [vmem:[#allocation2 + $0x70] sm:$0x3] %v6118_v2  ;;  %548 = vst [vmem:[#allocation2 + $0x78] sm:$0xff] %v6118_v2  ;;  %s280_s15 = scalar_select %p279_p3, %s6167_s25, 1  ;;  %5511 = vmatprep.subr.bf16.mxu0 %v6034_v6  ;;  %v6044_v39 = vld [vmem:[%s7101_s2 + $0x138] sm:$0xff]   ;;  %v6045_v54 = vld [vmem:[%s7101_s2 + $0x40] sm:$0xff]  }
   0xe   : > { %549 = vst [vmem:[#allocation2 + $0x80] sm:$0xff] %v6118_v2  ;;  %550 = vst [vmem:[#allocation2 + $0x88] sm:$0x3] %v6118_v2  ;;  %v6046_v60 = vld [vmem:[%s7101_s2 + $0x140] sm:$0xff]  }
   0xf   : > { %551 = vst [vmem:[#allocation2 + $0x90] sm:$0xff] %v6118_v2  ;;  %552 = vst [vmem:[#allocation2 + $0x98] sm:$0xff] %v6118_v2  ;;  %s6197_s20 = sshll.u32 %s280_s15, 7  ;;  %5320 = vmatpush3.bf16.msra.mxu1 %v6033_v5 }
  0x10   : > { %553 = vst [vmem:[#allocation2 + $0xa0] sm:$0x3] %v6118_v2  ;;  %554 = vst [vmem:[#allocation2 + $0xa8] sm:$0xff] %v6118_v2  ;;  %5512 = vmatpush3.bf16.msra.mxu0 %v6034_v6  ;;  %5321 = vmatprep.subr.bf16.mxu1 %v6035_v8  ;;  %s6209_s29 = scalar_lea.vmem %s7099_s0, %s6197_s20  ;;  %s6828_s15 = scalar_lea.vmem %s7100_s1, %s6197_s20 }
  0x11   : > { %555 = vst [vmem:[#allocation2 + $0xb0] sm:$0xff] %v6118_v2  ;;  %556 = vst [vmem:[#allocation2 + $0xb8] sm:$0x3] %v6118_v2  ;;  %5513 = vmatprep.subr.bf16.mxu0 %v6036_v9  ;;  %v4847_v14 = vld [vmem:[%s6209_s29] sm:$0xff]   ;;  %v5054_v19 = vld [vmem:[%s6209_s29 + $0x8] sm:$0xff]   ;;  %s6846_s18 = scalar_lea.vmem %s7104_s5, %s6197_s20 }
  0x12   : > { %557 = vst [vmem:[#allocation2 + $0xc0] sm:$0xff] %v6118_v2  ;;  %558 = vst [vmem:[#allocation2 + $0xc8] sm:$0xff] %v6118_v2  ;;  %v4848_v16 = vunpack.c.l.bf16 %v4847_v14  ;;  %v4849_v17 = vunpack.c.h.bf16 %v4847_v14  ;;  %v4852_v22 = vunpack.c.l.bf16 %v5054_v19  ;;  %v4853_v23 = vunpack.c.h.bf16 %v5054_v19  ;;  %v5055_v25 = vld [vmem:[%s6209_s29 + $0x10] sm:$0xff]   ;;  %v5056_v31 = vld [vmem:[%s6209_s29 + $0x18] sm:$0xff]  }
  0x13   : > { %559 = vst [vmem:[#allocation2 + $0xd0] sm:$0x3] %v6118_v2  ;;  %560 = vst [vmem:[#allocation2 + $0xd8] sm:$0xff] %v6118_v2  ;;  %5322 = vmatpush3.bf16.msra.mxu1 %v6035_v8  ;;  %v4856_v33 = vunpack.c.l.bf16 %v5055_v25  ;;  %v4857_v34 = vunpack.c.h.bf16 %v5055_v25  ;;  %v4860_v35 = vunpack.c.l.bf16 %v5056_v31  ;;  %v4861_v36 = vunpack.c.h.bf16 %v5056_v31  ;;  %v5057_v47 = vld [vmem:[%s6209_s29 + $0x20] sm:$0xff]   ;;  %v5058_v62 = vld [vmem:[%s6209_s29 + $0x28] sm:$0xff]  }
  0x14   : > { %561 = vst [vmem:[#allocation2 + $0xe0] sm:$0xff] %v6118_v2  ;;  %562 = vst [vmem:[#allocation2 + $0xe8] sm:$0x3] %v6118_v2  ;;  %5514 = vmatpush3.bf16.msra.mxu0 %v6036_v9  ;;  %5323 = vmatprep.subr.bf16.mxu1 %v6037_v10  ;;  %v366_v20 = vmul.f32 %v4848_v16, %v6221_v15  ;;  %v367_v21 = vmul.f32 %v4849_v17, %v6221_v15  ;;  %v4864_v57 = vunpack.c.l.bf16 %v5057_v47  ;;  %v6284_v8 = vld [vmem:[%s7101_s2 + $0x48] sm:$0xff]  }
  0x15   : > { %563 = vst [vmem:[#allocation2 + $0xf0] sm:$0xff] %v6118_v2  ;;  %564 = vst [vmem:[#allocation2 + $0xf8] sm:$0xff] %v6118_v2  ;;  %5515 = vmatprep.subr.bf16.mxu0 %v6038_v11  ;;  %v368_v29 = vmul.f32 %v4852_v22, %v6221_v15  ;;  %v369_v30 = vmul.f32 %v4853_v23, %v6221_v15  ;;  %v370_v42 = vmul.f32 %v4856_v33, %v6221_v15 }
  0x16   : > { %565 = vst [vmem:[#allocation2 + $0x100] sm:$0x3] %v6118_v2  ;;  %566 = vst [vmem:[#allocation2 + $0x108] sm:$0xff] %v6118_v2  ;;  %v405_v27 = vadd.f32 %v6226_v18, %v366_v20  ;;  %v406_v28 = vadd.f32 %v6226_v18, %v367_v21  ;;  %v371_v45 = vmul.f32 %v4857_v34, %v6221_v15  ;;  %v4865_v58 = vunpack.c.h.bf16 %v5057_v47 }
  0x17   : > { %567 = vst [vmem:[#allocation2 + $0x110] sm:$0xff] %v6118_v2  ;;  %568 = vst [vmem:[#allocation2 + $0x118] sm:$0x3] %v6118_v2  ;;  %5324 = vmatpush3.bf16.msra.mxu1 %v6037_v10  ;;  %v407_v40 = vadd.f32 %v6226_v18, %v368_v29  ;;  %v408_v41 = vadd.f32 %v6226_v18, %v369_v30  ;;  %v372_v46 = vmul.f32 %v4860_v35, %v6221_v15  ;;  %v6051_v35 = vld [vmem:[%s7101_s2 + $0x50] sm:$0xff]  }
  0x18   : > { %569 = vst [vmem:[#allocation2 + $0x120] sm:$0xff] %v6118_v2  ;;  %570 = vst [vmem:[#allocation2 + $0x128] sm:$0xff] %v6118_v2  ;;  %5516 = vmatpush3.bf16.msra.mxu0 %v6038_v11  ;;  %5325 = vmatprep.subr.bf16.mxu1 %v6039_v12  ;;  %vm437_vm0 = vcmp.gt.f32.partialorder %v405_v27, 0.0  ;;  %vm438_vm1 = vcmp.gt.f32.partialorder %v406_v28, 0.0  ;;  %v469_v37 = vmul.f32 0.01, %v405_v27  ;;  %v409_v51 = vadd.f32 %v6226_v18, %v370_v42 }
  0x19   : > { %571 = vst [vmem:[#allocation2 + $0x130] sm:$0x3] %v6118_v2  ;;  %572 = vst [vmem:[#allocation2 + $0x138] sm:$0xff] %v6118_v2  ;;  %5517 = vmatprep.subr.bf16.mxu0 %v6040_v13  ;;  %v470_v38 = vmul.f32 0.01, %v406_v28  ;;  %vm439_vm2 = vcmp.gt.f32.partialorder %v407_v40, 0.0  ;;  %v410_v52 = vadd.f32 %v6226_v18, %v371_v45  ;;  %v373_v53 = vmul.f32 %v4861_v36, %v6221_v15 }
  0x1a   : > { %573 = vst [vmem:[#allocation2 + $0x140] sm:$0xff] %v6118_v2  ;;  %574 = vst [vmem:[#allocation2 + $0x148] sm:$0x3] %v6118_v2  ;;  %v501_v43 = vsel %vm437_vm0, %v405_v27, %v469_v37  ;;  %vm440_vm3 = vcmp.gt.f32.partialorder %v408_v41, 0.0  ;;  %v471_v49 = vmul.f32 0.01, %v407_v40  ;;  %v411_v56 = vadd.f32 %v6226_v18, %v372_v46 }
  0x1b   : > { %575 = vst [vmem:[#allocation2 + $0x150] sm:$0xff] %v6118_v2  ;;  %576 = vst [vmem:[#allocation2 + $0x158] sm:$0xff] %v6118_v2  ;;  %5326 = vmatpush3.bf16.msra.mxu1 %v6039_v12  ;;  %v502_v44 = vsel %vm438_vm1, %v406_v28, %v470_v38  ;;  %v472_v50 = vmul.f32 0.01, %v408_v41  ;;  %vm441_vm4 = vcmp.gt.f32.partialorder %v409_v51, 0.0  ;;  %vm442_vm5 = vcmp.gt.f32.partialorder %v410_v52, 0.0 }
  0x1c   : > { %577 = vst [vmem:[#allocation2 + $0x160] sm:$0x3] %v6118_v2  ;;  %578 = vst [vmem:[#allocation2 + $0x168] sm:$0xff] %v6118_v2  ;;  %5518 = vmatpush3.bf16.msra.mxu0 %v6040_v13  ;;  %5327 = vmatprep.subr.bf16.mxu1 %v6041_v24  ;;  %v6255_v48 = vpack.c.bf16 %v502_v44, %v501_v43  ;;  %v503_v55 = vsel %vm439_vm2, %v407_v40, %v471_v49  ;;  %v473_v61 = vmul.f32 0.01, %v409_v51  ;;  %v5059_v11 = vld [vmem:[%s6209_s29 + $0x30] sm:$0xff]  }
  0x1d   : > { %579 = vst [vmem:[#allocation2 + $0x170] sm:$0xff] %v6118_v2  ;;  %580 = vst [vmem:[#allocation2 + $0x178] sm:$0x3] %v6118_v2  ;;  %5519 = vmatprep.subr.bf16.mxu0 %v6042_v26  ;;  %v504_v59 = vsel %vm440_vm3, %v408_v41, %v472_v50  ;;  %v474_v0 = vmul.f32 0.01, %v410_v52  ;;  %v412_v1 = vadd.f32 %v6226_v18, %v373_v53  ;;  %vm443_vm6 = vcmp.gt.f32.partialorder %v411_v56, 0.0 }
  0x1e   : > { %581 = vst [vmem:[#allocation2 + $0x180] sm:$0xff] %v6118_v2  ;;  %582 = vst [vmem:[#allocation2 + $0x188] sm:$0xff] %v6118_v2  ;;  %5523 = vmatprep.mubr.bf16.mxu0 %v6255_v48  ;;  %v6270_v63 = vpack.c.bf16 %v504_v59, %v503_v55  ;;  %v505_v3 = vsel %vm441_vm4, %v409_v51, %v473_v61  ;;  %v475_v4 = vmul.f32 0.01, %v411_v56  ;;  %v4868_v10 = vunpack.c.l.bf16 %v5058_v62  ;;  %v6049_v28 = vld [vmem:[%s7101_s2 + $0x150] sm:$0xff]   ;;  %v6311_v42 = vld [vmem:[%s6209_s29 + $0x40] sm:$0xff]  }
  0x1f   : > { %583 = vst [vmem:[#allocation2 + $0x190] sm:$0x3] %v6118_v2  ;;  %584 = vst [vmem:[#allocation2 + $0x198] sm:$0xff] %v6118_v2  ;;  %5328 = vmatpush3.bf16.msra.mxu1 %v6041_v24  ;;  %v374_v5 = vmul.f32 %v4864_v57, %v6221_v15  ;;  %v375_v6 = vmul.f32 %v4865_v58, %v6221_v15  ;;  %v506_v7 = vsel %vm442_vm5, %v410_v52, %v474_v0  ;;  %v5060_v24 = vld [vmem:[%s6209_s29 + $0x38] sm:$0xff]  }
  0x20   : > { %585 = vst [vmem:[#allocation2 + $0x1a0] sm:$0xff] %v6118_v2  ;;  %586 = vst [vmem:[#allocation2 + $0x1a8] sm:$0x3] %v6118_v2  ;;  %5520 = vmatpush3.bf16.msra.mxu0 %v6042_v26  ;;  %5329 = vmatprep.subr.bf16.mxu1 %v6043_v32  ;;  %v6276_v2 = vld [vmem:[%s7101_s2 + $0x148] sm:$0xff]   ;;  %vm444_vm7 = vcmp.gt.f32.partialorder %v412_v1, 0.0  ;;  %v6287_v14 = vpack.c.bf16 %v506_v7, %v505_v3  ;;  %v507_v16 = vsel %vm443_vm6, %v411_v56, %v475_v4  ;;  %v6054_v4 = vld [vmem:[%s7101_s2 + $0x58] sm:$0xff]  }
  0x21   : > { %588 = vst [vmem:[#allocation2 + $0x19] sm:$0xff] %v501_v43  ;;  %589 = vst [vmem:[#allocation2 + $0x21] sm:$0xff] %v502_v44  ;;  %5521 = vmatprep.subr.bf16.mxu0 %v6044_v39  ;;  %v476_v9 = vmul.f32 0.01, %v412_v1  ;;  %v413_v17 = vadd.f32 %v6226_v18, %v374_v5  ;;  %v414_v19 = vadd.f32 %v6226_v18, %v375_v6  ;;  %v4869_v22 = vunpack.c.h.bf16 %v5058_v62  ;;  %v5062_v6 = vld [vmem:[%s6209_s29 + $0x48] sm:$0xff]  }
  0x22   : > { %590 = vst [vmem:[#allocation2 + $0x31] sm:$0xff] %v503_v55  ;;  %591 = vst [vmem:[#allocation2 + $0x39] sm:$0xff] %v504_v59  ;;  %v376_v23 = vmul.f32 %v4868_v10, %v6221_v15  ;;  %v4873_v36 = vunpack.c.h.bf16 %v5059_v11  ;;  %v4876_v37 = vunpack.c.l.bf16 %v5060_v24  ;;  %v4877_v38 = vunpack.c.h.bf16 %v5060_v24 }
  0x23   : > { %5330 = vmatpush3.bf16.msra.mxu1 %v6043_v32  ;;  %592 = vst [vmem:[#allocation2 + $0x49] sm:$0xff] %v505_v3  ;;  %593 = vst [vmem:[#allocation2 + $0x51] sm:$0xff] %v506_v7  ;;  %v508_v21 = vsel %vm444_vm7, %v412_v1, %v476_v9  ;;  %vm445_vm8 = vcmp.gt.f32.partialorder %v413_v17, 0.0  ;;  %vm446_vm9 = vcmp.gt.f32.partialorder %v414_v19, 0.0  ;;  %v477_v26 = vmul.f32 0.01, %v413_v17 }
  0x24   : > { %5522 = vmatpush3.bf16.msra.mxu0 %v6044_v39  ;;  %5363 = vmatprep.subr.bf16.mxu1 %v6045_v54  ;;  %594 = vst [vmem:[#allocation2 + $0x61] sm:$0xff] %v507_v16  ;;  %595 = vst [vmem:[#allocation2 + $0x69] sm:$0xff] %v508_v21  ;;  %v6295_v25 = vpack.c.bf16 %v508_v21, %v507_v16  ;;  %v478_v29 = vmul.f32 0.01, %v414_v19  ;;  %v377_v30 = vmul.f32 %v4869_v22, %v6221_v15 }
  0x25   : > { %5555 = vmatprep.subr.bf16.mxu0 %v6046_v60  ;;  %v415_v31 = vadd.f32 %v6226_v18, %v376_v23  ;;  %v4872_v32 = vunpack.c.l.bf16 %v5059_v11  ;;  %v509_v34 = vsel %vm445_vm8, %v413_v17, %v477_v26  ;;  %v379_v47 = vmul.f32 %v4873_v36, %v6221_v15  ;;  %v5063_v11 = vld [vmem:[%s6209_s29 + $0x50] sm:$0xff]   ;;  %v6057_v23 = vld [vmem:[%s7101_s2 + $0x60] sm:$0xff]  }
  0x26   : > { %v510_v40 = vsel %vm446_vm9, %v414_v19, %v478_v29  ;;  %596 = vst [vmem:[#allocation2 + $0x79] sm:$0xff] %v509_v34  ;;  %v416_v41 = vadd.f32 %v6226_v18, %v377_v30  ;;  %v380_v51 = vmul.f32 %v4876_v37, %v6221_v15  ;;  %v381_v52 = vmul.f32 %v4877_v38, %v6221_v15  ;;  %v6053_v29 = vld [vmem:[%s7101_s2 + $0x168] sm:$0xff]  }
  0x27   : > { %5524 = vmatmul.mubr.bf16.vlgmr.msra.gmra.mrb[0].mxu0 %v6270_v63  ;;  %vm447_vm10 = vcmp.gt.f32.partialorder %v415_v31, 0.0  ;;  %597 = vst [vmem:[#allocation2 + $0x81] sm:$0xff] %v510_v40  ;;  %v6313_v44 = vpack.c.bf16 %v510_v40, %v509_v34  ;;  %v479_v45 = vmul.f32 0.01, %v415_v31  ;;  %v378_v46 = vmul.f32 %v4872_v32, %v6221_v15 }
  0x28   : > { %v654_v12 = vld [vmem:[#allocation2 + $0x18] sm:$0xff]  ;;  %v655_v13 = vld [vmem:[#allocation2 + $0x20] sm:$0xff]  ;;  %5556 = vmatpush3.bf16.msra.mxu0 %v6046_v60  ;;  %5527 = vmatprep.mubr.bf16.mxu0 %v6287_v14  ;;  %vm448_vm11 = vcmp.gt.f32.partialorder %v416_v41, 0.0  ;;  %v480_v50 = vmul.f32 0.01, %v416_v41  ;;  %v4880_v58 = vunpack.c.l.bf16 %v6311_v42  ;;  %v418_v61 = vadd.f32 %v6226_v18, %v379_v47 }
  0x29   : > { %v717_v20 = vpack.c.bf16 %v655_v13, %v654_v12  ;;  %v656_v27 = vld [vmem:[#allocation2 + $0x30] sm:$0xff]  ;;  %5557 = vmatprep.subr.bf16.mxu0 %v6276_v2  ;;  %v657_v33 = vld [vmem:[#allocation2 + $0x38] sm:$0xff]  ;;  %v511_v56 = vsel %vm447_vm10, %v415_v31, %v479_v45  ;;  %v417_v57 = vadd.f32 %v6226_v18, %v378_v46  ;;  %v419_v62 = vadd.f32 %v6226_v18, %v380_v51 }
  0x2a   : > { %v718_v39 = vpack.c.bf16 %v657_v33, %v656_v27  ;;  %v658_v43 = vld [vmem:[#allocation2 + $0x48] sm:$0xff]  ;;  %v659_v49 = vld [vmem:[#allocation2 + $0x50] sm:$0xff]  ;;  %v512_v60 = vsel %vm448_vm11, %v416_v41, %v480_v50  ;;  %598 = vst [vmem:[#allocation2 + $0x91] sm:$0xff] %v511_v56  ;;  %v420_v0 = vadd.f32 %v6226_v18, %v381_v52  ;;  %vm450_vm13 = vcmp.gt.f32.partialorder %v418_v61, 0.0  ;;  %v2501_v51 = vld [vmem:[#allocation2 + $0x1a] sm:$0xff] }
  0x2b   : > { %5332 = vmatmul.mubr.bf16.vlgmr.msra.gmra.mrb[0].mxu1 %v717_v20  ;;  %v6320_v53 = vpack.c.bf16 %v659_v49, %v658_v43  ;;  %v660_v55 = vld [vmem:[#allocation2 + $0x60] sm:$0xff]  ;;  %v661_v59 = vld [vmem:[#allocation2 + $0x68] sm:$0xff]  ;;  %599 = vst [vmem:[#allocation2 + $0x99] sm:$0xff] %v512_v60  ;;  %vm449_vm12 = vcmp.gt.f32.partialorder %v417_v57, 0.0  ;;  %v481_v3 = vmul.f32 0.01, %v417_v57  ;;  %v4881_v16 = vunpack.c.h.bf16 %v6311_v42 }
  0x2c   : > { %5364 = vmatpush3.bf16.msra.mxu1 %v6045_v54  ;;  %5558 = vmatpush3.bf16.msra.mxu0 %v6276_v2  ;;  %v6050_v54 = vld [vmem:[%s7101_s2 + $0x158] sm:$0xff]   ;;  %v6333_v1 = vpack.c.bf16 %v661_v59, %v660_v55  ;;  %v6052_v2 = vld [vmem:[%s7101_s2 + $0x160] sm:$0xff]   ;;  %v482_v5 = vmul.f32 0.01, %v418_v61  ;;  %vm451_vm14 = vcmp.gt.f32.partialorder %v419_v62, 0.0  ;;  %vm452_vm15 = vcmp.gt.f32.partialorder %v420_v0, 0.0 }
  0x2d   : > { %5365 = vmatprep.subr.bf16.mxu1 %v6284_v8  ;;  %5335 = vmatprep.mubr.bf16.mxu1 %v718_v39  ;;  %v662_v7 = vld [vmem:[#allocation2 + $0x78] sm:$0xff]  ;;  %v483_v9 = vmul.f32 0.01, %v419_v62  ;;  %v484_v10 = vmul.f32 0.01, %v420_v0  ;;  %v382_v17 = vmul.f32 %v4880_v58, %v6221_v15  ;;  %v6350_v20 = vpack.c.bf16 %v512_v60, %v511_v56  ;;  %v6059_v43 = vld [vmem:[%s7101_s2 + $0x68] sm:$0xff]  }
  0x2e   : > { %5559 = vmatprep.subr.bf16.mxu0 %v6049_v28  ;;  %v663_v12 = vld [vmem:[#allocation2 + $0x80] sm:$0xff]  ;;  %v514_v13 = vsel %vm450_vm13, %v418_v61, %v482_v5  ;;  %v383_v26 = vmul.f32 %v4881_v16, %v6221_v15  ;;  %v4885_v32 = vunpack.c.h.bf16 %v5062_v6  ;;  %v4888_v33 = vunpack.c.l.bf16 %v5063_v11  ;;  %v6369_v39 = vld [vmem:[%s6209_s29 + $0x58] sm:$0xff]   ;;  %v6383_v45 = vld [vmem:[%s7101_s2 + $0x170] sm:$0xff]  }
  0x2f   : > { %5528 = vmatmul.mubr.bf16.gmra.mrb[4].mxu0 %v6295_v25  ;;  %v6348_v19 = vpack.c.bf16 %v663_v12, %v662_v7  ;;  %601 = vst [vmem:[#allocation2 + $0xb1] sm:$0xff] %v514_v13  ;;  %v515_v21 = vsel %vm451_vm14, %v419_v62, %v483_v9  ;;  %v516_v22 = vsel %vm452_vm15, %v420_v0, %v484_v10  ;;  %v4889_v34 = vunpack.c.h.bf16 %v5063_v11  ;;  %v2502_v58 = vld [vmem:[#allocation2 + $0x22] sm:$0xff]  ;;  %v6061_v7 = vld [vmem:[%s7101_s2 + $0x70] sm:$0xff]   ;;  %v2504_v10 = vld [vmem:[#allocation2 + $0x3a] sm:$0xff] }
  0x30   : > { %5366 = vmatpush3.bf16.msra.mxu1 %v6284_v8  ;;  %5560 = vmatpush3.bf16.msra.mxu0 %v6049_v28  ;;  %v513_v8 = vsel %vm449_vm12, %v417_v57, %v481_v3  ;;  %602 = vst [vmem:[#allocation2 + $0xc1] sm:$0xff] %v515_v21  ;;  %603 = vst [vmem:[#allocation2 + $0xc9] sm:$0xff] %v516_v22  ;;  %v421_v27 = vadd.f32 %v6226_v18, %v382_v17  ;;  %v4884_v28 = vunpack.c.l.bf16 %v5062_v6  ;;  %v5065_v62 = vld [vmem:[%s6209_s29 + $0x60] sm:$0xff]   ;;  %v2503_v9 = vld [vmem:[#allocation2 + $0x32] sm:$0xff] }
  0x31   : > { %5367 = vmatprep.subr.bf16.mxu1 %v6051_v35  ;;  %5561 = vmatprep.subr.bf16.mxu0 %v6050_v54  ;;  %600 = vst [vmem:[#allocation2 + $0xa9] sm:$0xff] %v513_v8  ;;  %v6357_v24 = vpack.c.bf16 %v514_v13, %v513_v8  ;;  %v664_v30 = vld [vmem:[#allocation2 + $0x90] sm:$0xff]  ;;  %v6364_v31 = vpack.c.bf16 %v516_v22, %v515_v21  ;;  %v4892_v56 = vunpack.c.l.bf16 %v6369_v39  ;;  %v4893_v61 = vunpack.c.h.bf16 %v6369_v39  ;;  %v5066_v22 = vld [vmem:[%s6209_s29 + $0x68] sm:$0xff]  }
  0x32   : > { %5531 = vmatprep.mubr.bf16.mxu0 %v6313_v44  ;;  %v422_v36 = vadd.f32 %v6226_v18, %v383_v26  ;;  %vm453_vm0 = vcmp.gt.f32.partialorder %v421_v27, 0.0  ;;  %v485_v37 = vmul.f32 0.01, %v421_v27  ;;  %v384_v38 = vmul.f32 %v4884_v28, %v6221_v15  ;;  %v2505_v12 = vld [vmem:[#allocation2 + $0x4a] sm:$0xff]  ;;  %v2506_v26 = vld [vmem:[#allocation2 + $0x52] sm:$0xff] }
  0x33   : > { %5336 = vmatmul.mubr.bf16.gmra.mrb[4].mxu1 %v6320_v53  ;;  %v385_v41 = vmul.f32 %v4885_v32, %v6221_v15  ;;  %v386_v42 = vmul.f32 %v4888_v33, %v6221_v15  ;;  %v388_v21 = vmul.f32 %v4892_v56, %v6221_v15  ;;  %v389_v28 = vmul.f32 %v4893_v61, %v6221_v15 }
  0x34   : > { %5339 = vmatprep.mubr.bf16.mxu1 %v6333_v1  ;;  %5368 = vmatpush3.bf16.msra.mxu1 %v6051_v35  ;;  %v665_v35 = vld [vmem:[#allocation2 + $0x98] sm:$0xff]  ;;  %vm454_vm1 = vcmp.gt.f32.partialorder %v422_v36, 0.0  ;;  %v486_v46 = vmul.f32 0.01, %v422_v36  ;;  %v6385_v47 = vsel %vm453_vm0, %v421_v27, %v485_v37  ;;  %v423_v49 = vadd.f32 %v6226_v18, %v384_v38 }
  0x35   : > { %5369 = vmatprep.subr.bf16.mxu1 %v6054_v4  ;;  %5562 = vmatpush3.bf16.msra.mxu0 %v6050_v54  ;;  %v6372_v40 = vpack.c.bf16 %v665_v35, %v664_v30  ;;  %604 = vst [vmem:[#allocation2 + $0xd9] sm:$0xff] %v6385_v47  ;;  %v424_v52 = vadd.f32 %v6226_v18, %v385_v41  ;;  %v6063_v35 = vld [vmem:[%s7101_s2 + $0x78] sm:$0xff]   ;;  %v4900_v39 = vunpack.c.l.bf16 %v5066_v22  ;;  %v4901_v41 = vunpack.c.h.bf16 %v5066_v22 }
  0x36   : > { %5563 = vmatprep.subr.bf16.mxu0 %v6052_v2  ;;  %v387_v54 = vmul.f32 %v4889_v34, %v6221_v15  ;;  %v425_v55 = vadd.f32 %v6226_v18, %v386_v42  ;;  %v6396_v59 = vsel %vm454_vm1, %v422_v36, %v486_v46  ;;  %vm455_vm2 = vcmp.gt.f32.partialorder %v423_v49, 0.0  ;;  %v6058_v42 = vld [vmem:[%s7101_s2 + $0x180] sm:$0xff]  }
  0x37   : > { %5532 = vmatmul.mubr.bf16.gmra.mrb[8].mxu0 %v6350_v20  ;;  %v487_v60 = vmul.f32 0.01, %v423_v49  ;;  %v668_v3 = vld [vmem:[#allocation2 + $0xc0] sm:$0xff]  ;;  %605 = vst [vmem:[#allocation2 + $0xe1] sm:$0xff] %v6396_v59  ;;  %vm456_vm3 = vcmp.gt.f32.partialorder %v424_v52, 0.0  ;;  %v6430_v30 = vpack.c.bf16 %v2504_v10, %v2503_v9  ;;  %v427_v33 = vadd.f32 %v6226_v18, %v388_v21  ;;  %v6060_v9 = vld [vmem:[%s7101_s2 + $0x188] sm:$0xff]  }
  0x38   : > { %5370 = vmatpush3.bf16.msra.mxu1 %v6054_v4  ;;  %v666_v50 = vld [vmem:[#allocation2 + $0xa8] sm:$0xff]  ;;  %5535 = vmatprep.mubr.bf16.mxu0 %v6357_v24  ;;  %v667_v57 = vld [vmem:[#allocation2 + $0xb0] sm:$0xff]  ;;  %v488_v5 = vmul.f32 0.01, %v424_v52  ;;  %v426_v6 = vadd.f32 %v6226_v18, %v387_v54  ;;  %vm457_vm4 = vcmp.gt.f32.partialorder %v425_v55, 0.0  ;;  %v4897_v34 = vunpack.c.h.bf16 %v5065_v62 }
  0x39   : > { %5371 = vmatprep.subr.bf16.mxu1 %v6057_v23  ;;  %5564 = vmatpush3.bf16.msra.mxu0 %v6052_v2  ;;  %v6400_v0 = vpack.c.bf16 %v667_v57, %v666_v50  ;;  %v6405_v2 = vld [vmem:[%s7101_s2 + $0x178] sm:$0xff]   ;;  %v669_v4 = vld [vmem:[#allocation2 + $0xc8] sm:$0xff]  ;;  %v6415_v11 = vsel %vm455_vm2, %v423_v49, %v487_v60  ;;  %v489_v13 = vmul.f32 0.01, %v425_v55  ;;  %v428_v37 = vadd.f32 %v6226_v18, %v389_v28  ;;  %v5067_v54 = vld [vmem:[%s6209_s29 + $0x70] sm:$0xff]  }
  0x3a   : > { %5565 = vmatprep.subr.bf16.mxu0 %v6053_v29  ;;  %v6412_v8 = vpack.c.bf16 %v669_v4, %v668_v3  ;;  %v6418_v16 = vsel %vm456_vm3, %v424_v52, %v488_v5  ;;  %606 = vst [vmem:[#allocation2 + $0xf1] sm:$0xff] %v6415_v11  ;;  %vm458_vm5 = vcmp.gt.f32.partialorder %v426_v6, 0.0  ;;  %v490_v17 = vmul.f32 0.01, %v426_v6  ;;  %v2510_v28 = vld [vmem:[#allocation2 + $0x82] sm:$0xff] }
  0x3b   : > { %5340 = vmatmul.mubr.bf16.gmra.mrb[8].mxu1 %v6348_v19  ;;  %607 = vst [vmem:[#allocation2 + $0xf9] sm:$0xff] %v6418_v16  ;;  %v6426_v27 = vsel %vm457_vm4, %v425_v55, %v489_v13  ;;  %vm459_vm6 = vcmp.gt.f32.partialorder %v427_v33, 0.0  ;;  %v391_v46 = vmul.f32 %v4897_v34, %v6221_v15  ;;  %vm460_vm7 = vcmp.gt.f32.partialorder %v428_v37, 0.0  ;;  %v6459_v55 = vld [vmem:[%s7101_s2 + $0x80] sm:$0xff]  }
  0x3c   : > { %5343 = vmatprep.mubr.bf16.mxu1 %v6372_v40  ;;  %5372 = vmatpush3.bf16.msra.mxu1 %v6057_v23  ;;  %v6423_v23 = vpack.c.bf16 %v2502_v58, %v2501_v51  ;;  %v6432_v32 = vsel %vm458_vm5, %v426_v6, %v490_v17  ;;  %608 = vst [vmem:[#allocation2 + $0x109] sm:$0xff] %v6426_v27  ;;  %v670_v36 = vld [vmem:[#allocation2 + $0xd8] sm:$0xff]  ;;  %v492_v50 = vmul.f32 0.01, %v428_v37  ;;  %v2507_v6 = vld [vmem:[#allocation2 + $0x62] sm:$0xff] }
  0x3d   : > { %5373 = vmatprep.subr.bf16.mxu1 %v6059_v43  ;;  %5566 = vmatpush3.bf16.msra.mxu0 %v6053_v29  ;;  %v4896_v29 = vunpack.c.l.bf16 %v5065_v62  ;;  %609 = vst [vmem:[#allocation2 + $0x111] sm:$0xff] %v6432_v32  ;;  %v392_v52 = vmul.f32 %v4900_v39, %v6221_v15  ;;  %v430_v58 = vadd.f32 %v6226_v18, %v391_v46  ;;  %v2509_v17 = vld [vmem:[#allocation2 + $0x7a] sm:$0xff] }
  0x3e   : > { %5567 = vmatprep.subr.bf16.mxu0 %v6383_v45  ;;  %v671_v49 = vld [vmem:[#allocation2 + $0xe0] sm:$0xff]  ;;  %v393_v60 = vmul.f32 %v4901_v41, %v6221_v15  ;;  %v6468_v62 = vsel %vm460_vm7, %v428_v37, %v492_v50  ;;  %v6506_v50 = vpack.c.bf16 %v2510_v28, %v2509_v17  ;;  %v1096_v28 = vpack.c.bf16 %v6432_v32, %v6426_v27  ;;  %v6085_v27 = vld [vmem:[%s7101_s2 + $0xd0] sm:$0xff]   ;;  %v6087_v32 = vld [vmem:[%s7101_s2 + $0xd8] sm:$0xff]  }
  0x3f   : > { %5536 = vmatmul.mubr.bf16.gmra.mrb[12].mxu0 %v6364_v31  ;;  %v390_v38 = vmul.f32 %v4896_v29, %v6221_v15  ;;  %v6461_v56 = vpack.c.bf16 %v671_v49, %v670_v36  ;;  %v431_v4 = vadd.f32 %v6226_v18, %v392_v52  ;;  %611 = vst [vmem:[#allocation2 + $0x129] sm:$0xff] %v6468_v62  ;;  %vm462_vm9 = vcmp.gt.f32.partialorder %v430_v58, 0.0  ;;  %v2512_v17 = vld [vmem:[#allocation2 + $0x9a] sm:$0xff] }
  0x40   : > { %5374 = vmatpush3.bf16.msra.mxu1 %v6059_v43  ;;  %v6449_v43 = vpack.c.bf16 %v2506_v26, %v2505_v12  ;;  %5571 = vmatprep.mubr.bf16.mxu0 %v6423_v23  ;;  %v432_v10 = vadd.f32 %v6226_v18, %v393_v60  ;;  %v4904_v12 = vunpack.c.l.bf16 %v5067_v54  ;;  %v4905_v36 = vunpack.c.h.bf16 %v5067_v54 }
  0x41   : > { %5375 = vmatprep.subr.bf16.mxu1 %v6061_v7  ;;  %5568 = vmatpush3.bf16.msra.mxu0 %v6383_v45  ;;  %v491_v45 = vmul.f32 0.01, %v427_v33  ;;  %v429_v51 = vadd.f32 %v6226_v18, %v390_v38  ;;  %v672_v61 = vld [vmem:[#allocation2 + $0xf0] sm:$0xff]  ;;  %vm463_vm10 = vcmp.gt.f32.partialorder %v431_v4, 0.0  ;;  %v495_v22 = vmul.f32 0.01, %v431_v4 }
  0x42   : > { %5569 = vmatprep.subr.bf16.mxu0 %v6405_v2  ;;  %v673_v5 = vld [vmem:[#allocation2 + $0xf8] sm:$0xff]  ;;  %vm464_vm11 = vcmp.gt.f32.partialorder %v432_v10, 0.0  ;;  %v496_v34 = vmul.f32 0.01, %v432_v10  ;;  %v394_v37 = vmul.f32 %v4904_v12, %v6221_v15  ;;  %v395_v41 = vmul.f32 %v4905_v36, %v6221_v15 }
  0x43   : > { %5344 = vmatmul.mubr.bf16.gmra.mrb[12].mxu1 %v6400_v0  ;;  %v6463_v57 = vsel %vm459_vm6, %v427_v33, %v491_v45  ;;  %vm461_vm8 = vcmp.gt.f32.partialorder %v429_v51, 0.0  ;;  %v493_v3 = vmul.f32 0.01, %v429_v51  ;;  %v6477_v13 = vpack.c.bf16 %v673_v5, %v672_v61  ;;  %v674_v26 = vld [vmem:[#allocation2 + $0x108] sm:$0xff]  ;;  %v6062_v33 = vld [vmem:[%s7101_s2 + $0x190] sm:$0xff]   ;;  %v5068_v45 = vld [vmem:[%s6209_s29 + $0x78] sm:$0xff]  }
  0x44   : > { %5347 = vmatprep.mubr.bf16.mxu1 %v6412_v8  ;;  %5376 = vmatpush3.bf16.msra.mxu1 %v6061_v7  ;;  %610 = vst [vmem:[#allocation2 + $0x121] sm:$0xff] %v6463_v57  ;;  %v2508_v7 = vld [vmem:[#allocation2 + $0x6a] sm:$0xff]  ;;  %v6497_v39 = vsel %vm464_vm11, %v432_v10, %v496_v34  ;;  %v433_v46 = vadd.f32 %v6226_v18, %v394_v37  ;;  %v4908_v52 = vunpack.c.l.bf16 %v5068_v45  ;;  %v4909_v54 = vunpack.c.h.bf16 %v5068_v45  ;;  %v2511_v12 = vld [vmem:[#allocation2 + $0x92] sm:$0xff]  ;;  %v6066_v37 = vld [vmem:[%s7101_s2 + $0x1a0] sm:$0xff]  }
  0x45   : > { %5377 = vmatprep.subr.bf16.mxu1 %v6063_v35  ;;  %5570 = vmatpush3.bf16.msra.mxu0 %v6405_v2  ;;  %v494_v2 = vmul.f32 0.01, %v430_v58  ;;  %v6479_v21 = vsel %vm461_vm8, %v429_v51, %v493_v3  ;;  %v675_v38 = vld [vmem:[#allocation2 + $0x110] sm:$0xff]  ;;  %615 = vst [vmem:[#allocation2 + $0x159] sm:$0xff] %v6497_v39  ;;  %v434_v51 = vadd.f32 %v6226_v18, %v395_v41 }
  0x46   : > { %5603 = vmatprep.subr.bf16.mxu0 %v6058_v42  ;;  %612 = vst [vmem:[#allocation2 + $0x139] sm:$0xff] %v6479_v21  ;;  %vm465_vm12 = vcmp.gt.f32.partialorder %v433_v46, 0.0  ;;  %v497_v61 = vmul.f32 0.01, %v433_v46  ;;  %v1094_v3 = vpack.c.bf16 %v6396_v59, %v6385_v47  ;;  %v1095_v10 = vpack.c.bf16 %v6418_v16, %v6415_v11  ;;  %v1392_v47 = vld [vmem:[#allocation2 + $0xa] sm:$0xff] }
  0x47   : > { %v6482_v29 = vsel %vm462_vm9, %v430_v58, %v494_v2  ;;  %v6509_v58 = vpack.c.bf16 %v675_v38, %v674_v26  ;;  %vm466_vm13 = vcmp.gt.f32.partialorder %v434_v51, 0.0  ;;  %v498_v5 = vmul.f32 0.01, %v434_v51  ;;  %v6086_v59 = vld [vmem:[%s7101_s2 + $0x1f0] sm:$0xff]   ;;  %v6083_v16 = vld [vmem:[%s7101_s2 + $0xc8] sm:$0xff]  }
  0x48   : > { %5378 = vmatpush3.bf16.msra.mxu1 %v6063_v35  ;;  %5572 = vmatmul.mubr.bf16.vlgmr.msra.gmra.mrb[0].mxu0 %v6430_v30  ;;  %613 = vst [vmem:[#allocation2 + $0x141] sm:$0xff] %v6482_v29  ;;  %v6492_v35 = vsel %vm463_vm10, %v431_v4, %v495_v22  ;;  %v396_v2 = vmul.f32 %v4908_v52, %v6221_v15  ;;  %v2513_v22 = vld [vmem:[#allocation2 + $0xaa] sm:$0xff] }
  0x49   : > { %5411 = vmatprep.subr.bf16.mxu1 %v6459_v55  ;;  %5604 = vmatpush3.bf16.msra.mxu0 %v6058_v42  ;;  %614 = vst [vmem:[#allocation2 + $0x151] sm:$0xff] %v6492_v35  ;;  %v6502_v42 = vpack.c.bf16 %v2508_v7, %v2507_v6  ;;  %v529_v6 = vsel %vm465_vm12, %v433_v46, %v497_v61  ;;  %v6064_v7 = vld [vmem:[%s7101_s2 + $0x198] sm:$0xff]  }
  0x4a   : > { %5575 = vmatprep.mubr.bf16.mxu0 %v6449_v43  ;;  %5605 = vmatprep.subr.bf16.mxu0 %v6060_v9  ;;  %v530_v26 = vsel %vm466_vm13, %v434_v51, %v498_v5  ;;  %616 = vst [vmem:[#allocation2 + $0x169] sm:$0xff] %v529_v6  ;;  %v1097_v34 = vpack.c.bf16 %v6468_v62, %v6463_v57  ;;  %v3242_v62 = vld [vmem:[#allocation2 + $0x31] sm:$0xff] }
  0x4b   : > { %5348 = vmatmul.mubr.bf16.gmra.mrb[16].mxu1 %v6461_v56  ;;  %v676_v49 = vld [vmem:[#allocation2 + $0x120] sm:$0xff]  ;;  %v677_v60 = vld [vmem:[#allocation2 + $0x128] sm:$0xff]  ;;  %617 = vst [vmem:[#allocation2 + $0x171] sm:$0xff] %v530_v26  ;;  %v435_v38 = vadd.f32 %v6226_v18, %v396_v2  ;;  %v1099_v51 = vpack.c.bf16 %v6497_v39, %v6492_v35  ;;  %v6539_v52 = vpack.c.bf16 %v530_v26, %v529_v6 }
  0x4c   : > { %5351 = vmatprep.mubr.bf16.mxu1 %v6477_v13  ;;  %v6513_v4 = vpack.c.bf16 %v677_v60, %v676_v49  ;;  %v6541_v61 = vpack.c.bf16 %v2512_v17, %v2511_v12  ;;  %v6068_v6 = vld [vmem:[%s7101_s2 + $0x1a8] sm:$0xff]  }
  0x4d   : > { %5606 = vmatpush3.bf16.msra.mxu0 %v6060_v9  ;;  %v397_v9 = vmul.f32 %v4909_v54, %v6221_v15  ;;  %v2514_v15 = vld [vmem:[#allocation2 + $0xb2] sm:$0xff]  ;;  %vm467_vm14 = vcmp.gt.f32.partialorder %v435_v38, 0.0  ;;  %v499_v60 = vmul.f32 0.01, %v435_v38  ;;  %v2515_v12 = vld [vmem:[#allocation2 + $0xc2] sm:$0xff]  ;;  %v2516_v17 = vld [vmem:[#allocation2 + $0xca] sm:$0xff] }
  0x4e   : > { %5607 = vmatprep.subr.bf16.mxu0 %v6062_v33  ;;  %v678_v41 = vld [vmem:[#allocation2 + $0x138] sm:$0xff]  ;;  %v6545_v36 = vpack.c.bf16 %v2514_v15, %v2513_v22  ;;  %v1022_v26 = vld [vmem:[#allocation2 + $0x9] sm:$0xff] }
  0x4f   : > { %v679_v45 = vld [vmem:[#allocation2 + $0x140] sm:$0xff]  ;;  %v436_v49 = vadd.f32 %v6226_v18, %v397_v9 }
  0x50   : > { %5576 = vmatmul.mubr.bf16.gmra.mrb[4].mxu0 %v6502_v42  ;;  %v680_v46 = vld [vmem:[#allocation2 + $0x150] sm:$0xff]  ;;  %v681_v54 = vld [vmem:[#allocation2 + $0x158] sm:$0xff]  ;;  %v6543_v2 = vpack.c.bf16 %v679_v45, %v678_v41  ;;  %v2518_v15 = vld [vmem:[#allocation2 + $0xe2] sm:$0xff] }
  0x51   : > { %5579 = vmatprep.mubr.bf16.mxu0 %v6506_v50  ;;  %5608 = vmatpush3.bf16.msra.mxu0 %v6062_v33  ;;  %vm468_vm15 = vcmp.gt.f32.partialorder %v436_v49, 0.0  ;;  %v500_v5 = vmul.f32 0.01, %v436_v49  ;;  %v6547_v33 = vsel %vm467_vm14, %v435_v38, %v499_v60  ;;  %v6549_v18 = vpack.c.bf16 %v681_v54, %v680_v46  ;;  %v2517_v22 = vld [vmem:[#allocation2 + $0xda] sm:$0xff]  ;;  %v682_v38 = vld [vmem:[#allocation2 + $0x168] sm:$0xff]  ;;  %v6070_v45 = vld [vmem:[%s7101_s2 + $0x1b0] sm:$0xff]  }
  0x52   : > { %5609 = vmatprep.subr.bf16.mxu0 %v6064_v7  ;;  %618 = vst [vmem:[#allocation2 + $0x181] sm:$0xff] %v6547_v33  ;;  %v683_v41 = vld [vmem:[#allocation2 + $0x170] sm:$0xff]  ;;  %v6565_v46 = vpack.c.bf16 %v2516_v17, %v2515_v12  ;;  %v6569_v54 = vpack.c.bf16 %v2518_v15, %v2517_v22  ;;  %v2520_v12 = vld [vmem:[#allocation2 + $0xfa] sm:$0xff]  ;;  %v2523_v15 = vld [vmem:[#allocation2 + $0x122] sm:$0xff] }
  0x53   : > { %5352 = vmatmul.mubr.bf16.gmra.mrb[20].mxu1 %v6509_v58  ;;  %v6551_v9 = vsel %vm468_vm15, %v436_v49, %v500_v5  ;;  %v6567_v49 = vpack.c.bf16 %v683_v41, %v682_v38  ;;  %v6072_v5 = vld [vmem:[%s7101_s2 + $0x1b8] sm:$0xff]   ;;  %v2521_v17 = vld [vmem:[#allocation2 + $0x10a] sm:$0xff] }
  0x54   : > { %5355 = vmatprep.mubr.bf16.mxu1 %v6513_v4  ;;  %619 = vst [vmem:[#allocation2 + $0x189] sm:$0xff] %v6551_v9  ;;  %v2522_v38 = vld [vmem:[#allocation2 + $0x112] sm:$0xff]  ;;  %v2524_v41 = vld [vmem:[#allocation2 + $0x12a] sm:$0xff] }
  0x55   : > { %5610 = vmatpush3.bf16.msra.mxu0 %v6064_v7  ;;  %v1021_v7 = vld [vmem:[#allocation2 + $0x1] sm:$0xff] }
  0x56   : > { %5611 = vmatprep.subr.bf16.mxu0 %v6066_v37  ;;  %v1085_v60 = vpack.c.bf16 %v1022_v26, %v1021_v7  ;;  %v6584_v7 = vpack.c.bf16 %v2522_v38, %v2521_v17  ;;  %v6067_v26 = vld [vmem:[%s7101_s2 + $0x88] sm:$0xff]   ;;  %v2530_v38 = vld [vmem:[#allocation2 + $0x172] sm:$0xff] }
  0x57   : > { %v2529_v17 = vld [vmem:[#allocation2 + $0x16a] sm:$0xff] }
  0x58   : > { %5580 = vmatmul.mubr.bf16.gmra.mrb[8].mxu0 %v6541_v61 }
  0x59   : > { %5583 = vmatprep.mubr.bf16.mxu0 %v6545_v36  ;;  %5612 = vmatpush3.bf16.msra.mxu0 %v6066_v37  ;;  %v2519_v37 = vld [vmem:[#allocation2 + $0xf2] sm:$0xff] }
  0x5a   : > { %5613 = vmatprep.subr.bf16.mxu0 %v6068_v6  ;;  %v6582_v22 = vpack.c.bf16 %v2520_v12, %v2519_v37  ;;  %v6598_v37 = vpack.c.bf16 %v2524_v41, %v2523_v15  ;;  %v6614_v41 = vpack.c.bf16 %v2530_v38, %v2529_v17  ;;  %v6076_v38 = vld [vmem:[%s7101_s2 + $0x1c8] sm:$0xff]  }
  0x5b   : > { %5356 = vmatmul.mubr.bf16.gmra.mrb[24].mxu1 %v6543_v2 }
  0x5c   : > { %5359 = vmatprep.mubr.bf16.mxu1 %v6549_v18 }
  0x5d   : > { %5614 = vmatpush3.bf16.msra.mxu0 %v6068_v6  ;;  %v6580_v6 = vld [vmem:[%s7101_s2 + $0x1c0] sm:$0xff]  }
  0x5e   : > { %5615 = vmatprep.subr.bf16.mxu0 %v6070_v45 }
  0x60   : > { %5584 = vmatmul.mubr.bf16.gmra.mrb[12].mxu0 %v6565_v46 }
  0x61   : > { %5587 = vmatprep.mubr.bf16.mxu0 %v6569_v54  ;;  %5616 = vmatpush3.bf16.msra.mxu0 %v6070_v45  ;;  %v2525_v45 = vld [vmem:[#allocation2 + $0x13a] sm:$0xff] }
  0x62   : > { %5617 = vmatprep.subr.bf16.mxu0 %v6072_v5 }
  0x63   : > { %5360 = vmatmul.mubr.bf16.gmra.mrb[28].mxu1 %v6567_v49 }
  0x64   : > { %5379 = vmatprep.mubr.bf16.mxu1 %v1085_v60  ;;  %v2526_v60 = vld [vmem:[#allocation2 + $0x142] sm:$0xff] }
  0x65   : > { %5618 = vmatpush3.bf16.msra.mxu0 %v6072_v5  ;;  %v6069_v5 = vld [vmem:[%s7101_s2 + $0x90] sm:$0xff]   ;;  %v6600_v12 = vpack.c.bf16 %v2526_v60, %v2525_v45 }
  0x66   : > { %5651 = vmatprep.subr.bf16.mxu0 %v6580_v6  ;;  %v2532_v45 = vld [vmem:[#allocation2 + $0x18a] sm:$0xff] }
  0x67   : > { %v2872_v60 = vld [vmem:[#allocation2 + $0x30] sm:$0xff] }
  0x68   : > { %5588 = vmatmul.mubr.bf16.gmra.mrb[16].mxu0 %v6582_v22 }
  0x69   : > { %5591 = vmatprep.mubr.bf16.mxu0 %v6584_v7 }
  0x6b   : > { %5380 = vmatmul.mubr.bf16.vlgmr.msra.gmra.mrb[0].mxu1 %v6255_v48  ;;  %v6071_v48 = vld [vmem:[%s7101_s2 + $0x98] sm:$0xff]  }
  0x6c   : > { %5412 = vmatpush3.bf16.msra.mxu1 %v6459_v55  ;;  %5383 = vmatprep.mubr.bf16.mxu1 %v6270_v63  ;;  %v2527_v55 = vld [vmem:[#allocation2 + $0x152] sm:$0xff]  ;;  %v2528_v63 = vld [vmem:[#allocation2 + $0x15a] sm:$0xff] }
  0x6d   : > { %5413 = vmatprep.subr.bf16.mxu1 %v6067_v26  ;;  %v6612_v15 = vpack.c.bf16 %v2528_v63, %v2527_v55  ;;  %v6077_v55 = vld [vmem:[%s7101_s2 + $0xb0] sm:$0xff]  }
  0x70   : > { %5414 = vmatpush3.bf16.msra.mxu1 %v6067_v26  ;;  %5592 = vmatmul.mubr.bf16.gmra.mrb[20].mxu0 %v6598_v37  ;;  %v6073_v26 = vld [vmem:[%s7101_s2 + $0xa0] sm:$0xff]  }
  0x71   : > { %5415 = vmatprep.subr.bf16.mxu1 %v6069_v5  ;;  %5595 = vmatprep.mubr.bf16.mxu0 %v6600_v12 }
  0x73   : > { %5384 = vmatmul.mubr.bf16.gmra.mrb[4].mxu1 %v6287_v14  ;;  %v6075_v14 = vld [vmem:[%s7101_s2 + $0xa8] sm:$0xff]  }
  0x74   : > { %5387 = vmatprep.mubr.bf16.mxu1 %v6295_v25  ;;  %5416 = vmatpush3.bf16.msra.mxu1 %v6069_v5  ;;  %v2531_v25 = vld [vmem:[#allocation2 + $0x182] sm:$0xff]  ;;  %v2873_v5 = vld [vmem:[#allocation2 + $0x38] sm:$0xff] }
  0x75   : > { %5417 = vmatprep.subr.bf16.mxu1 %v6071_v48  ;;  %v2580_v63 = vpack.c.bf16 %v2532_v45, %v2531_v25  ;;  %v6628_v17 = vpack.c.bf16 %v2873_v5, %v2872_v60  ;;  %v3255_v25 = vld [vmem:[#allocation2 + $0xc9] sm:$0xff]  ;;  %v6097_v45 = vld [vmem:[%s7101_s2 + $0x220] sm:$0xff]  }
  0x78   : > { %5418 = vmatpush3.bf16.msra.mxu1 %v6071_v48  ;;  %5596 = vmatmul.mubr.bf16.gmra.mrb[24].mxu0 %v6612_v15  ;;  %v3320_v48 = vpack.c.bf16 %v6551_v9, %v6547_v33  ;;  %v6108_v9 = vld [vmem:[%s7101_s2 + $0x130] sm:$0xff]  }
  0x79   : > { %5419 = vmatprep.subr.bf16.mxu1 %v6073_v26  ;;  %5599 = vmatprep.mubr.bf16.mxu0 %v6614_v41 }
  0x7b   : > { %5388 = vmatmul.mubr.bf16.gmra.mrb[8].mxu1 %v6313_v44  ;;  %v6079_v44 = vld [vmem:[%s7101_s2 + $0xb8] sm:$0xff]  }
  0x7c   : > { %5391 = vmatprep.mubr.bf16.mxu1 %v6350_v20  ;;  %5420 = vmatpush3.bf16.msra.mxu1 %v6073_v26  ;;  %v6081_v20 = vld [vmem:[%s7101_s2 + $0xc0] sm:$0xff]   ;;  %v3253_v26 = vld [vmem:[#allocation2 + $0xb1] sm:$0xff] }
  0x7d   : > { %5421 = vmatprep.subr.bf16.mxu1 %v6075_v14 }
  0x80   : > { %5422 = vmatpush3.bf16.msra.mxu1 %v6075_v14  ;;  %5600 = vmatmul.mubr.bf16.gmra.mrb[28].mxu0 %v2580_v63  ;;  %v3254_v14 = vld [vmem:[#allocation2 + $0xc1] sm:$0xff]  ;;  %v3258_v63 = vld [vmem:[#allocation2 + $0xf1] sm:$0xff] }
  0x81   : > { %5423 = vmatprep.subr.bf16.mxu1 %v6077_v55  ;;  %5619 = vmatprep.mubr.bf16.mxu0 %v6628_v17  ;;  %v3312_v5 = vpack.c.bf16 %v3255_v25, %v3254_v14  ;;  %v3614_v14 = vld [vmem:[#allocation2 + $0x4a] sm:$0xff]  ;;  %v3615_v25 = vld [vmem:[#allocation2 + $0x52] sm:$0xff] }
  0x83   : > { %5392 = vmatmul.mubr.bf16.gmra.mrb[12].mxu1 %v6357_v24  ;;  %v6078_v24 = vld [vmem:[%s7101_s2 + $0x1d0] sm:$0xff]  }
  0x84   : > { %5395 = vmatprep.mubr.bf16.mxu1 %v6364_v31  ;;  %5424 = vmatpush3.bf16.msra.mxu1 %v6077_v55  ;;  %v7107_v31 = vpack.c.bf16 %v6482_v29, %v6479_v21  ;;  %v6093_v21 = vld [vmem:[%s7101_s2 + $0xf0] sm:$0xff]   ;;  %v6101_v29 = vld [vmem:[#allocation2] sm:$0xff] }
  0x85   : > { %5425 = vmatprep.subr.bf16.mxu1 %v6079_v44  ;;  %v2951_v35 = vpack.c.bf16 %v6101_v29, %v6101_v29  ;;  %v3257_v55 = vld [vmem:[#allocation2 + $0xe1] sm:$0xff] }
  0x88   : > { %5426 = vmatpush3.bf16.msra.mxu1 %v6079_v44  ;;  %5620 = vmatmul.mubr.bf16.vlgmr.msra.gmra.mrb[0].mxu0 %v6320_v53  ;;  %v6080_v53 = vld [vmem:[%s7101_s2 + $0x1d8] sm:$0xff]  }
  0x89   : > { %5459 = vmatprep.subr.bf16.mxu1 %v6081_v20  ;;  %5652 = vmatpush3.bf16.msra.mxu0 %v6580_v6  ;;  %v3259_v44 = vld [vmem:[#allocation2 + $0xf9] sm:$0xff] }
  0x8a   : > { %5623 = vmatprep.mubr.bf16.mxu0 %v6333_v1  ;;  %5653 = vmatprep.subr.bf16.mxu0 %v6076_v38  ;;  %v6082_v1 = vld [vmem:[%s7101_s2 + $0x1e0] sm:$0xff]  }
  0x8b   : > { %5396 = vmatmul.mubr.bf16.gmra.mrb[16].mxu1 %v1094_v3  ;;  %v3246_v3 = vld [vmem:[#allocation2 + $0x61] sm:$0xff] }
  0x8c   : > { %5399 = vmatprep.mubr.bf16.mxu1 %v1095_v10 }
  0x8d   : > { %5654 = vmatpush3.bf16.msra.mxu0 %v6076_v38  ;;  %v1762_v38 = vld [vmem:[#allocation2 + $0x20] sm:$0xff] }
  0x8e   : > { %5655 = vmatprep.subr.bf16.mxu0 %v6078_v24 }
  0x90   : > { %5624 = vmatmul.mubr.bf16.gmra.mrb[4].mxu0 %v6348_v19  ;;  %v6084_v19 = vld [vmem:[%s7101_s2 + $0x1e8] sm:$0xff]  }
  0x91   : > { %5627 = vmatprep.mubr.bf16.mxu0 %v6372_v40  ;;  %5656 = vmatpush3.bf16.msra.mxu0 %v6078_v24  ;;  %v1391_v40 = vld [vmem:[#allocation2 + $0x2] sm:$0xff]  ;;  %v6099_v24 = vld [vmem:[%s7101_s2 + $0x230] sm:$0xff]  }
  0x92   : > { %5657 = vmatprep.subr.bf16.mxu0 %v6080_v53  ;;  %v1455_v11 = vpack.c.bf16 %v1392_v47, %v1391_v40  ;;  %v3262_v40 = vld [vmem:[#allocation2 + $0x121] sm:$0xff]  ;;  %v3263_v47 = vld [vmem:[#allocation2 + $0x129] sm:$0xff] }
  0x93   : > { %5400 = vmatmul.mubr.bf16.gmra.mrb[20].mxu1 %v1096_v28 }
  0x94   : > { %5403 = vmatprep.mubr.bf16.mxu1 %v1097_v34  ;;  %v6092_v34 = vld [vmem:[%s7101_s2 + $0x208] sm:$0xff]  }
  0x95   : > { %5658 = vmatpush3.bf16.msra.mxu0 %v6080_v53 }
  0x96   : > { %5659 = vmatprep.subr.bf16.mxu0 %v6082_v1 }
  0x98   : > { %5628 = vmatmul.mubr.bf16.gmra.mrb[8].mxu0 %v6400_v0  ;;  %v6088_v0 = vld [vmem:[%s7101_s2 + $0x1f8] sm:$0xff]  }
  0x99   : > { %5631 = vmatprep.mubr.bf16.mxu0 %v6412_v8  ;;  %5660 = vmatpush3.bf16.msra.mxu0 %v6082_v1  ;;  %v6090_v8 = vld [vmem:[%s7101_s2 + $0x200] sm:$0xff]   ;;  %v6760_v1 = vpack.c.bf16 %v3259_v44, %v3258_v63  ;;  %v3677_v63 = vpack.c.bf16 %v3615_v25, %v3614_v14 }
  0x9a   : > { %5661 = vmatprep.subr.bf16.mxu0 %v6084_v19 }
  0x9b   : > { %5404 = vmatmul.mubr.bf16.gmra.mrb[24].mxu1 %v7107_v31  ;;  %v3261_v31 = vld [vmem:[#allocation2 + $0x111] sm:$0xff] }
  0x9c   : > { %5407 = vmatprep.mubr.bf16.mxu1 %v1099_v51  ;;  %v3248_v51 = vld [vmem:[#allocation2 + $0x79] sm:$0xff] }
  0x9d   : > { %5662 = vmatpush3.bf16.msra.mxu0 %v6084_v19  ;;  %v3260_v19 = vld [vmem:[#allocation2 + $0x109] sm:$0xff] }
  0x9e   : > { %5663 = vmatprep.subr.bf16.mxu0 %v6086_v59 }
  0xa0   : > { %5632 = vmatmul.mubr.bf16.gmra.mrb[12].mxu0 %v6461_v56  ;;  %v6089_v56 = vld [vmem:[%s7101_s2 + $0xe0] sm:$0xff]  }
  0xa1   : > { %5635 = vmatprep.mubr.bf16.mxu0 %v6477_v13  ;;  %5664 = vmatpush3.bf16.msra.mxu0 %v6086_v59  ;;  %v3243_v13 = vld [vmem:[#allocation2 + $0x39] sm:$0xff]  ;;  %v1765_v59 = vld [vmem:[#allocation2 + $0x48] sm:$0xff] }
  0xa2   : > { %5665 = vmatprep.subr.bf16.mxu0 %v6088_v0  ;;  %v3306_v39 = vpack.c.bf16 %v3243_v13, %v3242_v62  ;;  %v1769_v62 = vld [vmem:[#allocation2 + $0x78] sm:$0xff]  ;;  %v1770_v13 = vld [vmem:[#allocation2 + $0x80] sm:$0xff] }
  0xa3   : > { %5408 = vmatmul.mubr.bf16.gmra.mrb[28].mxu1 %v6539_v52 }
  0xa4   : > { %5427 = vmatprep.mubr.bf16.mxu1 %v1455_v11  ;;  %v1766_v11 = vld [vmem:[#allocation2 + $0x50] sm:$0xff] }
  0xa5   : > { %5666 = vmatpush3.bf16.msra.mxu0 %v6088_v0  ;;  %v6768_v0 = vpack.c.bf16 %v3261_v31, %v3260_v19  ;;  %v1784_v19 = vld [vmem:[#allocation2 + $0x128] sm:$0xff]  ;;  %v3620_v31 = vld [vmem:[#allocation2 + $0x92] sm:$0xff] }
  0xa6   : > { %5699 = vmatprep.subr.bf16.mxu0 %v6090_v8 }
  0xa8   : > { %5636 = vmatmul.mubr.bf16.gmra.mrb[16].mxu0 %v6509_v58  ;;  %v3245_v58 = vld [vmem:[#allocation2 + $0x51] sm:$0xff] }
  0xa9   : > { %5639 = vmatprep.mubr.bf16.mxu0 %v6513_v4  ;;  %v3247_v4 = vld [vmem:[#allocation2 + $0x69] sm:$0xff] }
  0xaa   : > { %v3308_v28 = vpack.c.bf16 %v3247_v4, %v3246_v3  ;;  %v1774_v3 = vld [vmem:[#allocation2 + $0xb0] sm:$0xff]  ;;  %v6105_v4 = vld [vmem:[%s7101_s2 + $0x118] sm:$0xff]  }
  0xab   : > { %5428 = vmatmul.mubr.bf16.vlgmr.msra.gmra.mrb[0].mxu1 %v6423_v23  ;;  %v2900_v23 = vld [vmem:[#allocation2 + $0x180] sm:$0xff] }
  0xac   : > { %5460 = vmatpush3.bf16.msra.mxu1 %v6081_v20  ;;  %5431 = vmatprep.mubr.bf16.mxu1 %v6430_v30  ;;  %v2901_v30 = vld [vmem:[#allocation2 + $0x188] sm:$0xff]  ;;  %v1761_v20 = vld [vmem:[#allocation2 + $0x18] sm:$0xff] }
  0xad   : > { %5461 = vmatprep.subr.bf16.mxu1 %v6083_v16  ;;  %v6711_v57 = vpack.c.bf16 %v2901_v30, %v2900_v23  ;;  %v1768_v23 = vld [vmem:[#allocation2 + $0x68] sm:$0xff]  ;;  %v3266_v30 = vld [vmem:[#allocation2 + $0x151] sm:$0xff] }
  0xb0   : > { %5462 = vmatpush3.bf16.msra.mxu1 %v6083_v16  ;;  %5640 = vmatmul.mubr.bf16.gmra.mrb[20].mxu0 %v6543_v2  ;;  %v3250_v2 = vld [vmem:[#allocation2 + $0x91] sm:$0xff]  ;;  %v1827_v16 = vpack.c.bf16 %v1766_v11, %v1765_v59  ;;  %v1786_v59 = vld [vmem:[#allocation2 + $0x140] sm:$0xff] }
  0xb1   : > { %5463 = vmatprep.subr.bf16.mxu1 %v6085_v27  ;;  %5643 = vmatprep.mubr.bf16.mxu0 %v6549_v18  ;;  %v3251_v18 = vld [vmem:[#allocation2 + $0x99] sm:$0xff] }
  0xb2   : > { %v3310_v6 = vpack.c.bf16 %v3251_v18, %v3250_v2  ;;  %v1776_v2 = vld [vmem:[#allocation2 + $0xc8] sm:$0xff]  ;;  %v3612_v18 = vld [vmem:[#allocation2 + $0x32] sm:$0xff] }
  0xb3   : > { %5432 = vmatmul.mubr.bf16.gmra.mrb[4].mxu1 %v6449_v43  ;;  %v6091_v43 = vld [vmem:[%s7101_s2 + $0xe8] sm:$0xff]  }
  0xb4   : > { %5435 = vmatprep.mubr.bf16.mxu1 %v6502_v42  ;;  %5464 = vmatpush3.bf16.msra.mxu1 %v6085_v27  ;;  %v6095_v42 = vld [vmem:[%s7101_s2 + $0xf8] sm:$0xff]  }
  0xb5   : > { %5465 = vmatprep.subr.bf16.mxu1 %v6087_v32  ;;  %v3264_v27 = vld [vmem:[#allocation2 + $0x139] sm:$0xff] }
  0xb8   : > { %5466 = vmatpush3.bf16.msra.mxu1 %v6087_v32  ;;  %5644 = vmatmul.mubr.bf16.gmra.mrb[24].mxu0 %v6567_v49  ;;  %v3265_v32 = vld [vmem:[#allocation2 + $0x141] sm:$0xff] }
  0xb9   : > { %5467 = vmatprep.subr.bf16.mxu1 %v6089_v56  ;;  %5647 = vmatprep.mubr.bf16.mxu0 %v6711_v57 }
  0xbb   : > { %5436 = vmatmul.mubr.bf16.gmra.mrb[8].mxu1 %v6506_v50  ;;  %v3244_v50 = vld [vmem:[#allocation2 + $0x49] sm:$0xff] }
  0xbc   : > { %5439 = vmatprep.mubr.bf16.mxu1 %v6541_v61  ;;  %5468 = vmatpush3.bf16.msra.mxu1 %v6089_v56  ;;  %v3307_v10 = vpack.c.bf16 %v3245_v58, %v3244_v50  ;;  %v3249_v61 = vld [vmem:[#allocation2 + $0x81] sm:$0xff]  ;;  %v3267_v56 = vld [vmem:[#allocation2 + $0x159] sm:$0xff] }
  0xbd   : > { %5469 = vmatprep.subr.bf16.mxu1 %v6091_v43  ;;  %v3309_v49 = vpack.c.bf16 %v3249_v61, %v3248_v51  ;;  %v6781_v29 = vpack.c.bf16 %v3267_v56, %v3266_v30  ;;  %v1772_v50 = vld [vmem:[#allocation2 + $0x98] sm:$0xff]  ;;  %v1773_v58 = vld [vmem:[#allocation2 + $0xa8] sm:$0xff] }
  0xbe   : > { %v3272_v51 = vld [vmem:[#allocation2 + $0x199] sm:$0xff]  ;;  %v3273_v61 = vld [vmem:[#allocation2 + $0x1a1] sm:$0xff] }
  0xbf   : > { %v3623_v30 = vld [vmem:[#allocation2 + $0xb2] sm:$0xff] }
  0xc0   : > { %5470 = vmatpush3.bf16.msra.mxu1 %v6091_v43  ;;  %5648 = vmatmul.mubr.bf16.gmra.mrb[28].mxu0 %v2951_v35  ;;  %v6103_v43 = vld [vmem:[%s7101_s2 + $0x108] sm:$0xff]   ;;  %v1829_v35 = vpack.c.bf16 %v1770_v13, %v1769_v62  ;;  %v1788_v56 = vld [vmem:[#allocation2 + $0x158] sm:$0xff] }
  0xc1   : > { %5471 = vmatprep.subr.bf16.mxu1 %v6093_v21  ;;  %5667 = vmatprep.mubr.bf16.mxu0 %v3306_v39  ;;  %v6104_v39 = vld [vmem:[%s7101_s2 + $0x110] sm:$0xff]   ;;  %v1789_v13 = vld [vmem:[#allocation2 + $0x168] sm:$0xff] }
  0xc2   : > { %v3625_v62 = vld [vmem:[#allocation2 + $0xca] sm:$0xff] }
  0xc3   : > { %5440 = vmatmul.mubr.bf16.gmra.mrb[12].mxu1 %v6545_v36  ;;  %v6734_v36 = vld [vmem:[%s7101_s2 + $0x100] sm:$0xff]  }
  0xc4   : > { %5443 = vmatprep.mubr.bf16.mxu1 %v6565_v46  ;;  %5472 = vmatpush3.bf16.msra.mxu1 %v6093_v21  ;;  %v6094_v46 = vld [vmem:[%s7101_s2 + $0x210] sm:$0xff]   ;;  %v6779_v21 = vpack.c.bf16 %v3265_v32, %v3264_v27 }
  0xc5   : > { %5473 = vmatprep.subr.bf16.mxu1 %v6095_v42  ;;  %v1787_v32 = vld [vmem:[#allocation2 + $0x150] sm:$0xff] }
  0xc8   : > { %5474 = vmatpush3.bf16.msra.mxu1 %v6095_v42  ;;  %5668 = vmatmul.mubr.bf16.vlgmr.msra.gmra.mrb[0].mxu0 %v3307_v10  ;;  %v1771_v42 = vld [vmem:[#allocation2 + $0x90] sm:$0xff] }
  0xc9   : > { %5747 = vmatprep.subr.bf16.mxu1 %v6734_v36  ;;  %5700 = vmatpush3.bf16.msra.mxu0 %v6090_v8  ;;  %v6770_v8 = vpack.c.bf16 %v3263_v47, %v3262_v40  ;;  %v1830_v10 = vpack.c.bf16 %v1772_v50, %v1771_v42  ;;  %v3621_v40 = vld [vmem:[#allocation2 + $0x9a] sm:$0xff] }
  0xca   : > { %5671 = vmatprep.mubr.bf16.mxu0 %v3308_v28  ;;  %5701 = vmatprep.subr.bf16.mxu0 %v6092_v34  ;;  %v1831_v28 = vpack.c.bf16 %v1774_v3, %v1773_v58  ;;  %v1785_v47 = vld [vmem:[#allocation2 + $0x138] sm:$0xff]  ;;  %v3627_v3 = vld [vmem:[#allocation2 + $0xe2] sm:$0xff] }
  0xcb   : > { %5444 = vmatmul.mubr.bf16.gmra.mrb[16].mxu1 %v6569_v54  ;;  %v6096_v54 = vld [vmem:[%s7101_s2 + $0x218] sm:$0xff]   ;;  %v1837_v27 = vpack.c.bf16 %v1786_v59, %v1785_v47 }
  0xcc   : > { %5447 = vmatprep.mubr.bf16.mxu1 %v6582_v22  ;;  %v3252_v22 = vld [vmem:[#allocation2 + $0xa9] sm:$0xff]  ;;  %v3626_v58 = vld [vmem:[#allocation2 + $0xda] sm:$0xff] }
  0xcd   : > { %5702 = vmatpush3.bf16.msra.mxu0 %v6092_v34  ;;  %v3311_v60 = vpack.c.bf16 %v3253_v26, %v3252_v22  ;;  %v6106_v34 = vld [vmem:[%s7101_s2 + $0x120] sm:$0xff]  }
  0xce   : > { %5703 = vmatprep.subr.bf16.mxu0 %v6094_v46 }
  0xd0   : > { %5672 = vmatmul.mubr.bf16.gmra.mrb[4].mxu0 %v3309_v49  ;;  %v1777_v49 = vld [vmem:[#allocation2 + $0xd8] sm:$0xff] }
  0xd1   : > { %5675 = vmatprep.mubr.bf16.mxu0 %v3310_v6  ;;  %5704 = vmatpush3.bf16.msra.mxu0 %v6094_v46  ;;  %v3613_v46 = vld [vmem:[#allocation2 + $0x3a] sm:$0xff] }
  0xd2   : > { %5705 = vmatprep.subr.bf16.mxu0 %v6096_v54  ;;  %v1778_v6 = vld [vmem:[#allocation2 + $0xe0] sm:$0xff]  ;;  %v3676_v26 = vpack.c.bf16 %v3613_v46, %v3612_v18 }
  0xd3   : > { %5448 = vmatmul.mubr.bf16.gmra.mrb[20].mxu1 %v6584_v7  ;;  %v6098_v7 = vld [vmem:[%s7101_s2 + $0x228] sm:$0xff]   ;;  %v1833_v33 = vpack.c.bf16 %v1778_v6, %v1777_v49  ;;  %v3634_v49 = vld [vmem:[#allocation2 + $0x13a] sm:$0xff] }
  0xd4   : > { %5451 = vmatprep.mubr.bf16.mxu1 %v6598_v37  ;;  %v3256_v37 = vld [vmem:[#allocation2 + $0xd9] sm:$0xff]  ;;  %v3635_v6 = vld [vmem:[#allocation2 + $0x142] sm:$0xff] }
  0xd5   : > { %5706 = vmatpush3.bf16.msra.mxu0 %v6096_v54  ;;  %v6758_v53 = vpack.c.bf16 %v3257_v55, %v3256_v37  ;;  %v6107_v54 = vld [vmem:[%s7101_s2 + $0x128] sm:$0xff]   ;;  %v1782_v37 = vld [vmem:[#allocation2 + $0x110] sm:$0xff]  ;;  %v6109_v55 = vld [vmem:[%s7101_s2 + $0x138] sm:$0xff]  }
  0xd6   : > { %5707 = vmatprep.subr.bf16.mxu0 %v6097_v45 }
  0xd8   : > { %5676 = vmatmul.mubr.bf16.gmra.mrb[8].mxu0 %v3311_v60  ;;  %v3616_v60 = vld [vmem:[#allocation2 + $0x62] sm:$0xff] }
  0xd9   : > { %5679 = vmatprep.mubr.bf16.mxu0 %v3312_v5  ;;  %5708 = vmatpush3.bf16.msra.mxu0 %v6097_v45  ;;  %v1780_v45 = vld [vmem:[#allocation2 + $0xf8] sm:$0xff]  ;;  %v3617_v5 = vld [vmem:[#allocation2 + $0x6a] sm:$0xff] }
  0xda   : > { %5709 = vmatprep.subr.bf16.mxu0 %v6098_v7 }
  0xdb   : > { %5452 = vmatmul.mubr.bf16.gmra.mrb[24].mxu1 %v6600_v12  ;;  %v1825_v12 = vpack.c.bf16 %v1762_v38, %v1761_v20  ;;  %v3678_v20 = vpack.c.bf16 %v3617_v5, %v3616_v60  ;;  %v3643_v60 = vld [vmem:[#allocation2 + $0x1a2] sm:$0xff] }
  0xdc   : > { %5455 = vmatprep.mubr.bf16.mxu1 %v6612_v15  ;;  %v6100_v15 = vld [vmem:[%s7101_s2 + $0x238] sm:$0xff]   ;;  %v2162_v5 = vld [vmem:[#allocation2 + $0x189] sm:$0xff] }
  0xdd   : > { %5710 = vmatpush3.bf16.msra.mxu0 %v6098_v7  ;;  %v1781_v7 = vld [vmem:[#allocation2 + $0x108] sm:$0xff] }
  0xde   : > { %5711 = vmatprep.subr.bf16.mxu0 %v6099_v24  ;;  %v1835_v38 = vpack.c.bf16 %v1782_v37, %v1781_v7 }
  0xe0   : > { %5680 = vmatmul.mubr.bf16.gmra.mrb[12].mxu0 %v6758_v53 }
  0xe1   : > { %5683 = vmatprep.mubr.bf16.mxu0 %v6760_v1  ;;  %5712 = vmatpush3.bf16.msra.mxu0 %v6099_v24  ;;  %v1783_v24 = vld [vmem:[#allocation2 + $0x120] sm:$0xff] }
  0xe2   : > { %5713 = vmatprep.subr.bf16.mxu0 %v6100_v15 }
  0xe3   : > { %5456 = vmatmul.mubr.bf16.gmra.mrb[28].mxu1 %v6614_v41  ;;  %v1767_v41 = vld [vmem:[#allocation2 + $0x60] sm:$0xff] }
  0xe4   : > { %5475 = vmatprep.mubr.bf16.mxu1 %v1825_v12  ;;  %v3618_v12 = vld [vmem:[#allocation2 + $0x7a] sm:$0xff] }
  0xe5   : > { %5714 = vmatpush3.bf16.msra.mxu0 %v6100_v15  ;;  %v3619_v15 = vld [vmem:[#allocation2 + $0x82] sm:$0xff] }
  0xe6   : > { %v3679_v11 = vpack.c.bf16 %v3619_v15, %v3618_v12 }
  0xe8   : > { %5684 = vmatmul.mubr.bf16.gmra.mrb[16].mxu0 %v6768_v0 }
  0xe9   : > { %5687 = vmatprep.mubr.bf16.mxu0 %v6770_v8 }
  0xeb   : > { %5476 = vmatmul.mubr.bf16.vlgmr.msra.gmra.mrb[0].mxu1 %v6628_v17  ;;  %v1828_v17 = vpack.c.bf16 %v1768_v23, %v1767_v41  ;;  %v3680_v41 = vpack.c.bf16 %v3621_v40, %v3620_v31  ;;  %v3622_v23 = vld [vmem:[#allocation2 + $0xaa] sm:$0xff] }
  0xec   : > { %5755 = vmatpush3.bf16.msra.mxu1 %v6734_v36  ;;  %5479 = vmatprep.mubr.bf16.mxu1 %v1827_v16  ;;  %v1775_v36 = vld [vmem:[#allocation2 + $0xc0] sm:$0xff]  ;;  %v1836_v16 = vpack.c.bf16 %v1784_v19, %v1783_v24 }
  0xed   : > { %5748 = vmatprep.subr.bf16.mxu1 %v6103_v43  ;;  %v1832_v22 = vpack.c.bf16 %v1776_v2, %v1775_v36  ;;  %v3630_v36 = vld [vmem:[#allocation2 + $0x10a] sm:$0xff] }
  0xee   : > { %v3633_v2 = vld [vmem:[#allocation2 + $0x12a] sm:$0xff] }
  0xf0   : > { %5756 = vmatpush3.bf16.msra.mxu1 %v6103_v43  ;;  %5688 = vmatmul.mubr.bf16.gmra.mrb[20].mxu0 %v6779_v21  ;;  %v3624_v43 = vld [vmem:[#allocation2 + $0xc2] sm:$0xff] }
  0xf1   : > { %5749 = vmatprep.subr.bf16.mxu1 %v6104_v39  ;;  %5691 = vmatprep.mubr.bf16.mxu0 %v6781_v29  ;;  %v3682_v42 = vpack.c.bf16 %v3625_v62, %v3624_v43 }
  0xf3   : > { %5480 = vmatmul.mubr.bf16.gmra.mrb[4].mxu1 %v1828_v17  ;;  %v1790_v17 = vld [vmem:[#allocation2 + $0x170] sm:$0xff] }
  0xf4   : > { %5483 = vmatprep.mubr.bf16.mxu1 %v1829_v35  ;;  %5757 = vmatpush3.bf16.msra.mxu1 %v6104_v39  ;;  %v3681_v35 = vpack.c.bf16 %v3623_v30, %v3622_v23  ;;  %v1838_v39 = vpack.c.bf16 %v1788_v56, %v1787_v32  ;;  %v1839_v50 = vpack.c.bf16 %v1790_v17, %v1789_v13 }
  0xf5   : > { %5750 = vmatprep.subr.bf16.mxu1 %v6105_v4 }
  0xf8   : > { %5758 = vmatpush3.bf16.msra.mxu1 %v6105_v4  ;;  %5692 = vmatmul.mubr.bf16.gmra.mrb[24].mxu0 %v6539_v52  ;;  %v3321_v52 = vpack.c.bf16 %v3273_v61, %v3272_v51  ;;  %v3628_v4 = vld [vmem:[#allocation2 + $0xf2] sm:$0xff]  ;;  %v3632_v61 = vld [vmem:[#allocation2 + $0x122] sm:$0xff] }
  0xf9   : > { %5751 = vmatprep.subr.bf16.mxu1 %v6106_v34  ;;  %5695 = vmatprep.mubr.bf16.mxu0 %v3320_v48  ;;  %v1779_v48 = vld [vmem:[#allocation2 + $0xf0] sm:$0xff]  ;;  %v3686_v46 = vpack.c.bf16 %v3633_v2, %v3632_v61 }
  0xfa   : > { %v1834_v44 = vpack.c.bf16 %v1780_v45, %v1779_v48  ;;  %v3631_v51 = vld [vmem:[#allocation2 + $0x112] sm:$0xff] }
  0xfb   : > { %5484 = vmatmul.mubr.bf16.gmra.mrb[8].mxu1 %v1830_v10  ;;  %v3629_v10 = vld [vmem:[#allocation2 + $0xfa] sm:$0xff]  ;;  %v3685_v18 = vpack.c.bf16 %v3631_v51, %v3630_v36  ;;  %v2160_v48 = vld [vmem:[#allocation2 + $0x171] sm:$0xff] }
  0xfc   : > { %5487 = vmatprep.mubr.bf16.mxu1 %v1831_v28  ;;  %5759 = vmatpush3.bf16.msra.mxu1 %v6106_v34  ;;  %v3683_v28 = vpack.c.bf16 %v3627_v3, %v3626_v58  ;;  %v3684_v34 = vpack.c.bf16 %v3629_v10, %v3628_v4  ;;  %v5071_v3 = vld [vmem:[%s6828_s15 + $0x18] sm:$0xff]  }
  0xfd   : > { %5752 = vmatprep.subr.bf16.mxu1 %v6107_v54  ;;  %v4924_v61 = vunpack.c.l.bf16 %v5071_v3 }
 0x100   : > { %5760 = vmatpush3.bf16.msra.mxu1 %v6107_v54  ;;  %5696 = vmatmul.mubr.bf16.gmra.mrb[28].mxu0 %v3321_v52  ;;  %v3636_v54 = vld [vmem:[#allocation2 + $0x152] sm:$0xff]  ;;  %v3637_v52 = vld [vmem:[#allocation2 + $0x15a] sm:$0xff] }
 0x101   : > { %5753 = vmatprep.subr.bf16.mxu1 %v6108_v9  ;;  %5715 = vmatprep.mubr.bf16.mxu0 %v3676_v26  ;;  %v3639_v26 = vld [vmem:[#allocation2 + $0x172] sm:$0xff] }
 0x103   : > { %5488 = vmatmul.mubr.bf16.gmra.mrb[12].mxu1 %v1832_v22  ;;  %v3688_v22 = vpack.c.bf16 %v3637_v52, %v3636_v54 }
 0x104   : > { %5491 = vmatprep.mubr.bf16.mxu1 %v1833_v33  ;;  %5761 = vmatpush3.bf16.msra.mxu1 %v6108_v9  ;;  %v3640_v33 = vld [vmem:[#allocation2 + $0x182] sm:$0xff]  ;;  %v3641_v9 = vld [vmem:[#allocation2 + $0x18a] sm:$0xff] }
 0x105   : > { %5754 = vmatprep.subr.bf16.mxu1 %v6109_v55  ;;  %v3690_v25 = vpack.c.bf16 %v3641_v9, %v3640_v33 }
 0x108   : > { %5762 = vmatpush3.bf16.msra.mxu1 %v6109_v55  ;;  %5716 = vmatmul.mubr.bf16.vlgmr.msra.gmra.mrb[0].mxu0 %v3677_v63 }
 0x109   : > { %5719 = vmatprep.mubr.bf16.mxu0 %v3678_v20 }
 0x10b   : > { %5492 = vmatmul.mubr.bf16.gmra.mrb[16].mxu1 %v1834_v44 }
 0x10c   : > { %5495 = vmatprep.mubr.bf16.mxu1 %v1835_v38 }
 0x110   : > { %5720 = vmatmul.mubr.bf16.gmra.mrb[4].mxu0 %v3679_v11 }
 0x111   : > { %5723 = vmatprep.mubr.bf16.mxu0 %v3680_v41  ;;  %v4911_v41 = vld [vmem:[%s6828_s15] sm:$0xff]  }
 0x112   : > { %v4912_v23 = vunpack.c.l.bf16 %v4911_v41  ;;  %v4913_v17 = vunpack.c.h.bf16 %v4911_v41 }
 0x113   : > { %5496 = vmatmul.mubr.bf16.gmra.mrb[20].mxu1 %v1836_v16  ;;  %v5069_v16 = vld [vmem:[%s6828_s15 + $0x8] sm:$0xff]  }
 0x114   : > { %5499 = vmatprep.mubr.bf16.mxu1 %v1837_v27  ;;  %v4916_v27 = vunpack.c.l.bf16 %v5069_v16  ;;  %v4917_v43 = vunpack.c.h.bf16 %v5069_v16 }
 0x118   : > { %5724 = vmatmul.mubr.bf16.gmra.mrb[8].mxu0 %v3681_v35 }
 0x119   : > { %5727 = vmatprep.mubr.bf16.mxu0 %v3682_v42 }
 0x11b   : > { %5500 = vmatmul.mubr.bf16.gmra.mrb[24].mxu1 %v1838_v39 }
 0x11c   : > { %5503 = vmatprep.mubr.bf16.mxu1 %v1839_v50 }
 0x120   : > { %5728 = vmatmul.mubr.bf16.gmra.mrb[12].mxu0 %v3683_v28  ;;  %v5070_v28 = vld [vmem:[%s6828_s15 + $0x10] sm:$0xff]  }
 0x121   : > { %5731 = vmatprep.mubr.bf16.mxu0 %v3684_v34 }
 0x123   : > { %5504 = vmatmul.mubr.bf16.gmra.mrb[28].mxu1 %v6711_v57  ;;  %v3687_v57 = vpack.c.bf16 %v3635_v6, %v3634_v49  ;;  %v4925_v49 = vunpack.c.h.bf16 %v5071_v3 }
 0x124   : > { %5539 = vmatprep.mubr.bf16.mxu1 %v6758_v53  ;;  %v3638_v53 = vld [vmem:[#allocation2 + $0x16a] sm:$0xff] }
 0x125   : > { %v3689_v14 = vpack.c.bf16 %v3639_v26, %v3638_v53 }
 0x128   : > { %5732 = vmatmul.mubr.bf16.gmra.mrb[16].mxu0 %v3685_v18 }
 0x129   : > { %5735 = vmatprep.mubr.bf16.mxu0 %v3686_v46  ;;  %v4920_v46 = vunpack.c.l.bf16 %v5070_v28 }
 0x12b   : > { %5540 = vmatmul.mubr.bf16.vlgmr.msra.gmra.mrb[16].mxu1 %v6760_v1  ;;  %v2159_v1 = vld [vmem:[#allocation2 + $0x169] sm:$0xff] }
 0x12c   : > { %5543 = vmatprep.mubr.bf16.mxu1 %v6768_v0  ;;  %v2209_v45 = vpack.c.bf16 %v2160_v48, %v2159_v1  ;;  %v3642_v0 = vld [vmem:[#allocation2 + $0x19a] sm:$0xff] }
 0x12d   : > { %v3691_v7 = vpack.c.bf16 %v3643_v60, %v3642_v0 }
 0x130   : > { %5736 = vmatmul.mubr.bf16.gmra.mrb[20].mxu0 %v3687_v57 }
 0x131   : > { %5739 = vmatprep.mubr.bf16.mxu0 %v3688_v22  ;;  %v4921_v22 = vunpack.c.h.bf16 %v5070_v28 }
 0x133   : > { %5544 = vmatmul.mubr.bf16.gmra.mrb[20].mxu1 %v6770_v8  ;;  %v2161_v8 = vld [vmem:[#allocation2 + $0x181] sm:$0xff] }
 0x134   : > { %5547 = vmatprep.mubr.bf16.mxu1 %v6779_v21  ;;  %v2210_v37 = vpack.c.bf16 %v2162_v5, %v2161_v8  ;;  %v5073_v8 = vld [vmem:[%s6828_s15 + $0x28] sm:$0xff]  }
 0x135   : > { %v4933_v16 = vunpack.c.h.bf16 %v5073_v8 }
 0x138   : > { %5740 = vmatmul.mubr.bf16.gmra.mrb[24].mxu0 %v3689_v14 }
 0x139   : > { %5743 = vmatprep.mubr.bf16.mxu0 %v3690_v25 }
 0x13b   : > { %5548 = vmatmul.mubr.bf16.gmra.mrb[24].mxu1 %v6781_v29 }
 0x13c   : > { %5551 = vmatprep.mubr.bf16.mxu1 %v2209_v45 }
 0x140   : > { %5744 = vmatmul.mubr.bf16.gmra.mrb[28].mxu0 %v3691_v7 }
 0x143   : > { %5552 = vmatmul.mubr.bf16.gmra.mrb[28].mxu1 %v2210_v37  ;;  %v5072_v37 = vld [vmem:[%s6828_s15 + $0x20] sm:$0xff]  }
 0x1be   : > { %v5477_v21 = vpop.f32.mrb[0].mxu1 }
 0x1bf   : > { %v1940_v55 = vpop.f32.mrb[1].mxu1 }
 0x1c0   : > { %v5478_v63 = vpop.f32.mrb[2].mxu1 }
 0x1c1   : > { %v1943_v44 = vpop.f32.mrb[3].mxu1 }
 0x1c6   : > { %v5481_v20 = vpop.f32.mrb[4].mxu1 }
 0x1c7   : > { %v1956_v38 = vpop.f32.mrb[5].mxu1 }
 0x1c8   : > { %v5482_v24 = vpop.f32.mrb[6].mxu1 }
 0x1c9   : > { %v1959_v12 = vpop.f32.mrb[7].mxu1 }
 0x1ce   : > { %v6814_v29 = vpop.f32.mrb[8].mxu1 }
 0x1cf   : > { %v6816_v15 = vpop.f32.mrb[9].mxu1 }
 0x1d0   : > { %v6818_v19 = vpop.f32.mrb[10].mxu1 }
 0x1d1   : > { %v6820_v31 = vpop.f32.mrb[11].mxu1 }
 0x1d6   : > { %v6822_v40 = vpop.f32.mrb[12].mxu1 }
 0x1d7   : > { %v6830_v47 = vpop.f32.mrb[13].mxu1 }
 0x1d8   : > { %v6832_v59 = vpop.f32.mrb[14].mxu1 }
 0x1d9   : > { %v6834_v11 = vpop.f32.mrb[15].mxu1 }
 0x1db   : > { %v5717_v32 = vpop.f32.mrb[0].mxu0 }
 0x1dc   : > { %v5763_v30 = vadd.f32 %v5717_v32, %v5477_v21  ;;  %v3791_v56 = vpop.f32.mrb[1].mxu0 }
 0x1dd   : > { %v5764_v62 = vadd.f32 %v3791_v56, %v1940_v55  ;;  %v5718_v13 = vpop.f32.mrb[2].mxu0 }
 0x1de   : > { %v4080_v35 = vadd.f32 %v5763_v30, %v4916_v27  ;;  %v5765_v39 = vadd.f32 %v5718_v13, %v5478_v63  ;;  %v3794_v42 = vpop.f32.mrb[3].mxu0 }
 0x1df   : > { %v4078_v50 = vadd.f32 %v5764_v62, %v4912_v23  ;;  %v5766_v58 = vadd.f32 %v3794_v42, %v1943_v44  ;;  %v4932_v44 = vunpack.c.l.bf16 %v5073_v8  ;;  %v4929_v23 = vunpack.c.h.bf16 %v5072_v37 }
 0x1e0   : > { %v4144_v4 = vmul.f32 0.01, %v4080_v35  ;;  %v4081_v10 = vadd.f32 %v5765_v39, %v4917_v43  ;;  %vm4112_vm0 = vcmp.gt.f32.partialorder %v4080_v35, 0.0 }
 0x1e1   : > { %v4142_v34 = vmul.f32 0.01, %v4078_v50  ;;  %v4079_v36 = vadd.f32 %v5766_v58, %v4913_v17  ;;  %vm4110_vm1 = vcmp.gt.f32.partialorder %v4078_v50, 0.0  ;;  %v5075_v58 = vld [vmem:[%s6828_s15 + $0x38] sm:$0xff]  }
 0x1e2   : > { %vm4113_vm2 = vcmp.gt.f32.partialorder %v4081_v10, 0.0  ;;  %v4145_v51 = vmul.f32 0.01, %v4081_v10  ;;  %v6840_v6 = vsel %vm4112_vm0, %v4080_v35, %v4144_v4 }
 0x1e3   : > { %vm4111_vm3 = vcmp.gt.f32.partialorder %v4079_v36, 0.0  ;;  %v4143_v2 = vmul.f32 0.01, %v4079_v36  ;;  %v5721_v18 = vpop.f32.mrb[4].mxu0  ;;  %v6850_v53 = vsel %vm4110_vm1, %v4078_v50, %v4142_v34 }
 0x1e4   : > { %v6848_v54 = vsel %vm4113_vm2, %v4081_v10, %v4145_v51  ;;  %v5767_v52 = vadd.f32 %v5721_v18, %v5481_v20  ;;  %v3807_v57 = vpop.f32.mrb[5].mxu0  ;;  %v5074_v10 = vld [vmem:[%s6828_s15 + $0x30] sm:$0xff]  }
 0x1e5   : > { %v4982_v26 = vpack.c.bf16 %v6848_v54, %v6840_v6  ;;  %v6854_v33 = vsel %vm4111_vm3, %v4079_v36, %v4143_v2  ;;  %v5768_v9 = vadd.f32 %v3807_v57, %v1956_v38  ;;  %v5722_v1 = vpop.f32.mrb[6].mxu0  ;;  %v4940_v36 = vunpack.c.l.bf16 %v5075_v58 }
 0x1e6   : > { %v4977_v48 = vpack.c.bf16 %v6854_v33, %v6850_v53  ;;  %v4084_v14 = vadd.f32 %v5767_v52, %v4924_v61  ;;  %v5769_v25 = vadd.f32 %v5722_v1, %v5482_v24  ;;  %v3810_v45 = vpop.f32.mrb[7].mxu0  ;;  %v4928_v24 = vunpack.c.l.bf16 %v5072_v37  ;;  %v5076_v37 = vld [vmem:[%s6828_s15 + $0x40] sm:$0xff]  }
 0x1e7   : > { %5084 = vst [vmem:[%s6846_s18 + $0x8] sm:$0xff] %v4982_v26   ;;  %v4082_v0 = vadd.f32 %v5768_v9, %v4920_v46  ;;  %v5770_v60 = vadd.f32 %v3810_v45, %v1959_v12  ;;  %v4936_v61 = vunpack.c.l.bf16 %v5074_v10  ;;  %v4941_v2 = vunpack.c.h.bf16 %v5075_v58 }
 0x1e8   : > { %4978 = vst [vmem:[%s6846_s18] sm:$0xff] %v4977_v48   ;;  %v4148_v5 = vmul.f32 0.01, %v4084_v14  ;;  %v4085_v7 = vadd.f32 %v5769_v25, %v4925_v49  ;;  %vm4116_vm4 = vcmp.gt.f32.partialorder %v4084_v14, 0.0  ;;  %v4937_v52 = vunpack.c.h.bf16 %v5074_v10 }
 0x1e9   : > { %v4146_v21 = vmul.f32 0.01, %v4082_v0  ;;  %v4083_v55 = vadd.f32 %v5770_v60, %v4921_v22  ;;  %vm4114_vm5 = vcmp.gt.f32.partialorder %v4082_v0, 0.0 }
 0x1ea   : > { %vm4117_vm6 = vcmp.gt.f32.partialorder %v4085_v7, 0.0  ;;  %v4149_v63 = vmul.f32 0.01, %v4085_v7  ;;  %v6862_v41 = vsel %vm4116_vm4, %v4084_v14, %v4148_v5  ;;  %v5077_v5 = vld [vmem:[%s6828_s15 + $0x48] sm:$0xff]  }
 0x1eb   : > { %vm4115_vm7 = vcmp.gt.f32.partialorder %v4083_v55, 0.0  ;;  %v4147_v20 = vmul.f32 0.01, %v4083_v55  ;;  %v5725_v38 = vpop.f32.mrb[8].mxu0  ;;  %v6867_v30 = vsel %vm4114_vm5, %v4082_v0, %v4146_v21 }
 0x1ec   : > { %v6864_v12 = vsel %vm4117_vm6, %v4085_v7, %v4149_v63  ;;  %v5771_v27 = vadd.f32 %v5725_v38, %v6814_v29  ;;  %v3823_v32 = vpop.f32.mrb[9].mxu0 }
 0x1ed   : > { %v4992_v56 = vpack.c.bf16 %v6864_v12, %v6862_v41  ;;  %v6871_v43 = vsel %vm4115_vm7, %v4083_v55, %v4147_v20  ;;  %v5772_v62 = vadd.f32 %v3823_v32, %v6816_v15  ;;  %v5726_v13 = vpop.f32.mrb[10].mxu0 }
 0x1ee   : > { %v4987_v17 = vpack.c.bf16 %v6871_v43, %v6867_v30  ;;  %v4088_v35 = vadd.f32 %v5771_v27, %v4932_v44  ;;  %v5773_v29 = vadd.f32 %v5726_v13, %v6818_v19  ;;  %v3826_v39 = vpop.f32.mrb[11].mxu0 }
 0x1ef   : > { %5086 = vst [vmem:[%s6846_s18 + $0x18] sm:$0xff] %v4992_v56   ;;  %v4086_v42 = vadd.f32 %v5772_v62, %v4928_v24  ;;  %v5774_v50 = vadd.f32 %v3826_v39, %v6820_v31  ;;  %v4944_v24 = vunpack.c.l.bf16 %v5076_v37 }
 0x1f0   : > { %5085 = vst [vmem:[%s6846_s18 + $0x10] sm:$0xff] %v4987_v17   ;;  %v4152_v3 = vmul.f32 0.01, %v4088_v35  ;;  %v4089_v4 = vadd.f32 %v5773_v29, %v4933_v16  ;;  %vm4120_vm8 = vcmp.gt.f32.partialorder %v4088_v35, 0.0  ;;  %v4949_v16 = vunpack.c.h.bf16 %v5077_v5 }
 0x1f1   : > { %v4150_v28 = vmul.f32 0.01, %v4086_v42  ;;  %v4087_v15 = vadd.f32 %v5774_v50, %v4929_v23  ;;  %vm4118_vm9 = vcmp.gt.f32.partialorder %v4086_v42, 0.0 }
 0x1f2   : > { %vm4121_vm10 = vcmp.gt.f32.partialorder %v4089_v4, 0.0  ;;  %v4153_v34 = vmul.f32 0.01, %v4089_v4  ;;  %v6882_v18 = vsel %vm4120_vm8, %v4088_v35, %v4152_v3 }
 0x1f3   : > { %vm4119_vm11 = vcmp.gt.f32.partialorder %v4087_v15, 0.0  ;;  %v4151_v51 = vmul.f32 0.01, %v4087_v15  ;;  %v5729_v19 = vpop.f32.mrb[12].mxu0  ;;  %v6887_v57 = vsel %vm4118_vm9, %v4086_v42, %v4150_v28  ;;  %v4945_v42 = vunpack.c.h.bf16 %v5076_v37  ;;  %v5079_v28 = vld [vmem:[%s6828_s15 + $0x58] sm:$0xff]  }
 0x1f4   : > { %v6884_v31 = vsel %vm4121_vm10, %v4089_v4, %v4153_v34  ;;  %v5775_v46 = vadd.f32 %v5729_v19, %v6822_v40  ;;  %v3839_v49 = vpop.f32.mrb[13].mxu0 }
 0x1f5   : > { %v5002_v22 = vpack.c.bf16 %v6884_v31, %v6882_v18  ;;  %v6891_v26 = vsel %vm4119_vm11, %v4087_v15, %v4151_v51  ;;  %v5776_v9 = vadd.f32 %v3839_v49, %v6830_v47  ;;  %v5730_v1 = vpop.f32.mrb[14].mxu0 }
 0x1f6   : > { %v4997_v48 = vpack.c.bf16 %v6891_v26, %v6887_v57  ;;  %v4092_v14 = vadd.f32 %v5775_v46, %v4940_v36  ;;  %v5777_v40 = vadd.f32 %v5730_v1, %v6832_v59  ;;  %v3842_v25 = vpop.f32.mrb[15].mxu0  ;;  %v4948_v59 = vunpack.c.l.bf16 %v5077_v5  ;;  %v5078_v36 = vld [vmem:[%s6828_s15 + $0x50] sm:$0xff]  }
 0x1f7   : > { %5088 = vst [vmem:[%s6846_s18 + $0x28] sm:$0xff] %v5002_v22   ;;  %v4090_v45 = vadd.f32 %v5776_v9, %v4936_v61  ;;  %v5778_v0 = vadd.f32 %v3842_v25, %v6834_v11  ;;  %v4956_v46 = vunpack.c.l.bf16 %v5079_v28  ;;  %v4952_v9 = vunpack.c.l.bf16 %v5078_v36 }
 0x1f8   : > { %5087 = vst [vmem:[%s6846_s18 + $0x20] sm:$0xff] %v4997_v48   ;;  %v4156_v60 = vmul.f32 0.01, %v4092_v14  ;;  %v4093_v8 = vadd.f32 %v5777_v40, %v4941_v2  ;;  %vm4124_vm12 = vcmp.gt.f32.partialorder %v4092_v14, 0.0  ;;  %v4957_v1 = vunpack.c.h.bf16 %v5079_v28 }
 0x1f9   : > { %v4154_v7 = vmul.f32 0.01, %v4090_v45  ;;  %v4091_v47 = vadd.f32 %v5778_v0, %v4937_v52  ;;  %vm4122_vm13 = vcmp.gt.f32.partialorder %v4090_v45, 0.0  ;;  %v4953_v0 = vunpack.c.h.bf16 %v5078_v36 }
 0x1fa   : > { %vm4125_vm14 = vcmp.gt.f32.partialorder %v4093_v8, 0.0  ;;  %v4157_v21 = vmul.f32 0.01, %v4093_v8  ;;  %v6902_v44 = vsel %vm4124_vm12, %v4092_v14, %v4156_v60 }
 0x1fb   : > { %vm4123_vm15 = vcmp.gt.f32.partialorder %v4091_v47, 0.0  ;;  %v4155_v55 = vmul.f32 0.01, %v4091_v47  ;;  %v5733_v63 = vpop.f32.mrb[16].mxu0  ;;  %v6906_v27 = vsel %vm4122_vm13, %v4090_v45, %v4154_v7 }
 0x1fc   : > { %v6904_v20 = vsel %vm4125_vm14, %v4093_v8, %v4157_v21  ;;  %v3855_v38 = vpop.f32.mrb[17].mxu0 }
 0x1fd   : > { %v5012_v32 = vpack.c.bf16 %v6904_v20, %v6902_v44  ;;  %v6910_v23 = vsel %vm4123_vm15, %v4091_v47, %v4155_v55  ;;  %v5734_v13 = vpop.f32.mrb[18].mxu0 }
 0x1fe   : > { %v5541_v11 = vpop.f32.mrb[16].mxu1  ;;  %v5007_v17 = vpack.c.bf16 %v6910_v23, %v6906_v27  ;;  %v3858_v39 = vpop.f32.mrb[19].mxu0 }
 0x1ff   : > { %v5779_v56 = vadd.f32 %v5733_v63, %v5541_v11  ;;  %v2374_v62 = vpop.f32.mrb[17].mxu1  ;;  %5090 = vst [vmem:[%s6846_s18 + $0x38] sm:$0xff] %v5012_v32  }
 0x200   : > { %v5780_v35 = vadd.f32 %v3855_v38, %v2374_v62  ;;  %v5542_v29 = vpop.f32.mrb[18].mxu1  ;;  %5089 = vst [vmem:[%s6846_s18 + $0x30] sm:$0xff] %v5007_v17  }
 0x201   : > { %v4096_v50 = vadd.f32 %v5779_v56, %v4948_v59  ;;  %v5781_v58 = vadd.f32 %v5734_v13, %v5542_v29  ;;  %v2377_v3 = vpop.f32.mrb[19].mxu1  ;;  %v5080_v56 = vld [vmem:[%s6828_s15 + $0x60] sm:$0xff]  }
 0x202   : > { %v4094_v4 = vadd.f32 %v5780_v35, %v4944_v24  ;;  %v5782_v10 = vadd.f32 %v3858_v39, %v2377_v3  ;;  %v5081_v24 = vld [vmem:[%s6828_s15 + $0x68] sm:$0xff]   ;;  %v4961_v36 = vunpack.c.h.bf16 %v5080_v56 }
 0x203   : > { %v4160_v15 = vmul.f32 0.01, %v4096_v50  ;;  %v4097_v34 = vadd.f32 %v5781_v58, %v4949_v16  ;;  %vm4128_vm0 = vcmp.gt.f32.partialorder %v4096_v50, 0.0  ;;  %v5737_v2 = vpop.f32.mrb[20].mxu0  ;;  %v4964_v29 = vunpack.c.l.bf16 %v5081_v24 }
 0x204   : > { %v4158_v51 = vmul.f32 0.01, %v4094_v4  ;;  %v4095_v19 = vadd.f32 %v5782_v10, %v4945_v42  ;;  %vm4126_vm1 = vcmp.gt.f32.partialorder %v4094_v4, 0.0  ;;  %v3871_v22 = vpop.f32.mrb[21].mxu0  ;;  %v4960_v58 = vunpack.c.l.bf16 %v5080_v56 }
 0x205   : > { %vm4129_vm2 = vcmp.gt.f32.partialorder %v4097_v34, 0.0  ;;  %v4161_v61 = vmul.f32 0.01, %v4097_v34  ;;  %v6918_v48 = vsel %vm4128_vm0, %v4096_v50, %v4160_v15  ;;  %v5738_v45 = vpop.f32.mrb[22].mxu0  ;;  %v4965_v3 = vunpack.c.h.bf16 %v5081_v24 }
 0x206   : > { %vm4127_vm3 = vcmp.gt.f32.partialorder %v4095_v19, 0.0  ;;  %v4159_v49 = vmul.f32 0.01, %v4095_v19  ;;  %v5545_v52 = vpop.f32.mrb[20].mxu1  ;;  %v6923_v60 = vsel %vm4126_vm1, %v4094_v4, %v4158_v51  ;;  %v3874_v37 = vpop.f32.mrb[23].mxu0 }
 0x207   : > { %v6920_v14 = vsel %vm4129_vm2, %v4097_v34, %v4161_v61  ;;  %v5783_v40 = vadd.f32 %v5737_v2, %v5545_v52  ;;  %v2390_v25 = vpop.f32.mrb[21].mxu1 }
 0x208   : > { %v5022_v8 = vpack.c.bf16 %v6920_v14, %v6918_v48  ;;  %v6927_v5 = vsel %vm4127_vm3, %v4095_v19, %v4159_v49  ;;  %v5784_v7 = vadd.f32 %v3871_v22, %v2390_v25  ;;  %v5546_v47 = vpop.f32.mrb[22].mxu1 }
 0x209   : > { %v5017_v21 = vpack.c.bf16 %v6927_v5, %v6923_v60  ;;  %v4100_v55 = vadd.f32 %v5783_v40, %v4956_v46  ;;  %v5785_v63 = vadd.f32 %v5738_v45, %v5546_v47  ;;  %v2393_v59 = vpop.f32.mrb[23].mxu1  ;;  %v5083_v45 = vld [vmem:[%s6828_s15 + $0x78] sm:$0xff]  }
 0x20a   : > { %5092 = vst [vmem:[%s6846_s18 + $0x48] sm:$0xff] %v5022_v8   ;;  %v4098_v11 = vadd.f32 %v5784_v7, %v4952_v9  ;;  %v5786_v38 = vadd.f32 %v3874_v37, %v2393_v59  ;;  %v5082_v7 = vld [vmem:[%s6828_s15 + $0x70] sm:$0xff]  }
 0x20b   : > { %5091 = vst [vmem:[%s6846_s18 + $0x40] sm:$0xff] %v5017_v21   ;;  %v4164_v16 = vmul.f32 0.01, %v4100_v55  ;;  %v4101_v32 = vadd.f32 %v5785_v63, %v4957_v1  ;;  %vm4132_vm4 = vcmp.gt.f32.partialorder %v4100_v55, 0.0  ;;  %v5741_v35 = vpop.f32.mrb[24].mxu0  ;;  %v4972_v63 = vunpack.c.l.bf16 %v5083_v45 }
 0x20c   : > { %v4162_v62 = vmul.f32 0.01, %v4098_v11  ;;  %v4099_v13 = vadd.f32 %v5786_v38, %v4953_v0  ;;  %vm4130_vm5 = vcmp.gt.f32.partialorder %v4098_v11, 0.0  ;;  %v3887_v50 = vpop.f32.mrb[25].mxu0  ;;  %v4968_v24 = vunpack.c.l.bf16 %v5082_v7 }
 0x20d   : > { %vm4133_vm6 = vcmp.gt.f32.partialorder %v4101_v32, 0.0  ;;  %v4165_v17 = vmul.f32 0.01, %v4101_v32  ;;  %v6935_v4 = vsel %vm4132_vm4, %v4100_v55, %v4164_v16  ;;  %v5742_v34 = vpop.f32.mrb[26].mxu0  ;;  %v4973_v16 = vunpack.c.h.bf16 %v5083_v45 }
 0x20e   : > { %vm4131_vm7 = vcmp.gt.f32.partialorder %v4099_v13, 0.0  ;;  %v4163_v39 = vmul.f32 0.01, %v4099_v13  ;;  %v5549_v42 = vpop.f32.mrb[24].mxu1  ;;  %v6940_v51 = vsel %vm4130_vm5, %v4098_v11, %v4162_v62  ;;  %v3890_v49 = vpop.f32.mrb[27].mxu0 }
 0x20f   : > { %v6937_v10 = vsel %vm4133_vm6, %v4101_v32, %v4165_v17  ;;  %v5787_v28 = vadd.f32 %v5741_v35, %v5549_v42  ;;  %v2406_v15 = vpop.f32.mrb[25].mxu1  ;;  %v4969_v35 = vunpack.c.h.bf16 %v5082_v7 }
 0x210   : > { %v5032_v19 = vpack.c.bf16 %v6937_v10, %v6935_v4  ;;  %v6944_v61 = vsel %vm4131_vm7, %v4099_v13, %v4163_v39  ;;  %v5788_v2 = vadd.f32 %v3887_v50, %v2406_v15  ;;  %v5550_v46 = vpop.f32.mrb[26].mxu1 }
 0x211   : > { %v5027_v52 = vpack.c.bf16 %v6944_v61, %v6940_v51  ;;  %v4104_v22 = vadd.f32 %v5787_v28, %v4964_v29  ;;  %v5789_v9 = vadd.f32 %v5742_v34, %v5550_v46  ;;  %v2409_v1 = vpop.f32.mrb[27].mxu1 }
 0x212   : > { %5094 = vst [vmem:[%s6846_s18 + $0x58] sm:$0xff] %v5032_v19   ;;  %v4102_v40 = vadd.f32 %v5788_v2, %v4960_v58  ;;  %v5790_v25 = vadd.f32 %v3890_v49, %v2409_v1 }
 0x213   : > { %5093 = vst [vmem:[%s6846_s18 + $0x50] sm:$0xff] %v5027_v52   ;;  %v4168_v0 = vmul.f32 0.01, %v4104_v22  ;;  %v4105_v8 = vadd.f32 %v5789_v9, %v4965_v3  ;;  %vm4136_vm8 = vcmp.gt.f32.partialorder %v4104_v22, 0.0  ;;  %v5745_v55 = vpop.f32.mrb[28].mxu0 }
 0x214   : > { %v4166_v47 = vmul.f32 0.01, %v4102_v40  ;;  %v4103_v37 = vadd.f32 %v5790_v25, %v4961_v36  ;;  %vm4134_vm9 = vcmp.gt.f32.partialorder %v4102_v40, 0.0  ;;  %v3903_v38 = vpop.f32.mrb[29].mxu0 }
 0x215   : > { %vm4137_vm10 = vcmp.gt.f32.partialorder %v4105_v8, 0.0  ;;  %v4169_v21 = vmul.f32 0.01, %v4105_v8  ;;  %v6952_v32 = vsel %vm4136_vm8, %v4104_v22, %v4168_v0  ;;  %v5746_v17 = vpop.f32.mrb[30].mxu0 }
 0x216   : > { %vm4135_vm11 = vcmp.gt.f32.partialorder %v4103_v37, 0.0  ;;  %v4167_v59 = vmul.f32 0.01, %v4103_v37  ;;  %v5553_v11 = vpop.f32.mrb[28].mxu1  ;;  %v6957_v29 = vsel %vm4134_vm9, %v4102_v40, %v4166_v47  ;;  %v3906_v3 = vpop.f32.mrb[31].mxu0  ;;  %v6120_v47 = vmov (!%p4808_p4), 0.0  }
 0x217   : > { %v6954_v56 = vsel %vm4137_vm10, %v4105_v8, %v4169_v21  ;;  %v5791_v62 = vadd.f32 %v5745_v55, %v5553_v11  ;;  %v2422_v13 = vpop.f32.mrb[29].mxu1  ;;  %4370 = vst [vmem:[%s7105_s6] sm:$0x1] (!%p4808_p4), %v6120_v47  ;;  %4371 = vst [vmem:[%s7106_s7] sm:$0x1] (!%p4808_p4), %v6120_v47 }
 0x218   : > { %v5042_v39 = vpack.c.bf16 %v6954_v56, %v6952_v32  ;;  %v6961_v42 = vsel %vm4135_vm11, %v4103_v37, %v4167_v59  ;;  %v5792_v50 = vadd.f32 %v3903_v38, %v2422_v13  ;;  %v5554_v58 = vpop.f32.mrb[30].mxu1 }
 0x219   : > { %v5037_v28 = vpack.c.bf16 %v6961_v42, %v6957_v29  ;;  %v4108_v15 = vadd.f32 %v5791_v62, %v4972_v63  ;;  %v5793_v34 = vadd.f32 %v5746_v17, %v5554_v58  ;;  %v2425_v36 = vpop.f32.mrb[31].mxu1 }
 0x21a   : > { %5096 = vst [vmem:[%s6846_s18 + $0x68] sm:$0xff] %v5042_v39   ;;  %v4106_v19 = vadd.f32 %v5792_v50, %v4968_v24  ;;  %v5794_v2 = vadd.f32 %v3906_v3, %v2425_v36 }
 0x21b   : > { %5095 = vst [vmem:[%s6846_s18 + $0x60] sm:$0xff] %v5037_v28   ;;  %v4172_v46 = vmul.f32 0.01, %v4108_v15  ;;  %v4109_v49 = vadd.f32 %v5793_v34, %v4973_v16  ;;  %vm4140_vm12 = vcmp.gt.f32.partialorder %v4108_v15, 0.0 }
 0x21c   : > { %v4170_v52 = vmul.f32 0.01, %v4106_v19  ;;  %v4107_v22 = vadd.f32 %v5794_v2, %v4969_v35  ;;  %vm4138_vm13 = vcmp.gt.f32.partialorder %v4106_v19, 0.0 }
 0x21d   : > { %vm4141_vm14 = vcmp.gt.f32.partialorder %v4109_v49, 0.0  ;;  %v4173_v9 = vmul.f32 0.01, %v4109_v49  ;;  %v6967_v40 = vsel %vm4140_vm12, %v4108_v15, %v4172_v46  ;;  %4369 = sbr.rel (%p4808_p4) target bundleno = 548 (0x224), region = 44 }
 0x21e   : > { %vm4139_vm15 = vcmp.gt.f32.partialorder %v4107_v22, 0.0  ;;  %v4171_v1 = vmul.f32 0.01, %v4107_v22  ;;  %v6971_v45 = vsel %vm4138_vm13, %v4106_v19, %v4170_v52 }
 0x21f   : > { %v6969_v25 = vsel %vm4141_vm14, %v4109_v49, %v4173_v9 }
 0x220   : > { %v5052_v0 = vpack.c.bf16 %v6969_v25, %v6967_v40  ;;  %v6975_v8 = vsel %vm4139_vm15, %v4107_v22, %v4171_v1 }
 0x221   : > { %v5047_v7 = vpack.c.bf16 %v6975_v8, %v6971_v45 }
 0x222   : > { %5098 = vst [vmem:[%s6846_s18 + $0x78] sm:$0xff] %v5052_v0  }
 0x223   : > { %5097 = vst [vmem:[%s6846_s18 + $0x70] sm:$0xff] %v5047_v7  }
 0x224 PF: > { %v4373_v37 = vadd.f32 %v6854_v33, %v6850_v53  ;;  %v4413_v63 = vmul.f32 %v6850_v53, %v6850_v53  ;;  %v4414_v59 = vmul.f32 %v6854_v33, %v6854_v33  ;;  %v4415_v38 = vmul.f32 %v6840_v6, %v6840_v6 }
 0x225   : > { %v4416_v16 = vmul.f32 %v6848_v54, %v6848_v54  ;;  %v4417_v17 = vmul.f32 %v6867_v30, %v6867_v30  ;;  %v4418_v33 = vmul.f32 %v6871_v43, %v6871_v43  ;;  %v4419_v50 = vmul.f32 %v6862_v41, %v6862_v41 }
 0x226   : > { %v4374_v21 = vadd.f32 %v4373_v37, %v6840_v6  ;;  %v4445_v62 = vadd.f32 %v4414_v59, %v4413_v63  ;;  %v4420_v3 = vmul.f32 %v6864_v12, %v6864_v12  ;;  %v4421_v15 = vmul.f32 %v6887_v57, %v6887_v57 }
 0x227   : > { %v4422_v36 = vmul.f32 %v6891_v26, %v6891_v26  ;;  %v4423_v2 = vmul.f32 %v6882_v18, %v6882_v18  ;;  %v4424_v49 = vmul.f32 %v6884_v31, %v6884_v31  ;;  %v4425_v22 = vmul.f32 %v6906_v27, %v6906_v27 }
 0x228   : > { %v4375_v55 = vadd.f32 %v4374_v21, %v6848_v54  ;;  %v4446_v53 = vadd.f32 %v4445_v62, %v4415_v38  ;;  %v4426_v1 = vmul.f32 %v6910_v23, %v6910_v23  ;;  %v4427_v7 = vmul.f32 %v6902_v44, %v6902_v44 }
 0x229   : > { %v4428_v37 = vmul.f32 %v6904_v20, %v6904_v20  ;;  %v4430_v59 = vmul.f32 %v6927_v5, %v6927_v5  ;;  %v4431_v38 = vmul.f32 %v6918_v48, %v6918_v48 }
 0x22a   : > { %v4376_v11 = vadd.f32 %v4375_v55, %v6867_v30  ;;  %v4447_v39 = vadd.f32 %v4446_v53, %v4416_v16  ;;  %v4429_v55 = vmul.f32 %v6923_v60, %v6923_v60  ;;  %v4432_v16 = vmul.f32 %v6920_v14, %v6920_v14 }
 0x22b   : > { %v4434_v53 = vmul.f32 %v6944_v61, %v6944_v61 }
 0x22c   : > { %v4377_v24 = vadd.f32 %v4376_v11, %v6871_v43  ;;  %v4448_v58 = vadd.f32 %v4447_v39, %v4417_v17 }
 0x22e   : > { %v4378_v13 = vadd.f32 %v4377_v24, %v6862_v41  ;;  %v4449_v28 = vadd.f32 %v4448_v58, %v4418_v33  ;;  %v4435_v33 = vmul.f32 %v6935_v4, %v6935_v4  ;;  %v4437_v58 = vmul.f32 %v6957_v29, %v6957_v29 }
 0x230   : > { %v4379_v35 = vadd.f32 %v4378_v13, %v6864_v12  ;;  %v4450_v34 = vadd.f32 %v4449_v28, %v4419_v50  ;;  %v4433_v13 = vmul.f32 %v6940_v51, %v6940_v51 }
 0x232   : > { %v4380_v6 = vadd.f32 %v4379_v35, %v6887_v57  ;;  %v4451_v19 = vadd.f32 %v4450_v34, %v4420_v3  ;;  %v4438_v3 = vmul.f32 %v6961_v42, %v6961_v42  ;;  %v4440_v34 = vmul.f32 %v6954_v56, %v6954_v56 }
 0x234   : > { %v4381_v54 = vadd.f32 %v4380_v6, %v6891_v26  ;;  %v4452_v46 = vadd.f32 %v4451_v19, %v4421_v15  ;;  %v4436_v6 = vmul.f32 %v6937_v10, %v6937_v10 }
 0x236   : > { %v4382_v30 = vadd.f32 %v4381_v54, %v6882_v18  ;;  %v4453_v52 = vadd.f32 %v4452_v46, %v4422_v36  ;;  %v4441_v36 = vmul.f32 %v6971_v45, %v6971_v45  ;;  %v4443_v46 = vmul.f32 %v6967_v40, %v6967_v40 }
 0x238   : > { %v4383_v43 = vadd.f32 %v4382_v30, %v6884_v31  ;;  %v4454_v9 = vadd.f32 %v4453_v52, %v4423_v2  ;;  %v4439_v30 = vmul.f32 %v6952_v32, %v6952_v32 }
 0x23a   : > { %v4384_v41 = vadd.f32 %v4383_v43, %v6906_v27  ;;  %v4455_v0 = vadd.f32 %v4454_v9, %v4424_v49 }
 0x23c   : > { %v4385_v12 = vadd.f32 %v4384_v41, %v6910_v23  ;;  %v4456_v47 = vadd.f32 %v4455_v0, %v4425_v22  ;;  %v4442_v41 = vmul.f32 %v6975_v8, %v6975_v8 }
 0x23e   : > { %v4386_v57 = vadd.f32 %v4385_v12, %v6902_v44  ;;  %v4457_v21 = vadd.f32 %v4456_v47, %v4426_v1 }
 0x240   : > { %v4387_v26 = vadd.f32 %v4386_v57, %v6904_v20  ;;  %v4458_v63 = vadd.f32 %v4457_v21, %v4427_v7 }
 0x242   : > { %v4388_v18 = vadd.f32 %v4387_v26, %v6923_v60  ;;  %v4459_v11 = vadd.f32 %v4458_v63, %v4428_v37 }
 0x244   : > { %v4389_v31 = vadd.f32 %v4388_v18, %v6927_v5  ;;  %v4460_v24 = vadd.f32 %v4459_v11, %v4429_v55 }
 0x246   : > { %v4390_v27 = vadd.f32 %v4389_v31, %v6918_v48  ;;  %v4461_v62 = vadd.f32 %v4460_v24, %v4430_v59  ;;  %v4412_v31 = vld [vmem:[%s7106_s7] sm:$0x1] }
 0x248   : > { %v4391_v23 = vadd.f32 %v4390_v27, %v6920_v14  ;;  %v4462_v17 = vadd.f32 %v4461_v62, %v4431_v38 }
 0x24a   : > { %v4392_v44 = vadd.f32 %v4391_v23, %v6940_v51  ;;  %v4463_v35 = vadd.f32 %v4462_v17, %v4432_v16 }
 0x24c   : > { %v4393_v20 = vadd.f32 %v4392_v44, %v6944_v61  ;;  %v4464_v39 = vadd.f32 %v4463_v35, %v4433_v13 }
 0x24e   : > { %v4394_v60 = vadd.f32 %v4393_v20, %v6935_v4  ;;  %v4465_v50 = vadd.f32 %v4464_v39, %v4434_v53 }
 0x250   : > { %v4395_v5 = vadd.f32 %v4394_v60, %v6937_v10  ;;  %v4466_v54 = vadd.f32 %v4465_v50, %v4435_v33 }
 0x252   : > { %v4396_v48 = vadd.f32 %v4395_v5, %v6957_v29  ;;  %v4467_v28 = vadd.f32 %v4466_v54, %v4436_v6 }
 0x254   : > { %v4397_v14 = vadd.f32 %v4396_v48, %v6961_v42  ;;  %v4468_v15 = vadd.f32 %v4467_v28, %v4437_v58 }
 0x256   : > { %v4398_v51 = vadd.f32 %v4397_v14, %v6952_v32  ;;  %v4469_v43 = vadd.f32 %v4468_v15, %v4438_v3 }
 0x258   : > { %v4399_v61 = vadd.f32 %v4398_v51, %v6954_v56  ;;  %v4470_v19 = vadd.f32 %v4469_v43, %v4439_v30  ;;  %v4444_v56 = vmul.f32 %v6969_v25, %v6969_v25 }
 0x25a   : > { %v4400_v4 = vadd.f32 %v4399_v61, %v6971_v45  ;;  %v4471_v2 = vadd.f32 %v4470_v19, %v4440_v34 }
 0x25c   : > { %v4401_v10 = vadd.f32 %v4400_v4, %v6975_v8  ;;  %v4472_v12 = vadd.f32 %v4471_v2, %v4441_v36  ;;  %v4372_v8 = vld [vmem:[%s7105_s6] sm:$0x1] }
 0x25e   : > { %v4402_v29 = vadd.f32 %v4401_v10, %v6967_v40  ;;  %v4473_v52 = vadd.f32 %v4472_v12, %v4442_v41 }
 0x260   : > { %v4403_v42 = vadd.f32 %v4402_v29, %v6969_v25  ;;  %v4474_v22 = vadd.f32 %v4473_v52, %v4443_v46 }
 0x262   : > { %v4404_v32 = vrot.slane %v4403_v42, 4  ;;  %v4475_v9 = vadd.f32 %v4474_v22, %v4444_v56 }
 0x264   : > { %v4405_v49 = vadd.f32 %v4404_v32, %v4403_v42  ;;  %v4476_v1 = vrot.slane %v4475_v9, 4 }
 0x266   : > { %v4406_v57 = vrot.slane %v4405_v49, 2  ;;  %v4477_v18 = vadd.f32 %v4476_v1, %v4475_v9 }
 0x268   : > { %v4407_v45 = vadd.f32 %v4406_v57, %v4405_v49  ;;  %v4478_v40 = vrot.slane %v4477_v18, 2 }
 0x26a   : > { %v4408_v26 = vrot.slane %v4407_v45, 1  ;;  %v4479_v25 = vadd.f32 %v4478_v40, %v4477_v18 }
 0x26c   : > { %v4409_v0 = vadd.f32 %v4408_v26, %v4407_v45  ;;  %v4480_v47 = vrot.slane %v4479_v25, 1 }
 0x26e   : > { %v4410_v7 = vadd.f32 %v4409_v0, %v4372_v8  ;;  %v4481_v37 = vadd.f32 %v4480_v47, %v4479_v25 }
 0x270   : > { %4411 = vst [vmem:[%s7105_s6] sm:$0x1] %v4410_v7  ;;  %v4482_v21 = vadd.f32 %v4481_v37, %v4412_v31 }
 0x272   : > { %4483 = vst [vmem:[%s7106_s7] sm:$0x1] %v4482_v21 }
 0x273 PF: > { %s18_s24 = sadd.s32 1, %s6116_s24  }
 0x274   : > { %p15_p5 = scmp.ge.s32.totalorder %s18_s24, 4  }
 0x276   :  { %17 = sbr.rel (!%p15_p5) target bundleno = 1 (0x1), region = 103 }

</bundles_post_ra>
